<compile_context>
chip_gen: v6e
topology: v6e:2x2x1
jax: 0.10.0
libtpu: 0.0.40
codegen_flags: <defaults>
</compile_context>

<pallas_src>
import jax
import jax.numpy as jnp
from jax.experimental import pallas as pl
from jax.experimental.pallas import tpu as pltpu


def chunk_forward_kernel(xT_ref, weT_ref, beT_ref, w1_ref, b1_ref, w2T_ref, b2T_ref,
                         out_ref, pooled_ref):
    # ---- extractor (frozen / no-grad in the reference): rppg^T = We^T @ x^T + be^T
    rppgT = jnp.dot(weT_ref[...], xT_ref[...],
                    preferred_element_type=jnp.float32) + beT_ref[...]      # (T, TN) f32

    # ---- per-chunk normalization over T (sublane axis), two-pass unbiased var
    T = rppgT.shape[0]
    mean = jnp.sum(rppgT, axis=0, keepdims=True) * (1.0 / T)                # (1, TN)
    cent = rppgT - mean
    var = jnp.sum(cent * cent, axis=0, keepdims=True) * (1.0 / (T - 1))     # >= 0
    inv = pl.reciprocal(jnp.sqrt(var) + 1e-6, approx=True)                  # EUP slot
    rnorm = cent * inv                                                      # (T, TN) f32

    # ---- TemporalBranch with the T-pool fused in -----------------------------
    # For each hidden unit h: hid = ReLU(rnorm * w1[h] + b1[h]) is only (T, TN)
    # (16 vregs at TN=128) and is reduced over T immediately; only the (1, TN)
    # pooled row is stored.  Static Python loop -> static slices only, no
    # dynamic lane/sublane indexing, full scheduler visibility.
    H = pooled_ref.shape[0]
    for h in range(H):
        w = w1_ref[h:h + 1, :]                                              # (1, 1) f32
        b = b1_ref[h:h + 1, :]                                              # (1, 1) f32
        hid = jnp.maximum(rnorm * w + b, 0.0)                               # (T, TN)
        pooled_ref[h:h + 1, :] = jnp.sum(hid, axis=0, keepdims=True)        # (1, TN)

    # ---- output projection: emb^T = (w2/T)^T @ pooled^T + b2^T ---------------
    pooled = pooled_ref[...].astype(w2T_ref.dtype)                          # (H, TN)
    out_ref[...] = (jnp.dot(w2T_ref[...], pooled,
                            preferred_element_type=jnp.float32)
                    + b2T_ref[...]).astype(out_ref.dtype)                   # (D, TN)


def _round_up(a, b):
    return (a + b - 1) // b * b


def prepare_params(params, mxu_dtype=jnp.bfloat16):
    """One-time re-layout of the frozen module weights (hoisted off the call path)."""
    we, be, w1, b1, w2, b2 = [jnp.asarray(p, jnp.float32) for p in params]
    T = we.shape[1]
    weT = we.T.astype(mxu_dtype)                   # (T, L)  MXU operand
    beT = be.T                                     # (T, 1)  f32
    w1c = w1.T                                     # (H, 1)  f32
    b1c = b1.T                                     # (H, 1)  f32
    w2Ts = (w2 * (1.0 / T)).T.astype(mxu_dtype)    # (D, H)  mean-pool 1/T folded in
    b2T = b2.T                                     # (D, 1)  f32
    return weT, beT, w1c, b1c, w2Ts, b2T


def chunk_forward(x, prepped, *, block_n=128):
    """x: (N, 1, L) rPPG snippet batch; prepped: output of prepare_params()."""
    weT, beT, w1c, b1c, w2Ts, b2T = prepped
    N, L = x.shape[0], x.shape[-1]
    D = w2Ts.shape[0]
    H = w1c.shape[0]
    mxu_dtype = weT.dtype

    x2d = x.reshape(N, L).astype(jnp.float32)      # squeeze the channel dim

    # Batch lives on the LANE axis: blocked tiles must be multiples of 128;
    # small batches use a single full-extent block instead.
    if N > block_n:
        assert block_n % 128 == 0, "block_n must be a multiple of 128 when blocking"
        TN = block_n
        Npad = _round_up(N, TN)
    else:
        TN = Npad = _round_up(max(N, 1), 8)
    xT = jnp.zeros((L, Npad), jnp.float32).at[:, :N].set(x2d.T).astype(mxu_dtype)

    def const_spec(a):
        nd = a.ndim
        return pl.BlockSpec(a.shape, lambda i, _nd=nd: (0,) * _nd)

    out = pl.pallas_call(
        chunk_forward_kernel,
        out_shape=jax.ShapeDtypeStruct((D, Npad), jnp.float32),
        grid=(Npad // TN,),
        in_specs=[
            pl.BlockSpec((L, TN), lambda i: (0, i)),   # x^T: blocked over batch lanes
            const_spec(weT),                           # frozen weights stay VMEM-resident
            const_spec(beT),
            const_spec(w1c),
            const_spec(b1c),
            const_spec(w2Ts),
            const_spec(b2T),
        ],
        out_specs=pl.BlockSpec((D, TN), lambda i: (0, i)),
        scratch_shapes=[pltpu.VMEM((H, TN), jnp.float32)],   # pooled accumulator
        compiler_params=pltpu.CompilerParams(
            dimension_semantics=("parallel",),          # megacore / v7x 2-TC sharding
            vmem_limit_bytes=32 * 1024 * 1024,          # safe on v7x's 64 MiB VMEM
        ),
    )(xT, weT, beT, w1c, b1c, w2Ts, b2T)

    return out[:, :N].T                                 # (N, D)


def reference(x, params):
    we, be, w1, b1, w2, b2 = params
    x2d = x.reshape(x.shape[0], x.shape[-1]).astype(jnp.float32)
    rppg = x2d @ we + be
    T = rppg.shape[1]
    mean = rppg.mean(axis=1, keepdims=True)
    std = jnp.sqrt(jnp.sum((rppg - mean) ** 2, axis=1, keepdims=True) / (T - 1))
    norm = (rppg - mean) / (std + 1e-6)
    hidden = jnp.maximum(norm[:, :, None] * w1[None, :, :] + b1[None, :, :], 0.0)
    pooled = hidden.mean(axis=1)
    return pooled @ w2 + b2


def make_params(key, L=128, T=128, H=32, D=16):
    ks = jax.random.split(key, 6)
    we = jax.random.normal(ks[0], (L, T), jnp.float32) * (1.0 / jnp.sqrt(L))
    be = jax.random.normal(ks[1], (1, T), jnp.float32) * 0.01
    w1 = jax.random.normal(ks[2], (1, H), jnp.float32)
    b1 = jax.random.normal(ks[3], (1, H), jnp.float32) * 0.01
    w2 = jax.random.normal(ks[4], (H, D), jnp.float32) * (1.0 / jnp.sqrt(H))
    b2 = jax.random.normal(ks[5], (1, D), jnp.float32) * 0.01
    return we, be, w1, b1, w2, b2


if __name__ == "__main__":
    key = jax.random.PRNGKey(0)
    k_x, k_p = jax.random.split(key)

    # Small shapes consistent with the module: (N, 1, 128) rPPG snippets.
    N, L, T, H, D = 24, 128, 128, 32, 16
    x = jax.random.normal(k_x, (N, 1, L), jnp.float32)
    params = make_params(k_p, L=L, T=T, H=H, D=D)

    ref = reference(x, params)

    # bf16 MXU operands: the recommended/default production path on v5e/v6e/v7x.
    out_bf16 = jax.block_until_ready(
        chunk_forward(x, prepare_params(params, jnp.bfloat16)))
    assert out_bf16.shape == (N, D), out_bf16.shape
    assert jnp.allclose(out_bf16, ref, atol=4e-2, rtol=4e-2), \
        f"bf16 path max abs diff {jnp.max(jnp.abs(out_bf16 - ref))}"

    # f32 MXU operands: tighter check (only approx reciprocal / matmul pass
    # choice deviate from the pure-JAX reference).
    out_f32 = jax.block_until_ready(
        chunk_forward(x, prepare_params(params, jnp.float32)))
    assert jnp.allclose(out_f32, ref, atol=1e-2, rtol=1e-2), \
        f"f32 path max abs diff {jnp.max(jnp.abs(out_f32 - ref))}"

    # TODO(synk): preprocess_rppg (scipy butter/filtfilt band-pass) is not on the
    # forward() path and has no clean Pallas equivalent, so it is omitted.
    print("KERNEL_OK")
</pallas_src>

<mosaic_0001>
module attributes {stable_mosaic.version = 11 : i64} {
  func.func @chunk_forward_kernel(%arg0: i32, %arg1: memref<128x24xbf16, #tpu.memory_space<vmem>>, %arg2: memref<128x128xbf16, #tpu.memory_space<vmem>>, %arg3: memref<128x1xf32, #tpu.memory_space<vmem>>, %arg4: memref<32x1xf32, #tpu.memory_space<vmem>>, %arg5: memref<32x1xf32, #tpu.memory_space<vmem>>, %arg6: memref<16x32xbf16, #tpu.memory_space<vmem>>, %arg7: memref<16x1xf32, #tpu.memory_space<vmem>>, %arg8: memref<16x24xf32, #tpu.memory_space<vmem>>, %arg9: memref<32x24xf32, #tpu.memory_space<vmem>>) attributes {dimension_semantics = [#tpu.dimension_semantics<parallel>], iteration_bounds = array<i64: 1>, scalar_prefetch = 0 : i64, scratch_operands = 1 : i64, tpu.core_type = #tpu.core_type<tc>, window_params = [{transform_indices = @transform_0, window_bounds = array<i64: 128, 24>}, {pipeline_mode = #tpu.pipeline_mode<synchronous>, transform_indices = @transform_1, window_bounds = array<i64: 128, 128>}, {pipeline_mode = #tpu.pipeline_mode<synchronous>, transform_indices = @transform_2, window_bounds = array<i64: 128, 1>}, {pipeline_mode = #tpu.pipeline_mode<synchronous>, transform_indices = @transform_3, window_bounds = array<i64: 32, 1>}, {pipeline_mode = #tpu.pipeline_mode<synchronous>, transform_indices = @transform_4, window_bounds = array<i64: 32, 1>}, {pipeline_mode = #tpu.pipeline_mode<synchronous>, transform_indices = @transform_5, window_bounds = array<i64: 16, 32>}, {pipeline_mode = #tpu.pipeline_mode<synchronous>, transform_indices = @transform_6, window_bounds = array<i64: 16, 1>}, {transform_indices = @transform_7, window_bounds = array<i64: 16, 24>}]} {
    %c0 = arith.constant 0 : index
    %c0_0 = arith.constant 0 : index
    %0 = vector.load %arg2[%c0, %c0_0] : memref<128x128xbf16, #tpu.memory_space<vmem>>, vector<128x128xbf16>
    %c0_1 = arith.constant 0 : index
    %c0_2 = arith.constant 0 : index
    %1 = vector.load %arg1[%c0_1, %c0_2] : memref<128x24xbf16, #tpu.memory_space<vmem>>, vector<128x24xbf16>
    %cst = arith.constant dense<0.000000e+00> : vector<128x24xf32>
    %2 = tpu.matmul %0, %1, %cst {dimension_numbers = #tpu.dot_dimension_numbers<[1], [0], [0], [1], [0, 0, 1, 1], [], []>} : vector<128x128xbf16>, vector<128x24xbf16>, vector<128x24xf32> -> vector<128x24xf32>
    %c0_3 = arith.constant 0 : index
    %c0_4 = arith.constant 0 : index
    %3 = vector.load %arg3[%c0_3, %c0_4] : memref<128x1xf32, #tpu.memory_space<vmem>>, vector<128x1xf32>
    %4 = vector.broadcast %3 : vector<128x1xf32> to vector<128x24xf32>
    %5 = arith.addf %2, %4 : vector<128x24xf32>
    %cst_5 = arith.constant dense<0.000000e+00> : vector<24xf32>
    %6 = vector.multi_reduction <add>, %5, %cst_5 [0] : vector<128x24xf32> to vector<24xf32>
    %7 = vector.shape_cast %6 : vector<24xf32> to vector<1x24xf32>
    %cst_6 = arith.constant 7.812500e-03 : f32
    %8 = vector.broadcast %cst_6 : f32 to vector<1x24xf32>
    %9 = arith.mulf %7, %8 : vector<1x24xf32>
    %10 = vector.broadcast %9 : vector<1x24xf32> to vector<128x24xf32>
    %11 = arith.subf %5, %10 : vector<128x24xf32>
    %12 = arith.mulf %11, %11 : vector<128x24xf32>
    %cst_7 = arith.constant dense<0.000000e+00> : vector<24xf32>
    %13 = vector.multi_reduction <add>, %12, %cst_7 [0] : vector<128x24xf32> to vector<24xf32>
    %14 = vector.shape_cast %13 : vector<24xf32> to vector<1x24xf32>
    %cst_8 = arith.constant 0.00787401571 : f32
    %15 = vector.broadcast %cst_8 : f32 to vector<1x24xf32>
    %16 = arith.mulf %14, %15 : vector<1x24xf32>
    %17 = math.sqrt %16 : vector<1x24xf32>
    %cst_9 = arith.constant 9.99999997E-7 : f32
    %18 = vector.broadcast %cst_9 : f32 to vector<1x24xf32>
    %19 = arith.addf %17, %18 : vector<1x24xf32>
    %20 = tpu.reciprocal %19 {approx = true} : vector<1x24xf32> -> vector<1x24xf32>
    %21 = vector.broadcast %20 : vector<1x24xf32> to vector<128x24xf32>
    %22 = arith.mulf %11, %21 : vector<128x24xf32>
    %c0_10 = arith.constant 0 : index
    %c0_11 = arith.constant 0 : index
    %23 = vector.load %arg4[%c0_10, %c0_11] : memref<32x1xf32, #tpu.memory_space<vmem>>, vector<1x1xf32>
    %c0_12 = arith.constant 0 : index
    %c0_13 = arith.constant 0 : index
    %24 = vector.load %arg5[%c0_12, %c0_13] : memref<32x1xf32, #tpu.memory_space<vmem>>, vector<1x1xf32>
    %25 = vector.broadcast %23 : vector<1x1xf32> to vector<128x24xf32>
    %26 = arith.mulf %22, %25 : vector<128x24xf32>
    %27 = vector.broadcast %24 : vector<1x1xf32> to vector<128x24xf32>
    %28 = arith.addf %26, %27 : vector<128x24xf32>
    %cst_14 = arith.constant 0.000000e+00 : f32
    %29 = vector.broadcast %cst_14 : f32 to vector<128x24xf32>
    %30 = arith.maximumf %28, %29 : vector<128x24xf32>
    %cst_15 = arith.constant dense<0.000000e+00> : vector<24xf32>
    %31 = vector.multi_reduction <add>, %30, %cst_15 [0] : vector<128x24xf32> to vector<24xf32>
    %32 = vector.shape_cast %31 : vector<24xf32> to vector<1x24xf32>
    %c0_16 = arith.constant 0 : index
    %c0_17 = arith.constant 0 : index
    %33 = vector.load %arg9[%c0_16, %c0_17] : memref<32x24xf32, #tpu.memory_space<vmem>>, vector<1x24xf32>
    tpu.vector_store %arg9[%c0_16, %c0_17], %32 {strides = array<i32>} : memref<32x24xf32, #tpu.memory_space<vmem>>, vector<1x24xf32>,
    %c1 = arith.constant 1 : index
    %c0_18 = arith.constant 0 : index
    %34 = vector.load %arg4[%c1, %c0_18] : memref<32x1xf32, #tpu.memory_space<vmem>>, vector<1x1xf32>
    %c1_19 = arith.constant 1 : index
    %c0_20 = arith.constant 0 : index
    %35 = vector.load %arg5[%c1_19, %c0_20] : memref<32x1xf32, #tpu.memory_space<vmem>>, vector<1x1xf32>
    %36 = vector.broadcast %34 : vector<1x1xf32> to vector<128x24xf32>
    %37 = arith.mulf %22, %36 : vector<128x24xf32>
    %38 = vector.broadcast %35 : vector<1x1xf32> to vector<128x24xf32>
    %39 = arith.addf %37, %38 : vector<128x24xf32>
    %cst_21 = arith.constant 0.000000e+00 : f32
    %40 = vector.broadcast %cst_21 : f32 to vector<128x24xf32>
    %41 = arith.maximumf %39, %40 : vector<128x24xf32>
    %cst_22 = arith.constant dense<0.000000e+00> : vector<24xf32>
    %42 = vector.multi_reduction <add>, %41, %cst_22 [0] : vector<128x24xf32> to vector<24xf32>
    %43 = vector.shape_cast %42 : vector<24xf32> to vector<1x24xf32>
    %c1_23 = arith.constant 1 : index
    %c0_24 = arith.constant 0 : index
    %44 = vector.load %arg9[%c1_23, %c0_24] : memref<32x24xf32, #tpu.memory_space<vmem>>, vector<1x24xf32>
    tpu.vector_store %arg9[%c1_23, %c0_24], %43 {strides = array<i32>} : memref<32x24xf32, #tpu.memory_space<vmem>>, vector<1x24xf32>,
    %c2 = arith.constant 2 : index
    %c0_25 = arith.constant 0 : index
    %45 = vector.load %arg4[%c2, %c0_25] : memref<32x1xf32, #tpu.memory_space<vmem>>, vector<1x1xf32>
    %c2_26 = arith.constant 2 : index
    %c0_27 = arith.constant 0 : index
    %46 = vector.load %arg5[%c2_26, %c0_27] : memref<32x1xf32, #tpu.memory_space<vmem>>, vector<1x1xf32>
    %47 = vector.broadcast %45 : vector<1x1xf32> to vector<128x24xf32>
    %48 = arith.mulf %22, %47 : vector<128x24xf32>
    %49 = vector.broadcast %46 : vector<1x1xf32> to vector<128x24xf32>
    %50 = arith.addf %48, %49 : vector<128x24xf32>
    %cst_28 = arith.constant 0.000000e+00 : f32
    %51 = vector.broadcast %cst_28 : f32 to vector<128x24xf32>
    %52 = arith.maximumf %50, %51 : vector<128x24xf32>
    %cst_29 = arith.constant dense<0.000000e+00> : vector<24xf32>
    %53 = vector.multi_reduction <add>, %52, %cst_29 [0] : vector<128x24xf32> to vector<24xf32>
    %54 = vector.shape_cast %53 : vector<24xf32> to vector<1x24xf32>
    %c2_30 = arith.constant 2 : index
    %c0_31 = arith.constant 0 : index
    %55 = vector.load %arg9[%c2_30, %c0_31] : memref<32x24xf32, #tpu.memory_space<vmem>>, vector<1x24xf32>
    tpu.vector_store %arg9[%c2_30, %c0_31], %54 {strides = array<i32>} : memref<32x24xf32, #tpu.memory_space<vmem>>, vector<1x24xf32>,
    %c3 = arith.constant 3 : index
    %c0_32 = arith.constant 0 : index
    %56 = vector.load %arg4[%c3, %c0_32] : memref<32x1xf32, #tpu.memory_space<vmem>>, vector<1x1xf32>
    %c3_33 = arith.constant 3 : index
    %c0_34 = arith.constant 0 : index
    %57 = vector.load %arg5[%c3_33, %c0_34] : memref<32x1xf32, #tpu.memory_space<vmem>>, vector<1x1xf32>
    %58 = vector.broadcast %56 : vector<1x1xf32> to vector<128x24xf32>
    %59 = arith.mulf %22, %58 : vector<128x24xf32>
    %60 = vector.broadcast %57 : vector<1x1xf32> to vector<128x24xf32>
    %61 = arith.addf %59, %60 : vector<128x24xf32>
    %cst_35 = arith.constant 0.000000e+00 : f32
    %62 = vector.broadcast %cst_35 : f32 to vector<128x24xf32>
    %63 = arith.maximumf %61, %62 : vector<128x24xf32>
    %cst_36 = arith.constant dense<0.000000e+00> : vector<24xf32>
    %64 = vector.multi_reduction <add>, %63, %cst_36 [0] : vector<128x24xf32> to vector<24xf32>
    %65 = vector.shape_cast %64 : vector<24xf32> to vector<1x24xf32>
    %c3_37 = arith.constant 3 : index
    %c0_38 = arith.constant 0 : index
    %66 = vector.load %arg9[%c3_37, %c0_38] : memref<32x24xf32, #tpu.memory_space<vmem>>, vector<1x24xf32>
    tpu.vector_store %arg9[%c3_37, %c0_38], %65 {strides = array<i32>} : memref<32x24xf32, #tpu.memory_space<vmem>>, vector<1x24xf32>,
    %c4 = arith.constant 4 : index
    %c0_39 = arith.constant 0 : index
    %67 = vector.load %arg4[%c4, %c0_39] : memref<32x1xf32, #tpu.memory_space<vmem>>, vector<1x1xf32>
    %c4_40 = arith.constant 4 : index
    %c0_41 = arith.constant 0 : index
    %68 = vector.load %arg5[%c4_40, %c0_41] : memref<32x1xf32, #tpu.memory_space<vmem>>, vector<1x1xf32>
    %69 = vector.broadcast %67 : vector<1x1xf32> to vector<128x24xf32>
    %70 = arith.mulf %22, %69 : vector<128x24xf32>
    %71 = vector.broadcast %68 : vector<1x1xf32> to vector<128x24xf32>
    %72 = arith.addf %70, %71 : vector<128x24xf32>
    %cst_42 = arith.constant 0.000000e+00 : f32
    %73 = vector.broadcast %cst_42 : f32 to vector<128x24xf32>
    %74 = arith.maximumf %72, %73 : vector<128x24xf32>
    %cst_43 = arith.constant dense<0.000000e+00> : vector<24xf32>
    %75 = vector.multi_reduction <add>, %74, %cst_43 [0] : vector<128x24xf32> to vector<24xf32>
    %76 = vector.shape_cast %75 : vector<24xf32> to vector<1x24xf32>
    %c4_44 = arith.constant 4 : index
    %c0_45 = arith.constant 0 : index
    %77 = vector.load %arg9[%c4_44, %c0_45] : memref<32x24xf32, #tpu.memory_space<vmem>>, vector<1x24xf32>
    tpu.vector_store %arg9[%c4_44, %c0_45], %76 {strides = array<i32>} : memref<32x24xf32, #tpu.memory_space<vmem>>, vector<1x24xf32>,
    %c5 = arith.constant 5 : index
    %c0_46 = arith.constant 0 : index
    %78 = vector.load %arg4[%c5, %c0_46] : memref<32x1xf32, #tpu.memory_space<vmem>>, vector<1x1xf32>
    %c5_47 = arith.constant 5 : index
    %c0_48 = arith.constant 0 : index
    %79 = vector.load %arg5[%c5_47, %c0_48] : memref<32x1xf32, #tpu.memory_space<vmem>>, vector<1x1xf32>
    %80 = vector.broadcast %78 : vector<1x1xf32> to vector<128x24xf32>
    %81 = arith.mulf %22, %80 : vector<128x24xf32>
    %82 = vector.broadcast %79 : vector<1x1xf32> to vector<128x24xf32>
    %83 = arith.addf %81, %82 : vector<128x24xf32>
    %cst_49 = arith.constant 0.000000e+00 : f32
    %84 = vector.broadcast %cst_49 : f32 to vector<128x24xf32>
    %85 = arith.maximumf %83, %84 : vector<128x24xf32>
    %cst_50 = arith.constant dense<0.000000e+00> : vector<24xf32>
    %86 = vector.multi_reduction <add>, %85, %cst_50 [0] : vector<128x24xf32> to vector<24xf32>
    %87 = vector.shape_cast %86 : vector<24xf32> to vector<1x24xf32>
    %c5_51 = arith.constant 5 : index
    %c0_52 = arith.constant 0 : index
    %88 = vector.load %arg9[%c5_51, %c0_52] : memref<32x24xf32, #tpu.memory_space<vmem>>, vector<1x24xf32>
    tpu.vector_store %arg9[%c5_51, %c0_52], %87 {strides = array<i32>} : memref<32x24xf32, #tpu.memory_space<vmem>>, vector<1x24xf32>,
    %c6 = arith.constant 6 : index
    %c0_53 = arith.constant 0 : index
    %89 = vector.load %arg4[%c6, %c0_53] : memref<32x1xf32, #tpu.memory_space<vmem>>, vector<1x1xf32>
    %c6_54 = arith.constant 6 : index
    %c0_55 = arith.constant 0 : index
    %90 = vector.load %arg5[%c6_54, %c0_55] : memref<32x1xf32, #tpu.memory_space<vmem>>, vector<1x1xf32>
    %91 = vector.broadcast %89 : vector<1x1xf32> to vector<128x24xf32>
    %92 = arith.mulf %22, %91 : vector<128x24xf32>
    %93 = vector.broadcast %90 : vector<1x1xf32> to vector<128x24xf32>
    %94 = arith.addf %92, %93 : vector<128x24xf32>
    %cst_56 = arith.constant 0.000000e+00 : f32
    %95 = vector.broadcast %cst_56 : f32 to vector<128x24xf32>
    %96 = arith.maximumf %94, %95 : vector<128x24xf32>
    %cst_57 = arith.constant dense<0.000000e+00> : vector<24xf32>
    %97 = vector.multi_reduction <add>, %96, %cst_57 [0] : vector<128x24xf32> to vector<24xf32>
    %98 = vector.shape_cast %97 : vector<24xf32> to vector<1x24xf32>
    %c6_58 = arith.constant 6 : index
    %c0_59 = arith.constant 0 : index
    %99 = vector.load %arg9[%c6_58, %c0_59] : memref<32x24xf32, #tpu.memory_space<vmem>>, vector<1x24xf32>
    tpu.vector_store %arg9[%c6_58, %c0_59], %98 {strides = array<i32>} : memref<32x24xf32, #tpu.memory_space<vmem>>, vector<1x24xf32>,
    %c7 = arith.constant 7 : index
    %c0_60 = arith.constant 0 : index
    %100 = vector.load %arg4[%c7, %c0_60] : memref<32x1xf32, #tpu.memory_space<vmem>>, vector<1x1xf32>
    %c7_61 = arith.constant 7 : index
    %c0_62 = arith.constant 0 : index
    %101 = vector.load %arg5[%c7_61, %c0_62] : memref<32x1xf32, #tpu.memory_space<vmem>>, vector<1x1xf32>
    %102 = vector.broadcast %100 : vector<1x1xf32> to vector<128x24xf32>
    %103 = arith.mulf %22, %102 : vector<128x24xf32>
    %104 = vector.broadcast %101 : vector<1x1xf32> to vector<128x24xf32>
    %105 = arith.addf %103, %104 : vector<128x24xf32>
    %cst_63 = arith.constant 0.000000e+00 : f32
    %106 = vector.broadcast %cst_63 : f32 to vector<128x24xf32>
    %107 = arith.maximumf %105, %106 : vector<128x24xf32>
    %cst_64 = arith.constant dense<0.000000e+00> : vector<24xf32>
    %108 = vector.multi_reduction <add>, %107, %cst_64 [0] : vector<128x24xf32> to vector<24xf32>
    %109 = vector.shape_cast %108 : vector<24xf32> to vector<1x24xf32>
    %c7_65 = arith.constant 7 : index
    %c0_66 = arith.constant 0 : index
    %110 = vector.load %arg9[%c7_65, %c0_66] : memref<32x24xf32, #tpu.memory_space<vmem>>, vector<1x24xf32>
    tpu.vector_store %arg9[%c7_65, %c0_66], %109 {strides = array<i32>} : memref<32x24xf32, #tpu.memory_space<vmem>>, vector<1x24xf32>,
    %c8 = arith.constant 8 : index
    %c0_67 = arith.constant 0 : index
    %111 = vector.load %arg4[%c8, %c0_67] : memref<32x1xf32, #tpu.memory_space<vmem>>, vector<1x1xf32>
    %c8_68 = arith.constant 8 : index
    %c0_69 = arith.constant 0 : index
    %112 = vector.load %arg5[%c8_68, %c0_69] : memref<32x1xf32, #tpu.memory_space<vmem>>, vector<1x1xf32>
    %113 = vector.broadcast %111 : vector<1x1xf32> to vector<128x24xf32>
    %114 = arith.mulf %22, %113 : vector<128x24xf32>
    %115 = vector.broadcast %112 : vector<1x1xf32> to vector<128x24xf32>
    %116 = arith.addf %114, %115 : vector<128x24xf32>
    %cst_70 = arith.constant 0.000000e+00 : f32
    %117 = vector.broadcast %cst_70 : f32 to vector<128x24xf32>
    %118 = arith.maximumf %116, %117 : vector<128x24xf32>
    %cst_71 = arith.constant dense<0.000000e+00> : vector<24xf32>
    %119 = vector.multi_reduction <add>, %118, %cst_71 [0] : vector<128x24xf32> to vector<24xf32>
    %120 = vector.shape_cast %119 : vector<24xf32> to vector<1x24xf32>
    %c8_72 = arith.constant 8 : index
    %c0_73 = arith.constant 0 : index
    %121 = vector.load %arg9[%c8_72, %c0_73] : memref<32x24xf32, #tpu.memory_space<vmem>>, vector<1x24xf32>
    tpu.vector_store %arg9[%c8_72, %c0_73], %120 {strides = array<i32>} : memref<32x24xf32, #tpu.memory_space<vmem>>, vector<1x24xf32>,
    %c9 = arith.constant 9 : index
    %c0_74 = arith.constant 0 : index
    %122 = vector.load %arg4[%c9, %c0_74] : memref<32x1xf32, #tpu.memory_space<vmem>>, vector<1x1xf32>
    %c9_75 = arith.constant 9 : index
    %c0_76 = arith.constant 0 : index
    %123 = vector.load %arg5[%c9_75, %c0_76] : memref<32x1xf32, #tpu.memory_space<vmem>>, vector<1x1xf32>
    %124 = vector.broadcast %122 : vector<1x1xf32> to vector<128x24xf32>
    %125 = arith.mulf %22, %124 : vector<128x24xf32>
    %126 = vector.broadcast %123 : vector<1x1xf32> to vector<128x24xf32>
    %127 = arith.addf %125, %126 : vector<128x24xf32>
    %cst_77 = arith.constant 0.000000e+00 : f32
    %128 = vector.broadcast %cst_77 : f32 to vector<128x24xf32>
    %129 = arith.maximumf %127, %128 : vector<128x24xf32>
    %cst_78 = arith.constant dense<0.000000e+00> : vector<24xf32>
    %130 = vector.multi_reduction <add>, %129, %cst_78 [0] : vector<128x24xf32> to vector<24xf32>
    %131 = vector.shape_cast %130 : vector<24xf32> to vector<1x24xf32>
    %c9_79 = arith.constant 9 : index
    %c0_80 = arith.constant 0 : index
    %132 = vector.load %arg9[%c9_79, %c0_80] : memref<32x24xf32, #tpu.memory_space<vmem>>, vector<1x24xf32>
    tpu.vector_store %arg9[%c9_79, %c0_80], %131 {strides = array<i32>} : memref<32x24xf32, #tpu.memory_space<vmem>>, vector<1x24xf32>,
    %c10 = arith.constant 10 : index
    %c0_81 = arith.constant 0 : index
    %133 = vector.load %arg4[%c10, %c0_81] : memref<32x1xf32, #tpu.memory_space<vmem>>, vector<1x1xf32>
    %c10_82 = arith.constant 10 : index
    %c0_83 = arith.constant 0 : index
    %134 = vector.load %arg5[%c10_82, %c0_83] : memref<32x1xf32, #tpu.memory_space<vmem>>, vector<1x1xf32>
    %135 = vector.broadcast %133 : vector<1x1xf32> to vector<128x24xf32>
    %136 = arith.mulf %22, %135 : vector<128x24xf32>
    %137 = vector.broadcast %134 : vector<1x1xf32> to vector<128x24xf32>
    %138 = arith.addf %136, %137 : vector<128x24xf32>
    %cst_84 = arith.constant 0.000000e+00 : f32
    %139 = vector.broadcast %cst_84 : f32 to vector<128x24xf32>
    %140 = arith.maximumf %138, %139 : vector<128x24xf32>
    %cst_85 = arith.constant dense<0.000000e+00> : vector<24xf32>
    %141 = vector.multi_reduction <add>, %140, %cst_85 [0] : vector<128x24xf32> to vector<24xf32>
    %142 = vector.shape_cast %141 : vector<24xf32> to vector<1x24xf32>
    %c10_86 = arith.constant 10 : index
    %c0_87 = arith.constant 0 : index
    %143 = vector.load %arg9[%c10_86, %c0_87] : memref<32x24xf32, #tpu.memory_space<vmem>>, vector<1x24xf32>
    tpu.vector_store %arg9[%c10_86, %c0_87], %142 {strides = array<i32>} : memref<32x24xf32, #tpu.memory_space<vmem>>, vector<1x24xf32>,
    %c11 = arith.constant 11 : index
    %c0_88 = arith.constant 0 : index
    %144 = vector.load %arg4[%c11, %c0_88] : memref<32x1xf32, #tpu.memory_space<vmem>>, vector<1x1xf32>
    %c11_89 = arith.constant 11 : index
    %c0_90 = arith.constant 0 : index
    %145 = vector.load %arg5[%c11_89, %c0_90] : memref<32x1xf32, #tpu.memory_space<vmem>>, vector<1x1xf32>
    %146 = vector.broadcast %144 : vector<1x1xf32> to vector<128x24xf32>
    %147 = arith.mulf %22, %146 : vector<128x24xf32>
    %148 = vector.broadcast %145 : vector<1x1xf32> to vector<128x24xf32>
    %149 = arith.addf %147, %148 : vector<128x24xf32>
    %cst_91 = arith.constant 0.000000e+00 : f32
    %150 = vector.broadcast %cst_91 : f32 to vector<128x24xf32>
    %151 = arith.maximumf %149, %150 : vector<128x24xf32>
    %cst_92 = arith.constant dense<0.000000e+00> : vector<24xf32>
    %152 = vector.multi_reduction <add>, %151, %cst_92 [0] : vector<128x24xf32> to vector<24xf32>
    %153 = vector.shape_cast %152 : vector<24xf32> to vector<1x24xf32>
    %c11_93 = arith.constant 11 : index
    %c0_94 = arith.constant 0 : index
    %154 = vector.load %arg9[%c11_93, %c0_94] : memref<32x24xf32, #tpu.memory_space<vmem>>, vector<1x24xf32>
    tpu.vector_store %arg9[%c11_93, %c0_94], %153 {strides = array<i32>} : memref<32x24xf32, #tpu.memory_space<vmem>>, vector<1x24xf32>,
    %c12 = arith.constant 12 : index
    %c0_95 = arith.constant 0 : index
    %155 = vector.load %arg4[%c12, %c0_95] : memref<32x1xf32, #tpu.memory_space<vmem>>, vector<1x1xf32>
    %c12_96 = arith.constant 12 : index
    %c0_97 = arith.constant 0 : index
    %156 = vector.load %arg5[%c12_96, %c0_97] : memref<32x1xf32, #tpu.memory_space<vmem>>, vector<1x1xf32>
    %157 = vector.broadcast %155 : vector<1x1xf32> to vector<128x24xf32>
    %158 = arith.mulf %22, %157 : vector<128x24xf32>
    %159 = vector.broadcast %156 : vector<1x1xf32> to vector<128x24xf32>
    %160 = arith.addf %158, %159 : vector<128x24xf32>
    %cst_98 = arith.constant 0.000000e+00 : f32
    %161 = vector.broadcast %cst_98 : f32 to vector<128x24xf32>
    %162 = arith.maximumf %160, %161 : vector<128x24xf32>
    %cst_99 = arith.constant dense<0.000000e+00> : vector<24xf32>
    %163 = vector.multi_reduction <add>, %162, %cst_99 [0] : vector<128x24xf32> to vector<24xf32>
    %164 = vector.shape_cast %163 : vector<24xf32> to vector<1x24xf32>
    %c12_100 = arith.constant 12 : index
    %c0_101 = arith.constant 0 : index
    %165 = vector.load %arg9[%c12_100, %c0_101] : memref<32x24xf32, #tpu.memory_space<vmem>>, vector<1x24xf32>
    tpu.vector_store %arg9[%c12_100, %c0_101], %164 {strides = array<i32>} : memref<32x24xf32, #tpu.memory_space<vmem>>, vector<1x24xf32>,
    %c13 = arith.constant 13 : index
    %c0_102 = arith.constant 0 : index
    %166 = vector.load %arg4[%c13, %c0_102] : memref<32x1xf32, #tpu.memory_space<vmem>>, vector<1x1xf32>
    %c13_103 = arith.constant 13 : index
    %c0_104 = arith.constant 0 : index
    %167 = vector.load %arg5[%c13_103, %c0_104] : memref<32x1xf32, #tpu.memory_space<vmem>>, vector<1x1xf32>
    %168 = vector.broadcast %166 : vector<1x1xf32> to vector<128x24xf32>
    %169 = arith.mulf %22, %168 : vector<128x24xf32>
    %170 = vector.broadcast %167 : vector<1x1xf32> to vector<128x24xf32>
    %171 = arith.addf %169, %170 : vector<128x24xf32>
    %cst_105 = arith.constant 0.000000e+00 : f32
    %172 = vector.broadcast %cst_105 : f32 to vector<128x24xf32>
    %173 = arith.maximumf %171, %172 : vector<128x24xf32>
    %cst_106 = arith.constant dense<0.000000e+00> : vector<24xf32>
    %174 = vector.multi_reduction <add>, %173, %cst_106 [0] : vector<128x24xf32> to vector<24xf32>
    %175 = vector.shape_cast %174 : vector<24xf32> to vector<1x24xf32>
    %c13_107 = arith.constant 13 : index
    %c0_108 = arith.constant 0 : index
    %176 = vector.load %arg9[%c13_107, %c0_108] : memref<32x24xf32, #tpu.memory_space<vmem>>, vector<1x24xf32>
    tpu.vector_store %arg9[%c13_107, %c0_108], %175 {strides = array<i32>} : memref<32x24xf32, #tpu.memory_space<vmem>>, vector<1x24xf32>,
    %c14 = arith.constant 14 : index
    %c0_109 = arith.constant 0 : index
    %177 = vector.load %arg4[%c14, %c0_109] : memref<32x1xf32, #tpu.memory_space<vmem>>, vector<1x1xf32>
    %c14_110 = arith.constant 14 : index
    %c0_111 = arith.constant 0 : index
    %178 = vector.load %arg5[%c14_110, %c0_111] : memref<32x1xf32, #tpu.memory_space<vmem>>, vector<1x1xf32>
    %179 = vector.broadcast %177 : vector<1x1xf32> to vector<128x24xf32>
    %180 = arith.mulf %22, %179 : vector<128x24xf32>
    %181 = vector.broadcast %178 : vector<1x1xf32> to vector<128x24xf32>
    %182 = arith.addf %180, %181 : vector<128x24xf32>
    %cst_112 = arith.constant 0.000000e+00 : f32
    %183 = vector.broadcast %cst_112 : f32 to vector<128x24xf32>
    %184 = arith.maximumf %182, %183 : vector<128x24xf32>
    %cst_113 = arith.constant dense<0.000000e+00> : vector<24xf32>
    %185 = vector.multi_reduction <add>, %184, %cst_113 [0] : vector<128x24xf32> to vector<24xf32>
    %186 = vector.shape_cast %185 : vector<24xf32> to vector<1x24xf32>
    %c14_114 = arith.constant 14 : index
    %c0_115 = arith.constant 0 : index
    %187 = vector.load %arg9[%c14_114, %c0_115] : memref<32x24xf32, #tpu.memory_space<vmem>>, vector<1x24xf32>
    tpu.vector_store %arg9[%c14_114, %c0_115], %186 {strides = array<i32>} : memref<32x24xf32, #tpu.memory_space<vmem>>, vector<1x24xf32>,
    %c15 = arith.constant 15 : index
    %c0_116 = arith.constant 0 : index
    %188 = vector.load %arg4[%c15, %c0_116] : memref<32x1xf32, #tpu.memory_space<vmem>>, vector<1x1xf32>
    %c15_117 = arith.constant 15 : index
    %c0_118 = arith.constant 0 : index
    %189 = vector.load %arg5[%c15_117, %c0_118] : memref<32x1xf32, #tpu.memory_space<vmem>>, vector<1x1xf32>
    %190 = vector.broadcast %188 : vector<1x1xf32> to vector<128x24xf32>
    %191 = arith.mulf %22, %190 : vector<128x24xf32>
    %192 = vector.broadcast %189 : vector<1x1xf32> to vector<128x24xf32>
    %193 = arith.addf %191, %192 : vector<128x24xf32>
    %cst_119 = arith.constant 0.000000e+00 : f32
    %194 = vector.broadcast %cst_119 : f32 to vector<128x24xf32>
    %195 = arith.maximumf %193, %194 : vector<128x24xf32>
    %cst_120 = arith.constant dense<0.000000e+00> : vector<24xf32>
    %196 = vector.multi_reduction <add>, %195, %cst_120 [0] : vector<128x24xf32> to vector<24xf32>
    %197 = vector.shape_cast %196 : vector<24xf32> to vector<1x24xf32>
    %c15_121 = arith.constant 15 : index
    %c0_122 = arith.constant 0 : index
    %198 = vector.load %arg9[%c15_121, %c0_122] : memref<32x24xf32, #tpu.memory_space<vmem>>, vector<1x24xf32>
    tpu.vector_store %arg9[%c15_121, %c0_122], %197 {strides = array<i32>} : memref<32x24xf32, #tpu.memory_space<vmem>>, vector<1x24xf32>,
    %c16 = arith.constant 16 : index
    %c0_123 = arith.constant 0 : index
    %199 = vector.load %arg4[%c16, %c0_123] : memref<32x1xf32, #tpu.memory_space<vmem>>, vector<1x1xf32>
    %c16_124 = arith.constant 16 : index
    %c0_125 = arith.constant 0 : index
    %200 = vector.load %arg5[%c16_124, %c0_125] : memref<32x1xf32, #tpu.memory_space<vmem>>, vector<1x1xf32>
    %201 = vector.broadcast %199 : vector<1x1xf32> to vector<128x24xf32>
    %202 = arith.mulf %22, %201 : vector<128x24xf32>
    %203 = vector.broadcast %200 : vector<1x1xf32> to vector<128x24xf32>
    %204 = arith.addf %202, %203 : vector<128x24xf32>
    %cst_126 = arith.constant 0.000000e+00 : f32
    %205 = vector.broadcast %cst_126 : f32 to vector<128x24xf32>
    %206 = arith.maximumf %204, %205 : vector<128x24xf32>
    %cst_127 = arith.constant dense<0.000000e+00> : vector<24xf32>
    %207 = vector.multi_reduction <add>, %206, %cst_127 [0] : vector<128x24xf32> to vector<24xf32>
    %208 = vector.shape_cast %207 : vector<24xf32> to vector<1x24xf32>
    %c16_128 = arith.constant 16 : index
    %c0_129 = arith.constant 0 : index
    %209 = vector.load %arg9[%c16_128, %c0_129] : memref<32x24xf32, #tpu.memory_space<vmem>>, vector<1x24xf32>
    tpu.vector_store %arg9[%c16_128, %c0_129], %208 {strides = array<i32>} : memref<32x24xf32, #tpu.memory_space<vmem>>, vector<1x24xf32>,
    %c17 = arith.constant 17 : index
    %c0_130 = arith.constant 0 : index
    %210 = vector.load %arg4[%c17, %c0_130] : memref<32x1xf32, #tpu.memory_space<vmem>>, vector<1x1xf32>
    %c17_131 = arith.constant 17 : index
    %c0_132 = arith.constant 0 : index
    %211 = vector.load %arg5[%c17_131, %c0_132] : memref<32x1xf32, #tpu.memory_space<vmem>>, vector<1x1xf32>
    %212 = vector.broadcast %210 : vector<1x1xf32> to vector<128x24xf32>
    %213 = arith.mulf %22, %212 : vector<128x24xf32>
    %214 = vector.broadcast %211 : vector<1x1xf32> to vector<128x24xf32>
    %215 = arith.addf %213, %214 : vector<128x24xf32>
    %cst_133 = arith.constant 0.000000e+00 : f32
    %216 = vector.broadcast %cst_133 : f32 to vector<128x24xf32>
    %217 = arith.maximumf %215, %216 : vector<128x24xf32>
    %cst_134 = arith.constant dense<0.000000e+00> : vector<24xf32>
    %218 = vector.multi_reduction <add>, %217, %cst_134 [0] : vector<128x24xf32> to vector<24xf32>
    %219 = vector.shape_cast %218 : vector<24xf32> to vector<1x24xf32>
    %c17_135 = arith.constant 17 : index
    %c0_136 = arith.constant 0 : index
    %220 = vector.load %arg9[%c17_135, %c0_136] : memref<32x24xf32, #tpu.memory_space<vmem>>, vector<1x24xf32>
    tpu.vector_store %arg9[%c17_135, %c0_136], %219 {strides = array<i32>} : memref<32x24xf32, #tpu.memory_space<vmem>>, vector<1x24xf32>,
    %c18 = arith.constant 18 : index
    %c0_137 = arith.constant 0 : index
    %221 = vector.load %arg4[%c18, %c0_137] : memref<32x1xf32, #tpu.memory_space<vmem>>, vector<1x1xf32>
    %c18_138 = arith.constant 18 : index
    %c0_139 = arith.constant 0 : index
    %222 = vector.load %arg5[%c18_138, %c0_139] : memref<32x1xf32, #tpu.memory_space<vmem>>, vector<1x1xf32>
    %223 = vector.broadcast %221 : vector<1x1xf32> to vector<128x24xf32>
    %224 = arith.mulf %22, %223 : vector<128x24xf32>
    %225 = vector.broadcast %222 : vector<1x1xf32> to vector<128x24xf32>
    %226 = arith.addf %224, %225 : vector<128x24xf32>
    %cst_140 = arith.constant 0.000000e+00 : f32
    %227 = vector.broadcast %cst_140 : f32 to vector<128x24xf32>
    %228 = arith.maximumf %226, %227 : vector<128x24xf32>
    %cst_141 = arith.constant dense<0.000000e+00> : vector<24xf32>
    %229 = vector.multi_reduction <add>, %228, %cst_141 [0] : vector<128x24xf32> to vector<24xf32>
    %230 = vector.shape_cast %229 : vector<24xf32> to vector<1x24xf32>
    %c18_142 = arith.constant 18 : index
    %c0_143 = arith.constant 0 : index
    %231 = vector.load %arg9[%c18_142, %c0_143] : memref<32x24xf32, #tpu.memory_space<vmem>>, vector<1x24xf32>
    tpu.vector_store %arg9[%c18_142, %c0_143], %230 {strides = array<i32>} : memref<32x24xf32, #tpu.memory_space<vmem>>, vector<1x24xf32>,
    %c19 = arith.constant 19 : index
    %c0_144 = arith.constant 0 : index
    %232 = vector.load %arg4[%c19, %c0_144] : memref<32x1xf32, #tpu.memory_space<vmem>>, vector<1x1xf32>
    %c19_145 = arith.constant 19 : index
    %c0_146 = arith.constant 0 : index
    %233 = vector.load %arg5[%c19_145, %c0_146] : memref<32x1xf32, #tpu.memory_space<vmem>>, vector<1x1xf32>
    %234 = vector.broadcast %232 : vector<1x1xf32> to vector<128x24xf32>
    %235 = arith.mulf %22, %234 : vector<128x24xf32>
    %236 = vector.broadcast %233 : vector<1x1xf32> to vector<128x24xf32>
    %237 = arith.addf %235, %236 : vector<128x24xf32>
    %cst_147 = arith.constant 0.000000e+00 : f32
    %238 = vector.broadcast %cst_147 : f32 to vector<128x24xf32>
    %239 = arith.maximumf %237, %238 : vector<128x24xf32>
    %cst_148 = arith.constant dense<0.000000e+00> : vector<24xf32>
    %240 = vector.multi_reduction <add>, %239, %cst_148 [0] : vector<128x24xf32> to vector<24xf32>
    %241 = vector.shape_cast %240 : vector<24xf32> to vector<1x24xf32>
    %c19_149 = arith.constant 19 : index
    %c0_150 = arith.constant 0 : index
    %242 = vector.load %arg9[%c19_149, %c0_150] : memref<32x24xf32, #tpu.memory_space<vmem>>, vector<1x24xf32>
    tpu.vector_store %arg9[%c19_149, %c0_150], %241 {strides = array<i32>} : memref<32x24xf32, #tpu.memory_space<vmem>>, vector<1x24xf32>,
    %c20 = arith.constant 20 : index
    %c0_151 = arith.constant 0 : index
    %243 = vector.load %arg4[%c20, %c0_151] : memref<32x1xf32, #tpu.memory_space<vmem>>, vector<1x1xf32>
    %c20_152 = arith.constant 20 : index
    %c0_153 = arith.constant 0 : index
    %244 = vector.load %arg5[%c20_152, %c0_153] : memref<32x1xf32, #tpu.memory_space<vmem>>, vector<1x1xf32>
    %245 = vector.broadcast %243 : vector<1x1xf32> to vector<128x24xf32>
    %246 = arith.mulf %22, %245 : vector<128x24xf32>
    %247 = vector.broadcast %244 : vector<1x1xf32> to vector<128x24xf32>
    %248 = arith.addf %246, %247 : vector<128x24xf32>
    %cst_154 = arith.constant 0.000000e+00 : f32
    %249 = vector.broadcast %cst_154 : f32 to vector<128x24xf32>
    %250 = arith.maximumf %248, %249 : vector<128x24xf32>
    %cst_155 = arith.constant dense<0.000000e+00> : vector<24xf32>
    %251 = vector.multi_reduction <add>, %250, %cst_155 [0] : vector<128x24xf32> to vector<24xf32>
    %252 = vector.shape_cast %251 : vector<24xf32> to vector<1x24xf32>
    %c20_156 = arith.constant 20 : index
    %c0_157 = arith.constant 0 : index
    %253 = vector.load %arg9[%c20_156, %c0_157] : memref<32x24xf32, #tpu.memory_space<vmem>>, vector<1x24xf32>
    tpu.vector_store %arg9[%c20_156, %c0_157], %252 {strides = array<i32>} : memref<32x24xf32, #tpu.memory_space<vmem>>, vector<1x24xf32>,
    %c21 = arith.constant 21 : index
    %c0_158 = arith.constant 0 : index
    %254 = vector.load %arg4[%c21, %c0_158] : memref<32x1xf32, #tpu.memory_space<vmem>>, vector<1x1xf32>
    %c21_159 = arith.constant 21 : index
    %c0_160 = arith.constant 0 : index
    %255 = vector.load %arg5[%c21_159, %c0_160] : memref<32x1xf32, #tpu.memory_space<vmem>>, vector<1x1xf32>
    %256 = vector.broadcast %254 : vector<1x1xf32> to vector<128x24xf32>
    %257 = arith.mulf %22, %256 : vector<128x24xf32>
    %258 = vector.broadcast %255 : vector<1x1xf32> to vector<128x24xf32>
    %259 = arith.addf %257, %258 : vector<128x24xf32>
    %cst_161 = arith.constant 0.000000e+00 : f32
    %260 = vector.broadcast %cst_161 : f32 to vector<128x24xf32>
    %261 = arith.maximumf %259, %260 : vector<128x24xf32>
    %cst_162 = arith.constant dense<0.000000e+00> : vector<24xf32>
    %262 = vector.multi_reduction <add>, %261, %cst_162 [0] : vector<128x24xf32> to vector<24xf32>
    %263 = vector.shape_cast %262 : vector<24xf32> to vector<1x24xf32>
    %c21_163 = arith.constant 21 : index
    %c0_164 = arith.constant 0 : index
    %264 = vector.load %arg9[%c21_163, %c0_164] : memref<32x24xf32, #tpu.memory_space<vmem>>, vector<1x24xf32>
    tpu.vector_store %arg9[%c21_163, %c0_164], %263 {strides = array<i32>} : memref<32x24xf32, #tpu.memory_space<vmem>>, vector<1x24xf32>,
    %c22 = arith.constant 22 : index
    %c0_165 = arith.constant 0 : index
    %265 = vector.load %arg4[%c22, %c0_165] : memref<32x1xf32, #tpu.memory_space<vmem>>, vector<1x1xf32>
    %c22_166 = arith.constant 22 : index
    %c0_167 = arith.constant 0 : index
    %266 = vector.load %arg5[%c22_166, %c0_167] : memref<32x1xf32, #tpu.memory_space<vmem>>, vector<1x1xf32>
    %267 = vector.broadcast %265 : vector<1x1xf32> to vector<128x24xf32>
    %268 = arith.mulf %22, %267 : vector<128x24xf32>
    %269 = vector.broadcast %266 : vector<1x1xf32> to vector<128x24xf32>
    %270 = arith.addf %268, %269 : vector<128x24xf32>
    %cst_168 = arith.constant 0.000000e+00 : f32
    %271 = vector.broadcast %cst_168 : f32 to vector<128x24xf32>
    %272 = arith.maximumf %270, %271 : vector<128x24xf32>
    %cst_169 = arith.constant dense<0.000000e+00> : vector<24xf32>
    %273 = vector.multi_reduction <add>, %272, %cst_169 [0] : vector<128x24xf32> to vector<24xf32>
    %274 = vector.shape_cast %273 : vector<24xf32> to vector<1x24xf32>
    %c22_170 = arith.constant 22 : index
    %c0_171 = arith.constant 0 : index
    %275 = vector.load %arg9[%c22_170, %c0_171] : memref<32x24xf32, #tpu.memory_space<vmem>>, vector<1x24xf32>
    tpu.vector_store %arg9[%c22_170, %c0_171], %274 {strides = array<i32>} : memref<32x24xf32, #tpu.memory_space<vmem>>, vector<1x24xf32>,
    %c23 = arith.constant 23 : index
    %c0_172 = arith.constant 0 : index
    %276 = vector.load %arg4[%c23, %c0_172] : memref<32x1xf32, #tpu.memory_space<vmem>>, vector<1x1xf32>
    %c23_173 = arith.constant 23 : index
    %c0_174 = arith.constant 0 : index
    %277 = vector.load %arg5[%c23_173, %c0_174] : memref<32x1xf32, #tpu.memory_space<vmem>>, vector<1x1xf32>
    %278 = vector.broadcast %276 : vector<1x1xf32> to vector<128x24xf32>
    %279 = arith.mulf %22, %278 : vector<128x24xf32>
    %280 = vector.broadcast %277 : vector<1x1xf32> to vector<128x24xf32>
    %281 = arith.addf %279, %280 : vector<128x24xf32>
    %cst_175 = arith.constant 0.000000e+00 : f32
    %282 = vector.broadcast %cst_175 : f32 to vector<128x24xf32>
    %283 = arith.maximumf %281, %282 : vector<128x24xf32>
    %cst_176 = arith.constant dense<0.000000e+00> : vector<24xf32>
    %284 = vector.multi_reduction <add>, %283, %cst_176 [0] : vector<128x24xf32> to vector<24xf32>
    %285 = vector.shape_cast %284 : vector<24xf32> to vector<1x24xf32>
    %c23_177 = arith.constant 23 : index
    %c0_178 = arith.constant 0 : index
    %286 = vector.load %arg9[%c23_177, %c0_178] : memref<32x24xf32, #tpu.memory_space<vmem>>, vector<1x24xf32>
    tpu.vector_store %arg9[%c23_177, %c0_178], %285 {strides = array<i32>} : memref<32x24xf32, #tpu.memory_space<vmem>>, vector<1x24xf32>,
    %c24 = arith.constant 24 : index
    %c0_179 = arith.constant 0 : index
    %287 = vector.load %arg4[%c24, %c0_179] : memref<32x1xf32, #tpu.memory_space<vmem>>, vector<1x1xf32>
    %c24_180 = arith.constant 24 : index
    %c0_181 = arith.constant 0 : index
    %288 = vector.load %arg5[%c24_180, %c0_181] : memref<32x1xf32, #tpu.memory_space<vmem>>, vector<1x1xf32>
    %289 = vector.broadcast %287 : vector<1x1xf32> to vector<128x24xf32>
    %290 = arith.mulf %22, %289 : vector<128x24xf32>
    %291 = vector.broadcast %288 : vector<1x1xf32> to vector<128x24xf32>
    %292 = arith.addf %290, %291 : vector<128x24xf32>
    %cst_182 = arith.constant 0.000000e+00 : f32
    %293 = vector.broadcast %cst_182 : f32 to vector<128x24xf32>
    %294 = arith.maximumf %292, %293 : vector<128x24xf32>
    %cst_183 = arith.constant dense<0.000000e+00> : vector<24xf32>
    %295 = vector.multi_reduction <add>, %294, %cst_183 [0] : vector<128x24xf32> to vector<24xf32>
    %296 = vector.shape_cast %295 : vector<24xf32> to vector<1x24xf32>
    %c24_184 = arith.constant 24 : index
    %c0_185 = arith.constant 0 : index
    %297 = vector.load %arg9[%c24_184, %c0_185] : memref<32x24xf32, #tpu.memory_space<vmem>>, vector<1x24xf32>
    tpu.vector_store %arg9[%c24_184, %c0_185], %296 {strides = array<i32>} : memref<32x24xf32, #tpu.memory_space<vmem>>, vector<1x24xf32>,
    %c25 = arith.constant 25 : index
    %c0_186 = arith.constant 0 : index
    %298 = vector.load %arg4[%c25, %c0_186] : memref<32x1xf32, #tpu.memory_space<vmem>>, vector<1x1xf32>
    %c25_187 = arith.constant 25 : index
    %c0_188 = arith.constant 0 : index
    %299 = vector.load %arg5[%c25_187, %c0_188] : memref<32x1xf32, #tpu.memory_space<vmem>>, vector<1x1xf32>
    %300 = vector.broadcast %298 : vector<1x1xf32> to vector<128x24xf32>
    %301 = arith.mulf %22, %300 : vector<128x24xf32>
    %302 = vector.broadcast %299 : vector<1x1xf32> to vector<128x24xf32>
    %303 = arith.addf %301, %302 : vector<128x24xf32>
    %cst_189 = arith.constant 0.000000e+00 : f32
    %304 = vector.broadcast %cst_189 : f32 to vector<128x24xf32>
    %305 = arith.maximumf %303, %304 : vector<128x24xf32>
    %cst_190 = arith.constant dense<0.000000e+00> : vector<24xf32>
    %306 = vector.multi_reduction <add>, %305, %cst_190 [0] : vector<128x24xf32> to vector<24xf32>
    %307 = vector.shape_cast %306 : vector<24xf32> to vector<1x24xf32>
    %c25_191 = arith.constant 25 : index
    %c0_192 = arith.constant 0 : index
    %308 = vector.load %arg9[%c25_191, %c0_192] : memref<32x24xf32, #tpu.memory_space<vmem>>, vector<1x24xf32>
    tpu.vector_store %arg9[%c25_191, %c0_192], %307 {strides = array<i32>} : memref<32x24xf32, #tpu.memory_space<vmem>>, vector<1x24xf32>,
    %c26 = arith.constant 26 : index
    %c0_193 = arith.constant 0 : index
    %309 = vector.load %arg4[%c26, %c0_193] : memref<32x1xf32, #tpu.memory_space<vmem>>, vector<1x1xf32>
    %c26_194 = arith.constant 26 : index
    %c0_195 = arith.constant 0 : index
    %310 = vector.load %arg5[%c26_194, %c0_195] : memref<32x1xf32, #tpu.memory_space<vmem>>, vector<1x1xf32>
    %311 = vector.broadcast %309 : vector<1x1xf32> to vector<128x24xf32>
    %312 = arith.mulf %22, %311 : vector<128x24xf32>
    %313 = vector.broadcast %310 : vector<1x1xf32> to vector<128x24xf32>
    %314 = arith.addf %312, %313 : vector<128x24xf32>
    %cst_196 = arith.constant 0.000000e+00 : f32
    %315 = vector.broadcast %cst_196 : f32 to vector<128x24xf32>
    %316 = arith.maximumf %314, %315 : vector<128x24xf32>
    %cst_197 = arith.constant dense<0.000000e+00> : vector<24xf32>
    %317 = vector.multi_reduction <add>, %316, %cst_197 [0] : vector<128x24xf32> to vector<24xf32>
    %318 = vector.shape_cast %317 : vector<24xf32> to vector<1x24xf32>
    %c26_198 = arith.constant 26 : index
    %c0_199 = arith.constant 0 : index
    %319 = vector.load %arg9[%c26_198, %c0_199] : memref<32x24xf32, #tpu.memory_space<vmem>>, vector<1x24xf32>
    tpu.vector_store %arg9[%c26_198, %c0_199], %318 {strides = array<i32>} : memref<32x24xf32, #tpu.memory_space<vmem>>, vector<1x24xf32>,
    %c27 = arith.constant 27 : index
    %c0_200 = arith.constant 0 : index
    %320 = vector.load %arg4[%c27, %c0_200] : memref<32x1xf32, #tpu.memory_space<vmem>>, vector<1x1xf32>
    %c27_201 = arith.constant 27 : index
    %c0_202 = arith.constant 0 : index
    %321 = vector.load %arg5[%c27_201, %c0_202] : memref<32x1xf32, #tpu.memory_space<vmem>>, vector<1x1xf32>
    %322 = vector.broadcast %320 : vector<1x1xf32> to vector<128x24xf32>
    %323 = arith.mulf %22, %322 : vector<128x24xf32>
    %324 = vector.broadcast %321 : vector<1x1xf32> to vector<128x24xf32>
    %325 = arith.addf %323, %324 : vector<128x24xf32>
    %cst_203 = arith.constant 0.000000e+00 : f32
    %326 = vector.broadcast %cst_203 : f32 to vector<128x24xf32>
    %327 = arith.maximumf %325, %326 : vector<128x24xf32>
    %cst_204 = arith.constant dense<0.000000e+00> : vector<24xf32>
    %328 = vector.multi_reduction <add>, %327, %cst_204 [0] : vector<128x24xf32> to vector<24xf32>
    %329 = vector.shape_cast %328 : vector<24xf32> to vector<1x24xf32>
    %c27_205 = arith.constant 27 : index
    %c0_206 = arith.constant 0 : index
    %330 = vector.load %arg9[%c27_205, %c0_206] : memref<32x24xf32, #tpu.memory_space<vmem>>, vector<1x24xf32>
    tpu.vector_store %arg9[%c27_205, %c0_206], %329 {strides = array<i32>} : memref<32x24xf32, #tpu.memory_space<vmem>>, vector<1x24xf32>,
    %c28 = arith.constant 28 : index
    %c0_207 = arith.constant 0 : index
    %331 = vector.load %arg4[%c28, %c0_207] : memref<32x1xf32, #tpu.memory_space<vmem>>, vector<1x1xf32>
    %c28_208 = arith.constant 28 : index
    %c0_209 = arith.constant 0 : index
    %332 = vector.load %arg5[%c28_208, %c0_209] : memref<32x1xf32, #tpu.memory_space<vmem>>, vector<1x1xf32>
    %333 = vector.broadcast %331 : vector<1x1xf32> to vector<128x24xf32>
    %334 = arith.mulf %22, %333 : vector<128x24xf32>
    %335 = vector.broadcast %332 : vector<1x1xf32> to vector<128x24xf32>
    %336 = arith.addf %334, %335 : vector<128x24xf32>
    %cst_210 = arith.constant 0.000000e+00 : f32
    %337 = vector.broadcast %cst_210 : f32 to vector<128x24xf32>
    %338 = arith.maximumf %336, %337 : vector<128x24xf32>
    %cst_211 = arith.constant dense<0.000000e+00> : vector<24xf32>
    %339 = vector.multi_reduction <add>, %338, %cst_211 [0] : vector<128x24xf32> to vector<24xf32>
    %340 = vector.shape_cast %339 : vector<24xf32> to vector<1x24xf32>
    %c28_212 = arith.constant 28 : index
    %c0_213 = arith.constant 0 : index
    %341 = vector.load %arg9[%c28_212, %c0_213] : memref<32x24xf32, #tpu.memory_space<vmem>>, vector<1x24xf32>
    tpu.vector_store %arg9[%c28_212, %c0_213], %340 {strides = array<i32>} : memref<32x24xf32, #tpu.memory_space<vmem>>, vector<1x24xf32>,
    %c29 = arith.constant 29 : index
    %c0_214 = arith.constant 0 : index
    %342 = vector.load %arg4[%c29, %c0_214] : memref<32x1xf32, #tpu.memory_space<vmem>>, vector<1x1xf32>
    %c29_215 = arith.constant 29 : index
    %c0_216 = arith.constant 0 : index
    %343 = vector.load %arg5[%c29_215, %c0_216] : memref<32x1xf32, #tpu.memory_space<vmem>>, vector<1x1xf32>
    %344 = vector.broadcast %342 : vector<1x1xf32> to vector<128x24xf32>
    %345 = arith.mulf %22, %344 : vector<128x24xf32>
    %346 = vector.broadcast %343 : vector<1x1xf32> to vector<128x24xf32>
    %347 = arith.addf %345, %346 : vector<128x24xf32>
    %cst_217 = arith.constant 0.000000e+00 : f32
    %348 = vector.broadcast %cst_217 : f32 to vector<128x24xf32>
    %349 = arith.maximumf %347, %348 : vector<128x24xf32>
    %cst_218 = arith.constant dense<0.000000e+00> : vector<24xf32>
    %350 = vector.multi_reduction <add>, %349, %cst_218 [0] : vector<128x24xf32> to vector<24xf32>
    %351 = vector.shape_cast %350 : vector<24xf32> to vector<1x24xf32>
    %c29_219 = arith.constant 29 : index
    %c0_220 = arith.constant 0 : index
    %352 = vector.load %arg9[%c29_219, %c0_220] : memref<32x24xf32, #tpu.memory_space<vmem>>, vector<1x24xf32>
    tpu.vector_store %arg9[%c29_219, %c0_220], %351 {strides = array<i32>} : memref<32x24xf32, #tpu.memory_space<vmem>>, vector<1x24xf32>,
    %c30 = arith.constant 30 : index
    %c0_221 = arith.constant 0 : index
    %353 = vector.load %arg4[%c30, %c0_221] : memref<32x1xf32, #tpu.memory_space<vmem>>, vector<1x1xf32>
    %c30_222 = arith.constant 30 : index
    %c0_223 = arith.constant 0 : index
    %354 = vector.load %arg5[%c30_222, %c0_223] : memref<32x1xf32, #tpu.memory_space<vmem>>, vector<1x1xf32>
    %355 = vector.broadcast %353 : vector<1x1xf32> to vector<128x24xf32>
    %356 = arith.mulf %22, %355 : vector<128x24xf32>
    %357 = vector.broadcast %354 : vector<1x1xf32> to vector<128x24xf32>
    %358 = arith.addf %356, %357 : vector<128x24xf32>
    %cst_224 = arith.constant 0.000000e+00 : f32
    %359 = vector.broadcast %cst_224 : f32 to vector<128x24xf32>
    %360 = arith.maximumf %358, %359 : vector<128x24xf32>
    %cst_225 = arith.constant dense<0.000000e+00> : vector<24xf32>
    %361 = vector.multi_reduction <add>, %360, %cst_225 [0] : vector<128x24xf32> to vector<24xf32>
    %362 = vector.shape_cast %361 : vector<24xf32> to vector<1x24xf32>
    %c30_226 = arith.constant 30 : index
    %c0_227 = arith.constant 0 : index
    %363 = vector.load %arg9[%c30_226, %c0_227] : memref<32x24xf32, #tpu.memory_space<vmem>>, vector<1x24xf32>
    tpu.vector_store %arg9[%c30_226, %c0_227], %362 {strides = array<i32>} : memref<32x24xf32, #tpu.memory_space<vmem>>, vector<1x24xf32>,
    %c31 = arith.constant 31 : index
    %c0_228 = arith.constant 0 : index
    %364 = vector.load %arg4[%c31, %c0_228] : memref<32x1xf32, #tpu.memory_space<vmem>>, vector<1x1xf32>
    %c31_229 = arith.constant 31 : index
    %c0_230 = arith.constant 0 : index
    %365 = vector.load %arg5[%c31_229, %c0_230] : memref<32x1xf32, #tpu.memory_space<vmem>>, vector<1x1xf32>
    %366 = vector.broadcast %364 : vector<1x1xf32> to vector<128x24xf32>
    %367 = arith.mulf %22, %366 : vector<128x24xf32>
    %368 = vector.broadcast %365 : vector<1x1xf32> to vector<128x24xf32>
    %369 = arith.addf %367, %368 : vector<128x24xf32>
    %cst_231 = arith.constant 0.000000e+00 : f32
    %370 = vector.broadcast %cst_231 : f32 to vector<128x24xf32>
    %371 = arith.maximumf %369, %370 : vector<128x24xf32>
    %cst_232 = arith.constant dense<0.000000e+00> : vector<24xf32>
    %372 = vector.multi_reduction <add>, %371, %cst_232 [0] : vector<128x24xf32> to vector<24xf32>
    %373 = vector.shape_cast %372 : vector<24xf32> to vector<1x24xf32>
    %c31_233 = arith.constant 31 : index
    %c0_234 = arith.constant 0 : index
    %374 = vector.load %arg9[%c31_233, %c0_234] : memref<32x24xf32, #tpu.memory_space<vmem>>, vector<1x24xf32>
    tpu.vector_store %arg9[%c31_233, %c0_234], %373 {strides = array<i32>} : memref<32x24xf32, #tpu.memory_space<vmem>>, vector<1x24xf32>,
    %c0_235 = arith.constant 0 : index
    %c0_236 = arith.constant 0 : index
    %375 = vector.load %arg9[%c0_235, %c0_236] : memref<32x24xf32, #tpu.memory_space<vmem>>, vector<32x24xf32>
    %376 = arith.truncf %375 : vector<32x24xf32> to vector<32x24xbf16>
    %c0_237 = arith.constant 0 : index
    %c0_238 = arith.constant 0 : index
    %377 = vector.load %arg6[%c0_237, %c0_238] : memref<16x32xbf16, #tpu.memory_space<vmem>>, vector<16x32xbf16>
    %cst_239 = arith.constant dense<0.000000e+00> : vector<16x24xf32>
    %378 = tpu.matmul %377, %376, %cst_239 {dimension_numbers = #tpu.dot_dimension_numbers<[1], [0], [0], [1], [0, 0, 1, 1], [], []>} : vector<16x32xbf16>, vector<32x24xbf16>, vector<16x24xf32> -> vector<16x24xf32>
    %c0_240 = arith.constant 0 : index
    %c0_241 = arith.constant 0 : index
    %379 = vector.load %arg7[%c0_240, %c0_241] : memref<16x1xf32, #tpu.memory_space<vmem>>, vector<16x1xf32>
    %380 = vector.broadcast %379 : vector<16x1xf32> to vector<16x24xf32>
    %381 = arith.addf %378, %380 : vector<16x24xf32>
    %c0_242 = arith.constant 0 : index
    %c0_243 = arith.constant 0 : index
    %382 = vector.load %arg8[%c0_242, %c0_243] : memref<16x24xf32, #tpu.memory_space<vmem>>, vector<16x24xf32>
    tpu.vector_store %arg8[%c0_242, %c0_243], %381 {strides = array<i32>} : memref<16x24xf32, #tpu.memory_space<vmem>>, vector<16x24xf32>,
    return
  }
  func.func @transform_0(%arg0: i32) -> (i32, i32) {
    %c0_i32 = arith.constant 0 : i32
    %c0_i32_0 = arith.constant 0 : i32
    return %c0_i32, %arg0 : i32, i32
  }
  func.func @transform_1(%arg0: i32) -> (i32, i32) {
    %c0_i32 = arith.constant 0 : i32
    %c0_i32_0 = arith.constant 0 : i32
    %c0_i32_1 = arith.constant 0 : i32
    return %c0_i32, %c0_i32_0 : i32, i32
  }
  func.func @transform_2(%arg0: i32) -> (i32, i32) {
    %c0_i32 = arith.constant 0 : i32
    %c0_i32_0 = arith.constant 0 : i32
    %c0_i32_1 = arith.constant 0 : i32
    return %c0_i32, %c0_i32_0 : i32, i32
  }
  func.func @transform_3(%arg0: i32) -> (i32, i32) {
    %c0_i32 = arith.constant 0 : i32
    %c0_i32_0 = arith.constant 0 : i32
    %c0_i32_1 = arith.constant 0 : i32
    return %c0_i32, %c0_i32_0 : i32, i32
  }
  func.func @transform_4(%arg0: i32) -> (i32, i32) {
    %c0_i32 = arith.constant 0 : i32
    %c0_i32_0 = arith.constant 0 : i32
    %c0_i32_1 = arith.constant 0 : i32
    return %c0_i32, %c0_i32_0 : i32, i32
  }
  func.func @transform_5(%arg0: i32) -> (i32, i32) {
    %c0_i32 = arith.constant 0 : i32
    %c0_i32_0 = arith.constant 0 : i32
    %c0_i32_1 = arith.constant 0 : i32
    return %c0_i32, %c0_i32_0 : i32, i32
  }
  func.func @transform_6(%arg0: i32) -> (i32, i32) {
    %c0_i32 = arith.constant 0 : i32
    %c0_i32_0 = arith.constant 0 : i32
    %c0_i32_1 = arith.constant 0 : i32
    return %c0_i32, %c0_i32_0 : i32, i32
  }
  func.func @transform_7(%arg0: i32) -> (i32, i32) {
    %c0_i32 = arith.constant 0 : i32
    %c0_i32_0 = arith.constant 0 : i32
    return %c0_i32, %arg0 : i32, i32
  }
}

</mosaic_0001>

<bundles_post_ra>
// kernel: tpu_custom_call.1
= control target key start
LH: loop header
LB: loop body
LE: loop exit
PB: predicated region body
PF: predicated region fallthrough
CT: control target
= control target key end

     0   :  { %v3916_v2 = vmov 0   ;;  %s7422_s0 = inlined_call_operand.vmem [shape: bf16[128,24], index: 0, kind: input, shape index: {}]   ;;  %s7423_s1 = inlined_call_operand.vmem [shape: bf16[128,128], index: 1, kind: input, shape index: {}]   ;;  %s7424_s2 = inlined_call_operand.vmem [shape: f32[128,1], index: 2, kind: input, shape index: {}]   ;;  %s7425_s3 = inlined_call_operand.vmem [shape: f32[32,1], index: 3, kind: input, shape index: {}]   ;;  %s7426_s4 = inlined_call_operand.vmem [shape: f32[32,1], index: 4, kind: input, shape index: {}]   ;;  %s7427_s5 = inlined_call_operand.vmem [shape: bf16[16,32], index: 5, kind: input, shape index: {}]   ;;  %s7428_s6 = inlined_call_operand.vmem [shape: f32[16,1], index: 6, kind: input, shape index: {}]   ;;  %s7429_s7 = inlined_call_operand.hbm [shape: f32[16,24], index: 7, kind: output, shape index: {}]  }
   0x1   :  { %v3873_v0 = vld [vmem:[%s7422_s0 + $0x38] sm:$0xff]   ;;  %v3874_v1 = vld [vmem:[%s7422_s0 + $0x30] sm:$0xff]   ;;  %3871 = vset.pattern.permute.xlu0 %v3916_v2  ;;  %3872 = vset.pattern.permute.xlu1 %v3916_v2  ;;  %v3875_v3 = vld [vmem:[%s7422_s0 + $0x28] sm:$0xff]  }
   0x2   :  { %3681 = vmatprep.subr.bf16.mxu0 %v3873_v0  ;;  %3721 = vmatprep.subr.bf16.mxu1 %v3873_v0  ;;  %v3876_v4 = vld [vmem:[%s7422_s0 + $0x20] sm:$0xff]   ;;  %v3882_v6 = vld [vmem:[%s7423_s1 + $0x30] sm:$0xff]   ;;  %v3877_v7 = vld [vmem:[%s7422_s0 + $0x18] sm:$0xff]  }
   0x3   :  { %3682 = vmatpush3.bf16.msra.mxu0 %v3873_v0  ;;  %3729 = vmatpush3.bf16.msra.mxu1 %v3873_v0  ;;  %v3881_v5 = vld [vmem:[%s7423_s1] sm:$0xff]   ;;  %v3878_v8 = vld [vmem:[%s7422_s0 + $0x10] sm:$0xff]   ;;  %v61_v11 = vld [vmem:[%s7424_s2 + $0x8] sm:$0xff] }
   0x4   :  { %3683 = vmatprep.subr.bf16.mxu0 %v3874_v1  ;;  %3722 = vmatprep.subr.bf16.mxu1 %v3874_v1  ;;  %v60_v9 = vld [vmem:[%s7424_s2] sm:$0xff]  ;;  %v62_v10 = vld [vmem:[%s7424_s2 + $0x10] sm:$0xff]  ;;  %v63_v12 = vld [vmem:[%s7424_s2 + $0x18] sm:$0xff] }
   0x5   :  { %3697 = vmatprep.mubr.bf16.mxu0 %v3881_v5  ;;  %3709 = vmatprep.mubr.bf16.mxu1 %v3882_v6  ;;  %v3879_v13 = vld [vmem:[%s7422_s0 + $0x8] sm:$0xff]   ;;  %v64_v14 = vld [vmem:[%s7424_s2 + $0x20] sm:$0xff] }
   0x6   :  { %78 = vperm.xlu0 %3871, %v60_v9   ;;  %88 = vperm.xlu1 %3872, %v62_v10   ;;  %v65_v15 = vld [vmem:[%s7424_s2 + $0x28] sm:$0xff] }
   0x7   :  { %3684 = vmatpush3.bf16.msra.mxu0 %v3874_v1  ;;  %3730 = vmatpush3.bf16.msra.mxu1 %v3874_v1 }
   0x8   :  { %3685 = vmatprep.subr.bf16.mxu0 %v3875_v3  ;;  %3723 = vmatprep.subr.bf16.mxu1 %v3875_v3 }
   0xa   :  { %83 = vperm.xlu0 %3871, %v61_v11   ;;  %93 = vperm.xlu1 %3872, %v63_v12  }
   0xb   :  { %3686 = vmatpush3.bf16.msra.mxu0 %v3875_v3  ;;  %3731 = vmatpush3.bf16.msra.mxu1 %v3875_v3 }
   0xc   :  { %3687 = vmatprep.subr.bf16.mxu0 %v3876_v4  ;;  %3724 = vmatprep.subr.bf16.mxu1 %v3876_v4 }
   0xf   :  { %3688 = vmatpush3.bf16.msra.mxu0 %v3876_v4  ;;  %3732 = vmatpush3.bf16.msra.mxu1 %v3876_v4 }
  0x10   :  { %3689 = vmatprep.subr.bf16.mxu0 %v3877_v7  ;;  %3725 = vmatprep.subr.bf16.mxu1 %v3877_v7 }
  0x13   :  { %3690 = vmatpush3.bf16.msra.mxu0 %v3877_v7  ;;  %3733 = vmatpush3.bf16.msra.mxu1 %v3877_v7 }
  0x14   :  { %3691 = vmatprep.subr.bf16.mxu0 %v3878_v8  ;;  %3726 = vmatprep.subr.bf16.mxu1 %v3878_v8 }
  0x15   :  { %12 = vsyncpa [#allocation4], 0  ;;  %v3880_v16 = vld [vmem:[%s7422_s0] sm:$0xff]   ;;  %98 = vperm.xlu0 %3871, %v64_v14   ;;  %103 = vperm.xlu1 %3872, %v65_v15   ;;  %v66_v17 = vld [vmem:[%s7424_s2 + $0x30] sm:$0xff]  ;;  %vm349_vm0 = vcmask 195584   ;;  %vm578_vm3 = vcmask 188416  }
  0x16   :  { %v67_v18 = vld [vmem:[%s7424_s2 + $0x38] sm:$0xff]  ;;  %v3883_v19 = vld [vmem:[%s7423_s1 + $0x8] sm:$0xff]   ;;  %v68_v21 = vld [vmem:[%s7424_s2 + $0x40] sm:$0xff]  ;;  %vm3918_vm4 = vmmov 0   ;;  %vm3581_vm5 = vcmask 261120  }
  0x17   :  { %3692 = vmatpush3.bf16.msra.mxu0 %v3878_v8  ;;  %3734 = vmatpush3.bf16.msra.mxu1 %v3878_v8  ;;  %v3884_v20 = vld [vmem:[%s7423_s1 + $0x38] sm:$0xff]   ;;  %v69_v22 = vld [vmem:[%s7424_s2 + $0x48] sm:$0xff]  ;;  %v3885_v23 = vld [vmem:[%s7423_s1 + $0x10] sm:$0xff]  }
  0x18   :  { %3693 = vmatprep.subr.bf16.mxu0 %v3879_v13  ;;  %3727 = vmatprep.subr.bf16.mxu1 %v3879_v13  ;;  %v70_v24 = vld [vmem:[%s7424_s2 + $0x50] sm:$0xff]  ;;  %v71_v25 = vld [vmem:[%s7424_s2 + $0x58] sm:$0xff]  ;;  %v72_v27 = vld [vmem:[%s7424_s2 + $0x60] sm:$0xff] }
  0x19   :  { %108 = vperm.xlu0 %3871, %v66_v17   ;;  %113 = vperm.xlu1 %3872, %v67_v18   ;;  %v3886_v26 = vld [vmem:[%s7423_s1 + $0x18] sm:$0xff]   ;;  %v73_v28 = vld [vmem:[%s7424_s2 + $0x68] sm:$0xff]  ;;  %v3887_v29 = vld [vmem:[%s7423_s1 + $0x20] sm:$0xff]  }
  0x1a   :  { %v74_v30 = vld [vmem:[%s7424_s2 + $0x70] sm:$0xff]  ;;  %v75_v31 = vld [vmem:[%s7424_s2 + $0x78] sm:$0xff]  ;;  %v3888_v32 = vld [vmem:[%s7423_s1 + $0x28] sm:$0xff]  }
  0x1b   :  { %3694 = vmatpush3.bf16.msra.mxu0 %v3879_v13  ;;  %3735 = vmatpush3.bf16.msra.mxu1 %v3879_v13  ;;  %v3564_v33 = vld [vmem:[%s7428_s6] sm:$0xff]  ;;  %v3565_v34 = vld [vmem:[%s7428_s6 + $0x8] sm:$0xff]  ;;  %v2020_v7 = vld [vmem:[%s7425_s3 + $0x10] sm:$0x1] }
  0x1c   :  { %3695 = vmatprep.subr.bf16.mxu0 %v3880_v16  ;;  %3728 = vmatprep.subr.bf16.mxu1 %v3880_v16  ;;  %v483_v35 = vld [vmem:[%s7425_s3] sm:$0x1]  ;;  %v580_v37 = vld [vmem:[%s7425_s3 + $0x1] sm:$0x1]  ;;  %v676_v39 = vld [vmem:[%s7425_s3 + $0x2] sm:$0x1] }
  0x1d   :  { %118 = vperm.xlu0 %3871, %v68_v21   ;;  %123 = vperm.xlu1 %3872, %v69_v22   ;;  %v484_v36 = vld [vmem:[%s7426_s4] sm:$0x1]  ;;  %3737 = vpush %v483_v35  ;;  %v581_v38 = vld [vmem:[%s7426_s4 + $0x1] sm:$0x1]  ;;  %v677_v40 = vld [vmem:[%s7426_s4 + $0x2] sm:$0x1] }
  0x1e   :  { %3739 = vpush %v484_v36  ;;  %v772_v41 = vld [vmem:[%s7425_s3 + $0x3] sm:$0x1]  ;;  %v868_v43 = vld [vmem:[%s7425_s3 + $0x4] sm:$0x1]  ;;  %v964_v45 = vld [vmem:[%s7425_s3 + $0x5] sm:$0x1] }
  0x1f   :  { %3696 = vmatpush3.bf16.msra.mxu0 %v3880_v16  ;;  %3736 = vmatpush3.bf16.msra.mxu1 %v3880_v16  ;;  %3741 = vpush %v580_v37  ;;  %v773_v42 = vld [vmem:[%s7426_s4 + $0x3] sm:$0x1]  ;;  %v869_v44 = vld [vmem:[%s7426_s4 + $0x4] sm:$0x1]  ;;  %v965_v46 = vld [vmem:[%s7426_s4 + $0x5] sm:$0x1] }
  0x20   :  { %3743 = vpush %v581_v38  ;;  %v1060_v47 = vld [vmem:[%s7425_s3 + $0x6] sm:$0x1]  ;;  %v1156_v49 = vld [vmem:[%s7425_s3 + $0x7] sm:$0x1]  ;;  %v1252_v51 = vld [vmem:[%s7425_s3 + $0x8] sm:$0x1] }
  0x21   :  { %128 = vperm.xlu0 %3871, %v70_v24   ;;  %133 = vperm.xlu1 %3872, %v71_v25   ;;  %3745 = vpush %v676_v39  ;;  %v1061_v48 = vld [vmem:[%s7426_s4 + $0x6] sm:$0x1]  ;;  %v1157_v50 = vld [vmem:[%s7426_s4 + $0x7] sm:$0x1]  ;;  %v1253_v52 = vld [vmem:[%s7426_s4 + $0x8] sm:$0x1] }
  0x22   :  { %3698 = vmatmul.mubr.bf16.vlgmr.msra.gmra.mxu0 %v3883_v19  ;;  %3710 = vmatmul.mubr.bf16.vlgmr.msra.gmra.mxu1 %v3884_v20  ;;  %3747 = vpush %v677_v40  ;;  %v1348_v53 = vld [vmem:[%s7425_s3 + $0x9] sm:$0x1]  ;;  %v1444_v55 = vld [vmem:[%s7425_s3 + $0xa] sm:$0x1]  ;;  %v1540_v58 = vld [vmem:[%s7425_s3 + $0xb] sm:$0x1] }
  0x23   :  { %3701 = vmatprep.mubr.bf16.mxu0 %v3885_v23  ;;  %3749 = vpush %v772_v41  ;;  %v1349_v54 = vld [vmem:[%s7426_s4 + $0x9] sm:$0x1]  ;;  %v1445_v56 = vld [vmem:[%s7426_s4 + $0xa] sm:$0x1]  ;;  %v1541_v59 = vld [vmem:[%s7426_s4 + $0xb] sm:$0x1] }
  0x24   :  { %3751 = vpush %v773_v42  ;;  %v1636_v61 = vld [vmem:[%s7425_s3 + $0xc] sm:$0x1]  ;;  %v1732_v63 = vld [vmem:[%s7425_s3 + $0xd] sm:$0x1]  ;;  %v1828_v2 = vld [vmem:[%s7425_s3 + $0xe] sm:$0x1] }
  0x25   :  { %138 = vperm.xlu0 %3871, %v72_v27   ;;  %143 = vperm.xlu1 %3872, %v73_v28   ;;  %3753 = vpush %v868_v43  ;;  %v1637_v62 = vld [vmem:[%s7426_s4 + $0xc] sm:$0x1]  ;;  %v1733_v0 = vld [vmem:[%s7426_s4 + $0xd] sm:$0x1]  ;;  %v1829_v3 = vld [vmem:[%s7426_s4 + $0xe] sm:$0x1] }
  0x26   :  { %3755 = vpush %v869_v44  ;;  %v1924_v5 = vld [vmem:[%s7425_s3 + $0xf] sm:$0x1]  ;;  %v2021_v8 = vld [vmem:[%s7426_s4 + $0x10] sm:$0x1]  ;;  %v2116_v10 = vld [vmem:[%s7425_s3 + $0x11] sm:$0x1] }
  0x27   :  { %3757 = vpush %v964_v45  ;;  %v1925_v6 = vld [vmem:[%s7426_s4 + $0xf] sm:$0x1]  ;;  %v2117_v12 = vld [vmem:[%s7426_s4 + $0x11] sm:$0x1]  ;;  %v2212_v14 = vld [vmem:[%s7425_s3 + $0x12] sm:$0x1] }
  0x28   :  { %3759 = vpush %v965_v46  ;;  %v2213_v16 = vld [vmem:[%s7426_s4 + $0x12] sm:$0x1]  ;;  %v2308_v17 = vld [vmem:[%s7425_s3 + $0x13] sm:$0x1]  ;;  %v2404_v22 = vld [vmem:[%s7425_s3 + $0x14] sm:$0x1] }
  0x29   :  { %148 = vperm.xlu0 %3871, %v74_v30   ;;  %153 = vperm.xlu1 %3872, %v75_v31   ;;  %3761 = vpush %v1060_v47  ;;  %v2309_v19 = vld [vmem:[%s7426_s4 + $0x13] sm:$0x1]  ;;  %v2405_v24 = vld [vmem:[%s7426_s4 + $0x14] sm:$0x1]  ;;  %v2500_v28 = vld [vmem:[%s7425_s3 + $0x15] sm:$0x1] }
  0x2a   :  { %3702 = vmatmul.mubr.bf16.gmra.mxu0 %v3886_v26  ;;  %3763 = vpush %v1061_v48  ;;  %v2501_v30 = vld [vmem:[%s7426_s4 + $0x15] sm:$0x1]  ;;  %v2597_v37 = vld [vmem:[%s7426_s4 + $0x16] sm:$0x1]  ;;  %v2692_v41 = vld [vmem:[%s7425_s3 + $0x17] sm:$0x1] }
  0x2b   :  { %3705 = vmatprep.mubr.bf16.mxu0 %v3887_v29  ;;  %3765 = vpush %v1156_v49  ;;  %v2693_v44 = vld [vmem:[%s7426_s4 + $0x17] sm:$0x1]  ;;  %v2788_v47 = vld [vmem:[%s7425_s3 + $0x18] sm:$0x1] }
  0x2c   :  { %3767 = vpush %v1157_v50 }
  0x2d   :  { %3568 = vperm.xlu0 %3871, %v3564_v33   ;;  %3573 = vperm.xlu1 %3872, %v3565_v34   ;;  %3769 = vpush %v1252_v51  ;;  %v2596_v34 = vld [vmem:[%s7425_s3 + $0x16] sm:$0x1]  ;;  %v2789_v51 = vld [vmem:[%s7426_s4 + $0x18] sm:$0x1] }
  0x2e   :  { %3771 = vpush %v1253_v52 }
  0x2f   :  { %3773 = vpush %v1348_v53 }
  0x30   :  { %3775 = vpush %v1349_v54 }
  0x31   :  { %3777 = vpush %v1444_v55  ;;  %v2884_v55 = vld [vmem:[%s7425_s3 + $0x19] sm:$0x1] }
  0x32   :  { %3706 = vmatmul.mubr.bf16.gmra.mxu0 %v3888_v32  ;;  %3779 = vpush %v1445_v56 }
  0x33   :  { %3781 = vpush %v1540_v58  ;;  %v2885_v58 = vld [vmem:[%s7426_s4 + $0x19] sm:$0x1] }
  0x34   :  { %3783 = vpush %v1541_v59 }
  0x35   :  { %3785 = vpush %v1636_v61 }
  0x36   :  { %3787 = vpush %v1637_v62  ;;  %v2980_v62 = vld [vmem:[%s7425_s3 + $0x1a] sm:$0x1] }
  0x37   :  { %3789 = vpush %v1732_v63 }
  0x38   :  { %3791 = vpush %v1733_v0 }
  0x39   :  { %3793 = vpush %v1828_v2  ;;  %v2981_v2 = vld [vmem:[%s7426_s4 + $0x1a] sm:$0x1] }
  0x3a   :  { %3795 = vpush %v1829_v3 }
  0x3b   :  { %3797 = vpush %v1924_v5  ;;  %v3076_v5 = vld [vmem:[%s7425_s3 + $0x1b] sm:$0x1] }
  0x3c   :  { %3799 = vpush %v1925_v6 }
  0x3d   :  { %3801 = vpush %v2020_v7 }
  0x3e   :  { %3803 = vpush %v2021_v8 }
  0x3f   :  { %3805 = vpush %v2116_v10 }
  0x40   :  { %3807 = vpush %v2117_v12 }
  0x41   :  { %3809 = vpush %v2212_v14 }
  0x42   :  { %3811 = vpush %v2213_v16 }
  0x43   :  { %3813 = vpush %v2308_v17 }
  0x44   :  { %3815 = vpush %v2309_v19  ;;  %v3268_v19 = vld [vmem:[%s7425_s3 + $0x1d] sm:$0x1] }
  0x45   :  { %3817 = vpush %v2404_v22 }
  0x46   :  { %3819 = vpush %v2405_v24 }
  0x47   :  { %3821 = vpush %v2500_v28  ;;  %v3364_v28 = vld [vmem:[%s7425_s3 + $0x1e] sm:$0x1] }
  0x48   :  { %3823 = vpush %v2501_v30 }
  0x49   :  { %3825 = vpush %v2596_v34 }
  0x4a   :  { %3827 = vpush %v2597_v37 }
  0x4b   :  { %3829 = vpush %v2692_v41 }
  0x4c   :  { %3831 = vpush %v2693_v44 }
  0x4d   :  { %3833 = vpush %v2788_v47 }
  0x4e   :  { %3835 = vpush %v2789_v51 }
  0x4f   :  { %3837 = vpush %v2884_v55 }
  0x50   :  { %3839 = vpush %v2885_v58 }
  0x51   :  { %3841 = vpush %v2980_v62 }
  0x52   :  { %3843 = vpush %v2981_v2 }
  0x53   :  { %3845 = vpush %v3076_v5 }
  0x81   :  { %v79_v57 = vpop.permute.xlu0 %78  ;;  %v89_v60 = vpop.permute.xlu1 %88 }
  0x85   :  { %v84_v1 = vpop.permute.xlu0 %83  ;;  %v94_v4 = vpop.permute.xlu1 %93 }
  0x90   :  { %v99_v9 = vpop.permute.xlu0 %98  ;;  %v104_v13 = vpop.permute.xlu1 %103 }
  0x94   :  { %v109_v20 = vpop.permute.xlu0 %108  ;;  %v114_v25 = vpop.permute.xlu1 %113 }
  0x98   :  { %v119_v38 = vpop.permute.xlu0 %118  ;;  %v124_v45 = vpop.permute.xlu1 %123 }
  0x9c   :  { %v129_v59 = vpop.permute.xlu0 %128  ;;  %v134_v6 = vpop.permute.xlu1 %133 }
  0xe2   :  { %v3699_v11 = vpop.f32.mrf.mxu0  ;;  %v4229_v48 = vpop.f32.mrf.mxu1 }
  0xe3   :  { %v4192_v26 = vadd.f32 %v3699_v11, %v89_v60  ;;  %v3172_v11 = vld [vmem:[%s7425_s3 + $0x1c] sm:$0x1] }
  0xe4   :  { %v286_v15 = vpop.f32.mrf.mxu0  ;;  %v334_v63 = vpop.f32.mrf.mxu1 }
  0xe5   :  { %v4184_v21 = vadd.f32 %v286_v15, %v79_v57  ;;  %v353_v39 = vsel %vm349_vm0, %v4192_v26, 0.0  ;;  %v3173_v15 = vld [vmem:[%s7426_s4 + $0x1c] sm:$0x1] }
  0xe6   :  { %v3700_v18 = vpop.f32.mrf.mxu0  ;;  %v3712_v12 = vpop.f32.mrf.mxu1 }
  0xe7   :  { %v350_v31 = vsel %vm349_vm0, %v4184_v21, 0.0  ;;  %v4204_v32 = vadd.f32 %v3700_v18, %v94_v4 }
  0xe8   :  { %v289_v23 = vpop.f32.mrf.mxu0  ;;  %v337_v30 = vpop.f32.mrf.mxu1 }
  0xe9   :  { %v4194_v27 = vadd.f32 %v289_v23, %v84_v1  ;;  %v355_v46 = vsel %vm349_vm0, %v4204_v32, 0.0  ;;  %v3269_v23 = vld [vmem:[%s7426_s4 + $0x1d] sm:$0x1] }
  0xea   :  { %v3703_v29 = vpop.f32.mrf.mxu0 }
  0xeb   :  { %v351_v33 = vsel %vm349_vm0, %v4194_v27, 0.0  ;;  %v4234_v52 = vadd.f32 %v3703_v29, %v109_v20  ;;  %v139_v20 = vpop.permute.xlu0 %138  ;;  %v144_v29 = vpop.permute.xlu1 %143 }
  0xec   :  { %v352_v35 = vadd.f32 %v351_v33, %v350_v31  ;;  %v302_v36 = vpop.f32.mrf.mxu0  ;;  %v3365_v33 = vld [vmem:[%s7426_s4 + $0x1e] sm:$0x1]  ;;  %v4296_v34 = vadd.f32 %v334_v63, %v139_v20 }
  0xed   :  { %v4216_v40 = vadd.f32 %v302_v36, %v99_v9  ;;  %v361_v3 = vsel %vm349_vm0, %v4234_v52, 0.0  ;;  %v3077_v9 = vld [vmem:[%s7426_s4 + $0x1b] sm:$0x1]  ;;  %v3460_v36 = vld [vmem:[%s7425_s3 + $0x1f] sm:$0x1]  ;;  %s3738_s3 = spop %3737 }
  0xee   :  { %v354_v42 = vadd.f32 %v353_v39, %v352_v35  ;;  %v3704_v43 = vpop.f32.mrf.mxu0  ;;  %3847 = vpush %v3077_v9  ;;  %v4306_v39 = vadd.f32 %v337_v30, %v144_v29 }
  0xef   :  { %v357_v53 = vsel %vm349_vm0, %v4216_v40, 0.0  ;;  %v4246_v60 = vadd.f32 %v3704_v43, %v114_v25  ;;  %3849 = vpush %v3172_v11 }
  0xf0   :  { %v356_v49 = vadd.f32 %v355_v46, %v354_v42  ;;  %v305_v50 = vpop.f32.mrf.mxu0  ;;  %3851 = vpush %v3173_v15  ;;  %v149_v42 = vpop.permute.xlu0 %148 }
  0xf1   :  { %v4238_v54 = vadd.f32 %v305_v50, %v104_v13  ;;  %v363_v10 = vsel %vm349_vm0, %v4246_v60, 0.0  ;;  %3853 = vpush %v3268_v19  ;;  %v4311_v44 = vadd.f32 %v4229_v48, %v149_v42  ;;  %v154_v46 = vpop.permute.xlu1 %153  ;;  %v375_v50 = vsel %vm349_vm0, %v4306_v39, 0.0 }
  0xf2   :  { %v358_v56 = vadd.f32 %v357_v53, %v356_v49  ;;  %v3707_v57 = vpop.f32.mrf.mxu0  ;;  %3855 = vpush %v3269_v23  ;;  %v4315_v49 = vadd.f32 %v3712_v12, %v154_v46 }
  0xf3   :  { %v359_v61 = vsel %vm349_vm0, %v4238_v54, 0.0  ;;  %v4274_v16 = vadd.f32 %v3707_v57, %v129_v59  ;;  %3857 = vpush %v3364_v28  ;;  %v377_v53 = vsel %vm349_vm0, %v4311_v44, 0.0 }
  0xf4   :  { %v360_v0 = vadd.f32 %v359_v61, %v358_v56  ;;  %v318_v1 = vpop.f32.mrf.mxu0  ;;  %3859 = vpush %v3365_v33  ;;  %v379_v48 = vsel %vm349_vm0, %v4315_v49, 0.0 }
  0xf5   :  { %v4258_v4 = vadd.f32 %v318_v1, %v119_v38  ;;  %v369_v35 = vsel %vm349_vm0, %v4274_v16, 0.0  ;;  %v3461_v38 = vld [vmem:[%s7426_s4 + $0x1f] sm:$0x1]  ;;  %3861 = vpush %v3460_v36  ;;  %s3740_s4 = spop %3739 }
  0xf6   :  { %v362_v7 = vadd.f32 %v361_v3, %v360_v0  ;;  %v3708_v8 = vpop.f32.mrf.mxu0  ;;  %3863 = vpush %v3461_v38  ;;  %s3742_s15 = spop %3741 }
  0xf7   :  { %v365_v17 = vsel %vm349_vm0, %v4258_v4, 0.0  ;;  %v4286_v24 = vadd.f32 %v3708_v8, %v134_v6  ;;  %s3744_s0 = spop %3743 }
  0xf8   :  { %v364_v13 = vadd.f32 %v363_v10, %v362_v7  ;;  %v321_v14 = vpop.f32.mrf.mxu0  ;;  %s3746_s16 = spop %3745 }
  0xf9   :  { %v4278_v18 = vadd.f32 %v321_v14, %v124_v45  ;;  %v371_v41 = vsel %vm349_vm0, %v4286_v24, 0.0  ;;  %v373_v45 = vsel %vm349_vm0, %v4296_v34, 0.0  ;;  %s3748_s17 = spop %3747 }
  0xfa   :  { %v366_v22 = vadd.f32 %v365_v17, %v364_v13  ;;  %s3750_s18 = spop %3749 }
  0xfb   :  { %v367_v25 = vsel %vm349_vm0, %v4278_v18, 0.0  ;;  %s3752_s19 = spop %3751 }
  0xfc   :  { %v368_v31 = vadd.f32 %v367_v25, %v366_v22  ;;  %s3754_s20 = spop %3753 }
  0xfd   :  { %s4419_s21 = spop %3755 }
  0xfe   :  { %v370_v37 = vadd.f32 %v369_v35, %v368_v31  ;;  %s4421_s2 = spop %3757 }
  0xff   :  { %s3760_s22 = spop %3759 }
 0x100   :  { %v372_v43 = vadd.f32 %v371_v41, %v370_v37  ;;  %s3762_s23 = spop %3761 }
 0x101   :  { %s3764_s1 = spop %3763 }
 0x102   :  { %v374_v47 = vadd.f32 %v373_v45, %v372_v43  ;;  %s3766_s24 = spop %3765 }
 0x103   :  { %s3768_s25 = spop %3767 }
 0x104   :  { %v376_v51 = vadd.f32 %v375_v50, %v374_v47  ;;  %s4423_s26 = spop %3769 }
 0x105   :  { %s4435_s6 = spop %3771 }
 0x106   :  { %v378_v55 = vadd.f32 %v377_v53, %v376_v51  ;;  %s4463_s27 = spop %3773 }
 0x107   :  { %s4493_s28 = spop %3775 }
 0x108   :  { %v380_v56 = vadd.f32 %v379_v48, %v378_v55  ;;  %s3778_s29 = spop %3777 }
 0x109   :  { %s3780_s30 = spop %3779 }
 0x10a   :  { %v381_v57 = vrot.slane %v380_v56, 4  ;;  %s3782_s8 = spop %3781 }
 0x10b   :  { %s4556_s9 = spop %3783 }
 0x10c   :  { %v382_v58 = vadd.f32 %v381_v57, %v380_v56  ;;  %s3786_s10 = spop %3785 }
 0x10d   :  { %s3788_s11 = spop %3787 }
 0x10e   :  { %v383_v59 = vrot.slane %v382_v58, 2  ;;  %s3790_s12 = spop %3789 }
 0x10f   :  { %s3792_s13 = spop %3791 }
 0x110   :  { %v384_v61 = vadd.f32 %v383_v59, %v382_v58  ;;  %s3794_s14 = spop %3793 }
 0x112   :  { %v385_v62 = vrot.slane %v384_v61, 1 }
 0x114   :  { %v386_v63 = vadd.f32 %v385_v62, %v384_v61 }
 0x116   :  { %v387_v0 = vmul.f32 0.0078125, %v386_v63 }
 0x118   :  { %v4324_v1 = vsub.f32 %v4184_v21, %v387_v0  ;;  %v4327_v2 = vsub.f32 %v4194_v27, %v387_v0  ;;  %v4330_v3 = vsub.f32 %v4192_v26, %v387_v0  ;;  %v4333_v5 = vsub.f32 %v4204_v32, %v387_v0 }
 0x119   :  { %v4340_v8 = vsub.f32 %v4216_v40, %v387_v0  ;;  %v4345_v27 = vsub.f32 %v4238_v54, %v387_v0  ;;  %v4352_v11 = vsub.f32 %v4234_v52, %v387_v0  ;;  %v4358_v54 = vsub.f32 %v4246_v60, %v387_v0 }
 0x11a   :  { %v404_v6 = vmul.f32 %v4324_v1, %v4324_v1  ;;  %v405_v7 = vmul.f32 %v4327_v2, %v4327_v2  ;;  %v406_v21 = vmul.f32 %v4330_v3, %v4330_v3  ;;  %v407_v26 = vmul.f32 %v4333_v5, %v4333_v5 }
 0x11b   :  { %v408_v40 = vmul.f32 %v4340_v8, %v4340_v8  ;;  %v409_v14 = vmul.f32 %v4345_v27, %v4345_v27  ;;  %v4364_v19 = vsub.f32 %v4258_v4, %v387_v0  ;;  %v410_v52 = vmul.f32 %v4352_v11, %v4352_v11 }
 0x11c   :  { %v420_v32 = vsel %vm349_vm0, %v404_v6, 0.0  ;;  %v421_v9 = vsel %vm349_vm0, %v405_v7, 0.0  ;;  %v423_v12 = vsel %vm349_vm0, %v406_v21, 0.0  ;;  %v425_v15 = vsel %vm349_vm0, %v407_v26, 0.0 }
 0x11d   :  { %v422_v10 = vadd.f32 %v421_v9, %v420_v32  ;;  %v427_v20 = vsel %vm349_vm0, %v408_v40, 0.0  ;;  %v4370_v23 = vsub.f32 %v4278_v18, %v387_v0  ;;  %v411_v60 = vmul.f32 %v4358_v54, %v4358_v54 }
 0x11e   :  { %v429_v25 = vsel %vm349_vm0, %v409_v14, 0.0  ;;  %v4376_v29 = vsub.f32 %v4274_v16, %v387_v0  ;;  %v412_v4 = vmul.f32 %v4364_v19, %v4364_v19  ;;  %v431_v30 = vsel %vm349_vm0, %v410_v52, 0.0 }
 0x11f   :  { %v424_v13 = vadd.f32 %v423_v12, %v422_v10  ;;  %v4382_v33 = vsub.f32 %v4286_v24, %v387_v0  ;;  %v413_v18 = vmul.f32 %v4370_v23, %v4370_v23  ;;  %v433_v35 = vsel %vm349_vm0, %v411_v60, 0.0 }
 0x120   :  { %v4388_v37 = vsub.f32 %v4296_v34, %v387_v0  ;;  %v414_v16 = vmul.f32 %v4376_v29, %v4376_v29  ;;  %v435_v38 = vsel %vm349_vm0, %v412_v4, 0.0  ;;  %v4394_v42 = vsub.f32 %v4306_v39, %v387_v0 }
 0x121   :  { %v426_v17 = vadd.f32 %v425_v15, %v424_v13  ;;  %v415_v24 = vmul.f32 %v4382_v33, %v4382_v33  ;;  %v437_v43 = vsel %vm349_vm0, %v413_v18, 0.0  ;;  %v4400_v46 = vsub.f32 %v4311_v44, %v387_v0 }
 0x122   :  { %v416_v34 = vmul.f32 %v4388_v37, %v4388_v37  ;;  %v439_v47 = vsel %vm349_vm0, %v414_v16, 0.0  ;;  %v4406_v51 = vsub.f32 %v4315_v49, %v387_v0  ;;  %v417_v39 = vmul.f32 %v4394_v42, %v4394_v42 }
 0x123   :  { %v428_v22 = vadd.f32 %v427_v20, %v426_v17  ;;  %v441_v53 = vsel %vm349_vm0, %v415_v24, 0.0  ;;  %v418_v48 = vmul.f32 %v4400_v46, %v4400_v46  ;;  %v4425_v17 = vstv %s3738_s3  ;;  %s3796_s3 = spop %3795 }
 0x124   :  { %v443_v44 = vsel %vm349_vm0, %v416_v34, 0.0  ;;  %v419_v57 = vmul.f32 %v4406_v51, %v4406_v51  ;;  %v445_v58 = vsel %vm349_vm0, %v417_v39, 0.0  ;;  %7600 = vst [vmem:[#allocation6_spill] sm:$0xff] %v4425_v17  ;;  %v4427_v52 = vstv %s3740_s4  ;;  %s3798_s4 = spop %3797 }
 0x125   :  { %v430_v28 = vadd.f32 %v429_v25, %v428_v22  ;;  %v447_v49 = vsel %vm349_vm0, %v418_v48, 0.0  ;;  %7601 = vst [vmem:[#allocation7_spill] sm:$0xff] %v4427_v52  ;;  %v4429_v20 = vstv %s3742_s15  ;;  %v4431_v22 = vstv %s3744_s0  ;;  %s3800_s15 = spop %3799 }
 0x126   :  { %v449_v62 = vsel %vm349_vm0, %v419_v57, 0.0  ;;  %7602 = vst [vmem:[#allocation8_spill] sm:$0xff] %v4429_v20  ;;  %7603 = vst [vmem:[#allocation9_spill] sm:$0xff] %v4431_v22  ;;  %v4433_v60 = vstv %s3746_s16  ;;  %v4441_v4 = vstv %s3750_s18  ;;  %v4491_v24 = vstv %s3760_s22  ;;  %s3802_s0 = spop %3801 }
 0x127   :  { %v432_v31 = vadd.f32 %v431_v30, %v430_v28  ;;  %7604 = vst [vmem:[#allocation10_spill] sm:$0xff] %v4433_v60  ;;  %v4439_v28 = vstv %s3748_s17  ;;  %7606 = vst [vmem:[#allocation12_spill] sm:$0xff] %v4441_v4  ;;  %v4443_v30 = vstv %s3752_s19  ;;  %v4524_v57 = vstv %s4423_s26  ;;  %s3804_s16 = spop %3803 }
 0x128   :  { %7605 = vst [vmem:[#allocation11_spill] sm:$0xff] %v4439_v28  ;;  %7607 = vst [vmem:[#allocation13_spill] sm:$0xff] %v4443_v30  ;;  %s3806_s17 = spop %3805 }
 0x129   :  { %v434_v36 = vadd.f32 %v433_v35, %v432_v31  ;;  %v4445_v31 = vstv %s3754_s20  ;;  %7611 = vst [vmem:[#allocation17_spill] sm:$0xff] %v4491_v24  ;;  %7616 = vst [vmem:[#allocation22_spill] sm:$0xff] %v4524_v57  ;;  %s3808_s18 = spop %3807 }
 0x12a   :  { %7608 = vst [vmem:[#allocation14_spill] sm:$0xff] %v4445_v31  ;;  %s3810_s19 = spop %3809 }
 0x12b   :  { %v436_v41 = vadd.f32 %v435_v38, %v434_v36  ;;  %s3812_s20 = spop %3811 }
 0x12d   :  { %v438_v45 = vadd.f32 %v437_v43, %v436_v41  ;;  %v4486_v41 = vstv %s4419_s21  ;;  %v4499_v43 = vstv %s3766_s24  ;;  %s3814_s21 = spop %3813 }
 0x12e   :  { %7609 = vst [vmem:[#allocation15_spill] sm:$0xff] %v4486_v41  ;;  %7614 = vst [vmem:[#allocation20_spill] sm:$0xff] %v4499_v43 }
 0x12f   :  { %v440_v50 = vadd.f32 %v439_v47, %v438_v45 }
 0x131   :  { %v442_v55 = vadd.f32 %v441_v53, %v440_v50 }
 0x133   :  { %v444_v56 = vadd.f32 %v443_v44, %v442_v55 }
 0x135   :  { %v446_v59 = vadd.f32 %v445_v58, %v444_v56 }
 0x137   :  { %v448_v61 = vadd.f32 %v447_v49, %v446_v59 }
 0x139   :  { %v450_v63 = vadd.f32 %v449_v62, %v448_v61 }
 0x13b   :  { %v451_v0 = vrot.slane %v450_v63, 4 }
 0x13d   :  { %v452_v6 = vadd.f32 %v451_v0, %v450_v63 }
 0x13f   :  { %v453_v7 = vrot.slane %v452_v6, 2 }
 0x141   :  { %v454_v21 = vadd.f32 %v453_v7, %v452_v6 }
 0x143   :  { %v455_v26 = vrot.slane %v454_v21, 1 }
 0x145   :  { %v456_v32 = vadd.f32 %v455_v26, %v454_v21 }
 0x147   :  { %v457_v9 = vmul.f32 0.007874016, %v456_v32  ;;  %v4540_v32 = vstv %s4435_s6 }
 0x148   :  { %7619 = vst [vmem:[#allocation25_spill] sm:$0xff] %v4540_v32 }
 0x149   :  { %3890 = vrsqrt.f32 %v457_v9  ;;  %vm460_vm1 = vcmp.eq.f32.partialorder %v457_v9, inf  ;;  %v463_v12 = vand.u32 2147483648, %v457_v9  ;;  %vm462_vm2 = vcmp.eq.f32.partialorder %v457_v9, 0.0 }
 0x156   :  { %v3891_v10 = vpop.eup %3890 }
 0x157   :  { %v459_v40 = vmul.f32 %v3891_v10, %v457_v9  ;;  %v4546_v10 = vstv %s4493_s28 }
 0x158   :  { %7621 = vst [vmem:[#allocation27_spill] sm:$0xff] %v4546_v10 }
 0x159   :  { %v461_v13 = vsel %vm460_vm1, %v457_v9, %v459_v40  ;;  %v4543_v9 = vstv %s4463_s27  ;;  %v4548_v40 = vstv %s3778_s29 }
 0x15a   :  { %v464_v14 = vsel %vm462_vm2, %v463_v12, %v461_v13  ;;  %7620 = vst [vmem:[#allocation26_spill] sm:$0xff] %v4543_v9  ;;  %7622 = vst [vmem:[#allocation28_spill] sm:$0xff] %v4548_v40  ;;  %v4550_v12 = vstv %s3780_s30 }
 0x15b   :  { %v465_v15 = vadd.f32 1e-06, %v464_v14  ;;  %7623 = vst [vmem:[#allocation29_spill] sm:$0xff] %v4550_v12  ;;  %v4602_v12 = vstv %s3788_s11 }
 0x15c   :  { %7630 = vst [vmem:[#allocation36_spill] sm:$0xff] %v4602_v12 }
 0x15d   :  { %3892 = vrcp.f32 %v465_v15 }
 0x16a   :  { %v4437_v25 = vpop.eup %3892 }
 0x16b   :  { %v4449_v18 = vmul.f32 %v4437_v25, %v4324_v1  ;;  %v4453_v35 = vmul.f32 %v4437_v25, %v4327_v2  ;;  %v4457_v36 = vmul.f32 %v4437_v25, %v4330_v3  ;;  %v4461_v16 = vmul.f32 %v4437_v25, %v4333_v5 }
 0x16c   :  { %v4467_v38 = vmul.f32 %v4437_v25, %v4340_v8  ;;  %v4471_v1 = vmul.f32 %v4437_v25, %v4345_v27  ;;  %v4475_v2 = vmul.f32 %v4437_v25, %v4352_v11  ;;  %v4479_v3 = vmul.f32 %v4437_v25, %v4358_v54 }
 0x16d   :  { %v4483_v5 = vmul.f32 %v4437_v25, %v4364_v19  ;;  %v4489_v8 = vstv %s4421_s2  ;;  %v4495_v27 = vstv %s3762_s23  ;;  %v4497_v11 = vstv %s3764_s1  ;;  %s3816_s2 = spop %3815 }
 0x16e   :  { %7610 = vst [vmem:[#allocation16_spill] sm:$0xff] %v4489_v8  ;;  %7612 = vst [vmem:[#allocation18_spill] sm:$0xff] %v4495_v27  ;;  %v4501_v54 = vstv %s3768_s25  ;;  %v489_v19 = vmul.f32 %v4425_v17, %v4449_v18  ;;  %v490_v45 = vmul.f32 %v4425_v17, %v4453_v35  ;;  %v491_v34 = vmul.f32 %v4425_v17, %v4457_v36  ;;  %s3818_s22 = spop %3817 }
 0x16f   :  { %7613 = vst [vmem:[#allocation19_spill] sm:$0xff] %v4497_v11  ;;  %7615 = vst [vmem:[#allocation21_spill] sm:$0xff] %v4501_v54  ;;  %v492_v47 = vmul.f32 %v4425_v17, %v4461_v16  ;;  %v493_v50 = vmul.f32 %v4425_v17, %v4467_v38  ;;  %v494_v39 = vmul.f32 %v4425_v17, %v4471_v1  ;;  %s3820_s23 = spop %3819 }
 0x170   :  { %v495_v53 = vmul.f32 %v4425_v17, %v4475_v2  ;;  %v496_v55 = vmul.f32 %v4425_v17, %v4479_v3  ;;  %v497_v48 = vmul.f32 %v4425_v17, %v4483_v5  ;;  %v509_v44 = vadd.f32 %v4427_v52, %v489_v19  ;;  %s3822_s1 = spop %3821 }
 0x171   :  { %v510_v56 = vadd.f32 %v4427_v52, %v490_v45  ;;  %v511_v58 = vadd.f32 %v4427_v52, %v491_v34  ;;  %v512_v59 = vadd.f32 %v4427_v52, %v492_v47  ;;  %v513_v49 = vadd.f32 %v4427_v52, %v493_v50  ;;  %s3824_s24 = spop %3823 }
 0x172   :  { %v514_v61 = vadd.f32 %v4427_v52, %v494_v39  ;;  %v4531_v62 = vadd.f32 %v4427_v52, %v495_v53  ;;  %v4534_v63 = vadd.f32 %v4427_v52, %v496_v55  ;;  %v4537_v0 = vadd.f32 %v4427_v52, %v497_v48  ;;  %s3826_s25 = spop %3825 }
 0x173   :  { %v525_v6 = vmax.f32 %v509_v44, 0.0  ;;  %v526_v7 = vmax.f32 %v510_v56, 0.0  ;;  %v527_v21 = vmax.f32 %v511_v58, 0.0  ;;  %v528_v26 = vmax.f32 %v512_v59, 0.0  ;;  %s3828_s26 = spop %3827 }
 0x174   :  { %7617 = vst [vmem:[#allocation23_spill] sm:$0xff] %v4534_v63  ;;  %7618 = vst [vmem:[#allocation24_spill] sm:$0xff] %v4537_v0  ;;  %v529_v13 = vmax.f32 %v513_v49, 0.0  ;;  %v4554_v19 = vstv %s3782_s8  ;;  %v530_v45 = vmax.f32 %v514_v61, 0.0  ;;  %v586_v39 = vmul.f32 %v4429_v20, %v4449_v18  ;;  %s3830_s6 = spop %3829 }
 0x175   :  { %v541_v14 = vsel %vm349_vm0, %v525_v6, 0.0  ;;  %v542_v15 = vsel %vm349_vm0, %v526_v7, 0.0  ;;  %7624 = vst [vmem:[#allocation30_spill] sm:$0xff] %v4554_v19  ;;  %v544_v47 = vsel %vm349_vm0, %v527_v21, 0.0  ;;  %v546_v50 = vsel %vm349_vm0, %v528_v26, 0.0  ;;  %s3832_s27 = spop %3831 }
 0x176   :  { %v543_v34 = vadd.f32 %v542_v15, %v541_v14  ;;  %v587_v53 = vmul.f32 %v4429_v20, %v4453_v35  ;;  %v588_v55 = vmul.f32 %v4429_v20, %v4457_v36  ;;  %v589_v48 = vmul.f32 %v4429_v20, %v4461_v16  ;;  %s3834_s28 = spop %3833 }
 0x177   :  { %v590_v56 = vmul.f32 %v4429_v20, %v4467_v38  ;;  %v591_v58 = vmul.f32 %v4429_v20, %v4471_v1  ;;  %v592_v59 = vmul.f32 %v4429_v20, %v4475_v2  ;;  %v548_v49 = vsel %vm349_vm0, %v529_v13, 0.0  ;;  %s3836_s29 = spop %3835 }
 0x178   :  { %v545_v44 = vadd.f32 %v544_v47, %v543_v34  ;;  %v593_v61 = vmul.f32 %v4429_v20, %v4479_v3  ;;  %v594_v6 = vmul.f32 %v4429_v20, %v4483_v5  ;;  %v606_v7 = vadd.f32 %v4431_v22, %v586_v39  ;;  %s3838_s30 = spop %3837 }
 0x179   :  { %v607_v26 = vadd.f32 %v4431_v22, %v587_v53  ;;  %v608_v14 = vadd.f32 %v4431_v22, %v588_v55  ;;  %v609_v15 = vadd.f32 %v4431_v22, %v589_v48  ;;  %v610_v34 = vadd.f32 %v4431_v22, %v590_v56  ;;  %s3840_s8 = spop %3839 }
 0x17a   :  { %v547_v21 = vadd.f32 %v546_v50, %v545_v44  ;;  %v611_v13 = vadd.f32 %v4431_v22, %v591_v58  ;;  %v4586_v47 = vadd.f32 %v4431_v22, %v592_v59  ;;  %v4589_v52 = vadd.f32 %v4431_v22, %v593_v61 }
 0x17b   :  { %v4592_v50 = vadd.f32 %v4431_v22, %v594_v6  ;;  %v622_v53 = vmax.f32 %v606_v7, 0.0  ;;  %v623_v44 = vmax.f32 %v607_v26, 0.0  ;;  %v550_v55 = vsel %vm349_vm0, %v530_v45, 0.0 }
 0x17c   :  { %7625 = vst [vmem:[#allocation31_spill] sm:$0xff] %v4589_v52  ;;  %v549_v39 = vadd.f32 %v548_v49, %v547_v21  ;;  %v624_v48 = vmax.f32 %v608_v14, 0.0  ;;  %v625_v19 = vmax.f32 %v609_v15, 0.0  ;;  %v4596_v56 = vstv %s4556_s9  ;;  %s3842_s9 = spop %3841 }
 0x17d   :  { %7626 = vst [vmem:[#allocation32_spill] sm:$0xff] %v4592_v50  ;;  %7627 = vst [vmem:[#allocation33_spill] sm:$0xff] %v4596_v56  ;;  %v4600_v59 = vstv %s3786_s10  ;;  %v4604_v61 = vstv %s3790_s12  ;;  %v4608_v49 = vmul.f32 %v4437_v25, %v4370_v23  ;;  %v626_v6 = vmax.f32 %v610_v34, 0.0  ;;  %s3844_s10 = spop %3843 }
 0x17e   :  { %v4598_v58 = vadd.f32 %v550_v55, %v549_v39  ;;  %7629 = vst [vmem:[#allocation35_spill] sm:$0xff] %v4600_v59  ;;  %7631 = vst [vmem:[#allocation37_spill] sm:$0xff] %v4604_v61  ;;  %v638_v7 = vsel %vm349_vm0, %v622_v53, 0.0  ;;  %v639_v45 = vsel %vm349_vm0, %v623_v44, 0.0  ;;  %v627_v21 = vmax.f32 %v611_v13, 0.0  ;;  %s3846_s11 = spop %3845 }
 0x17f   :  { %v640_v26 = vadd.f32 %v639_v45, %v638_v7  ;;  %v641_v14 = vsel %vm349_vm0, %v624_v48, 0.0  ;;  %v643_v15 = vsel %vm349_vm0, %v625_v19, 0.0  ;;  %v682_v39 = vmul.f32 %v4433_v60, %v4449_v18  ;;  %s3848_s12 = spop %3847 }
 0x180   :  { %7628 = vst [vmem:[#allocation34_spill] sm:$0xff] %v4598_v58  ;;  %v683_v55 = vmul.f32 %v4433_v60, %v4453_v35  ;;  %v684_v23 = vmul.f32 %v4433_v60, %v4457_v36  ;;  %v685_v34 = vmul.f32 %v4433_v60, %v4461_v16  ;;  %v686_v13 = vmul.f32 %v4433_v60, %v4467_v38 }
 0x181   :  { %v642_v53 = vadd.f32 %v641_v14, %v640_v26  ;;  %v687_v44 = vmul.f32 %v4433_v60, %v4471_v1  ;;  %v688_v19 = vmul.f32 %v4433_v60, %v4475_v2  ;;  %v645_v48 = vsel %vm349_vm0, %v626_v6, 0.0 }
 0x182   :  { %v689_v7 = vmul.f32 %v4433_v60, %v4479_v3  ;;  %v690_v45 = vmul.f32 %v4433_v60, %v4483_v5  ;;  %v702_v22 = vadd.f32 %v4439_v28, %v682_v39  ;;  %v703_v14 = vadd.f32 %v4439_v28, %v683_v55 }
 0x183   :  { %v644_v26 = vadd.f32 %v643_v15, %v642_v53  ;;  %v704_v58 = vadd.f32 %v4439_v28, %v684_v23  ;;  %v705_v61 = vadd.f32 %v4439_v28, %v685_v34  ;;  %v706_v12 = vadd.f32 %v4439_v28, %v686_v13 }
 0x184   :  { %v707_v59 = vadd.f32 %v4439_v28, %v687_v44  ;;  %v4640_v6 = vadd.f32 %v4439_v28, %v688_v19  ;;  %v4643_v56 = vadd.f32 %v4439_v28, %v689_v7  ;;  %v4646_v39 = vadd.f32 %v4439_v28, %v690_v45 }
 0x185   :  { %v646_v40 = vadd.f32 %v645_v48, %v644_v26  ;;  %v718_v15 = vmax.f32 %v702_v22, 0.0  ;;  %v719_v55 = vmax.f32 %v703_v14, 0.0  ;;  %v4650_v23 = vmul.f32 %v4437_v25, %v4376_v29 }
 0x186   :  { %7632 = vst [vmem:[#allocation38_spill] sm:$0xff] %v4643_v56  ;;  %7633 = vst [vmem:[#allocation39_spill] sm:$0xff] %v4646_v39  ;;  %v647_v34 = vsel %vm349_vm0, %v627_v21, 0.0  ;;  %v720_v53 = vmax.f32 %v704_v58, 0.0  ;;  %v721_v13 = vmax.f32 %v705_v61, 0.0  ;;  %v4655_v44 = vmul.f32 %v4437_v25, %v4382_v33 }
 0x187   :  { %v4659_v19 = vmul.f32 %v4437_v25, %v4388_v37  ;;  %v4663_v22 = vmul.f32 %v4437_v25, %v4394_v42  ;;  %v4665_v48 = vadd.f32 %v647_v34, %v646_v40  ;;  %v4669_v29 = vmul.f32 %v4437_v25, %v4400_v46 }
 0x188   :  { %v722_v58 = vmax.f32 %v706_v12, 0.0  ;;  %v734_v61 = vsel %vm349_vm0, %v718_v15, 0.0  ;;  %v735_v33 = vsel %vm349_vm0, %v719_v55, 0.0  ;;  %v723_v21 = vmax.f32 %v707_v59, 0.0 }
 0x189   :  { %7634 = vst [vmem:[#allocation40_spill] sm:$0xff] %v4663_v22  ;;  %7635 = vst [vmem:[#allocation41_spill] sm:$0xff] %v4665_v48  ;;  %v736_v7 = vadd.f32 %v735_v33, %v734_v61  ;;  %v737_v37 = vsel %vm349_vm0, %v720_v53, 0.0  ;;  %v739_v45 = vsel %vm349_vm0, %v721_v13, 0.0  ;;  %v778_v42 = vmul.f32 %v4441_v4, %v4449_v18 }
 0x18a   :  { %7636 = vst [vmem:[#allocation42_spill] sm:$0xff] %v4669_v29  ;;  %v779_v40 = vmul.f32 %v4441_v4, %v4453_v35  ;;  %v780_v46 = vmul.f32 %v4441_v4, %v4457_v36  ;;  %v781_v12 = vmul.f32 %v4441_v4, %v4461_v16  ;;  %v782_v59 = vmul.f32 %v4441_v4, %v4467_v38 }
 0x18b   :  { %v738_v26 = vadd.f32 %v737_v37, %v736_v7  ;;  %v783_v14 = vmul.f32 %v4441_v4, %v4471_v1  ;;  %v784_v15 = vmul.f32 %v4441_v4, %v4475_v2  ;;  %v741_v55 = vsel %vm349_vm0, %v722_v58, 0.0 }
 0x18c   :  { %v785_v34 = vmul.f32 %v4441_v4, %v4479_v3  ;;  %v786_v53 = vmul.f32 %v4441_v4, %v4483_v5  ;;  %v798_v13 = vadd.f32 %v4443_v30, %v778_v42  ;;  %v799_v33 = vadd.f32 %v4443_v30, %v779_v40 }
 0x18d   :  { %v740_v61 = vadd.f32 %v739_v45, %v738_v26  ;;  %v800_v7 = vadd.f32 %v4443_v30, %v780_v46  ;;  %v801_v37 = vadd.f32 %v4443_v30, %v781_v12  ;;  %v802_v28 = vadd.f32 %v4443_v30, %v782_v59 }
 0x18e   :  { %v803_v48 = vadd.f32 %v4443_v30, %v783_v14  ;;  %v4701_v58 = vadd.f32 %v4443_v30, %v784_v15  ;;  %v4704_v29 = vadd.f32 %v4443_v30, %v785_v34  ;;  %v4707_v42 = vadd.f32 %v4443_v30, %v786_v53 }
 0x18f   :  { %v742_v22 = vadd.f32 %v741_v55, %v740_v61  ;;  %v814_v45 = vmax.f32 %v798_v13, 0.0  ;;  %v815_v40 = vmax.f32 %v799_v33, 0.0  ;;  %v4711_v46 = vmul.f32 %v4437_v25, %v4406_v51 }
 0x190   :  { %7637 = vst [vmem:[#allocation43_spill] sm:$0xff] %v4704_v29  ;;  %7638 = vst [vmem:[#allocation44_spill] sm:$0xff] %v4707_v42  ;;  %v743_v12 = vsel %vm349_vm0, %v723_v21, 0.0  ;;  %v816_v26 = vmax.f32 %v800_v7, 0.0  ;;  %v817_v59 = vmax.f32 %v801_v37, 0.0  ;;  %v4716_v14 = vmul.f32 %v4425_v17, %v4608_v49 }
 0x191   :  { %v531_v15 = vmax.f32 %v4531_v62, 0.0  ;;  %v4720_v34 = vadd.f32 %v743_v12, %v742_v22  ;;  %v818_v13 = vmax.f32 %v802_v28, 0.0  ;;  %v830_v51 = vsel %vm349_vm0, %v814_v45, 0.0 }
 0x192   :  { %7639 = vst [vmem:[#allocation45_spill] sm:$0xff] %v4716_v14  ;;  %v831_v25 = vsel %vm349_vm0, %v815_v40, 0.0  ;;  %v819_v21 = vmax.f32 %v803_v48, 0.0  ;;  %v833_v33 = vsel %vm349_vm0, %v816_v26, 0.0  ;;  %v835_v7 = vsel %vm349_vm0, %v817_v59, 0.0 }
 0x193   :  { %7640 = vst [vmem:[#allocation46_spill] sm:$0xff] %v4720_v34  ;;  %v832_v61 = vadd.f32 %v831_v25, %v830_v51  ;;  %v874_v62 = vmul.f32 %v4445_v31, %v4449_v18  ;;  %v875_v22 = vmul.f32 %v4445_v31, %v4453_v35  ;;  %v876_v37 = vmul.f32 %v4445_v31, %v4457_v36 }
 0x194   :  { %v877_v28 = vmul.f32 %v4445_v31, %v4461_v16  ;;  %v878_v48 = vmul.f32 %v4445_v31, %v4467_v38  ;;  %v879_v40 = vmul.f32 %v4445_v31, %v4471_v1  ;;  %v880_v12 = vmul.f32 %v4445_v31, %v4475_v2 }
 0x195   :  { %v834_v45 = vadd.f32 %v833_v33, %v832_v61  ;;  %v837_v26 = vsel %vm349_vm0, %v818_v13, 0.0  ;;  %v881_v59 = vmul.f32 %v4445_v31, %v4479_v3  ;;  %v882_v51 = vmul.f32 %v4445_v31, %v4483_v5 }
 0x196   :  { %v894_v25 = vadd.f32 %v4486_v41, %v874_v62  ;;  %v895_v33 = vadd.f32 %v4486_v41, %v875_v22  ;;  %v896_v53 = vadd.f32 %v4486_v41, %v876_v37  ;;  %v897_v55 = vadd.f32 %v4486_v41, %v877_v28 }
 0x197   :  { %v836_v61 = vadd.f32 %v835_v7, %v834_v45  ;;  %v898_v30 = vadd.f32 %v4486_v41, %v878_v48  ;;  %v899_v34 = vadd.f32 %v4486_v41, %v879_v40  ;;  %v4753_v13 = vadd.f32 %v4486_v41, %v880_v12 }
 0x198   :  { %v4756_v0 = vadd.f32 %v4486_v41, %v881_v59  ;;  %v4759_v62 = vadd.f32 %v4486_v41, %v882_v51  ;;  %v910_v7 = vmax.f32 %v894_v25, 0.0  ;;  %v911_v22 = vmax.f32 %v895_v33, 0.0 }
 0x199   :  { %v838_v63 = vadd.f32 %v837_v26, %v836_v61  ;;  %v4762_v37 = vsel %vm349_vm0, %v531_v15, 0.0  ;;  %v839_v28 = vsel %vm349_vm0, %v819_v21, 0.0  ;;  %v912_v45 = vmax.f32 %v896_v53, 0.0 }
 0x19a   :  { %7641 = vst [vmem:[#allocation47_spill] sm:$0xff] %v4756_v0  ;;  %7642 = vst [vmem:[#allocation48_spill] sm:$0xff] %v4759_v62  ;;  %v913_v48 = vmax.f32 %v897_v55, 0.0  ;;  %v4767_v40 = vmul.f32 %v4429_v20, %v4608_v49  ;;  %v628_v12 = vmax.f32 %v4586_v47, 0.0  ;;  %v914_v25 = vmax.f32 %v898_v30, 0.0 }
 0x19b   :  { %7643 = vst [vmem:[#allocation49_spill] sm:$0xff] %v4762_v37  ;;  %v4771_v59 = vadd.f32 %v839_v28, %v838_v63  ;;  %v926_v15 = vsel %vm349_vm0, %v910_v7, 0.0  ;;  %v927_v61 = vsel %vm349_vm0, %v911_v22, 0.0  ;;  %v915_v21 = vmax.f32 %v899_v34, 0.0 }
 0x19c   :  { %7644 = vst [vmem:[#allocation50_spill] sm:$0xff] %v4767_v40  ;;  %v928_v53 = vadd.f32 %v927_v61, %v926_v15  ;;  %v929_v55 = vsel %vm349_vm0, %v912_v45, 0.0  ;;  %v931_v33 = vsel %vm349_vm0, %v913_v48, 0.0  ;;  %v970_v47 = vmul.f32 %v4489_v8, %v4449_v18 }
 0x19d   :  { %7645 = vst [vmem:[#allocation51_spill] sm:$0xff] %v4771_v59  ;;  %v971_v63 = vmul.f32 %v4489_v8, %v4453_v35  ;;  %v972_v28 = vmul.f32 %v4489_v8, %v4457_v36  ;;  %v973_v30 = vmul.f32 %v4489_v8, %v4461_v16  ;;  %v974_v34 = vmul.f32 %v4489_v8, %v4467_v38 }
 0x19e   :  { %v930_v7 = vadd.f32 %v929_v55, %v928_v53  ;;  %v975_v22 = vmul.f32 %v4489_v8, %v4471_v1  ;;  %v976_v45 = vmul.f32 %v4489_v8, %v4475_v2  ;;  %v933_v48 = vsel %vm349_vm0, %v914_v25, 0.0 }
 0x19f   :  { %v977_v15 = vmul.f32 %v4489_v8, %v4479_v3  ;;  %v978_v61 = vmul.f32 %v4489_v8, %v4483_v5  ;;  %v990_v51 = vadd.f32 %v4491_v24, %v970_v47  ;;  %v991_v55 = vadd.f32 %v4491_v24, %v971_v63 }
 0x1a0   :  { %v932_v53 = vadd.f32 %v931_v33, %v930_v7  ;;  %v992_v26 = vadd.f32 %v4491_v24, %v972_v28  ;;  %v993_v41 = vadd.f32 %v4491_v24, %v973_v30  ;;  %v994_v59 = vadd.f32 %v4491_v24, %v974_v34 }
 0x1a1   :  { %v995_v50 = vadd.f32 %v4491_v24, %v975_v22  ;;  %v4804_v25 = vadd.f32 %v4491_v24, %v976_v45  ;;  %v4807_v52 = vadd.f32 %v4491_v24, %v977_v15  ;;  %v4810_v47 = vadd.f32 %v4491_v24, %v978_v61 }
 0x1a2   :  { %v934_v40 = vadd.f32 %v933_v48, %v932_v53  ;;  %v1006_v33 = vmax.f32 %v990_v51, 0.0  ;;  %v1007_v63 = vmax.f32 %v991_v55, 0.0  ;;  %v4813_v28 = vsel %vm349_vm0, %v628_v12, 0.0 }
 0x1a3   :  { %7646 = vst [vmem:[#allocation52_spill] sm:$0xff] %v4807_v52  ;;  %7647 = vst [vmem:[#allocation53_spill] sm:$0xff] %v4810_v47  ;;  %v935_v30 = vsel %vm349_vm0, %v915_v21, 0.0  ;;  %v1008_v7 = vmax.f32 %v992_v26, 0.0  ;;  %v1009_v34 = vmax.f32 %v993_v41, 0.0  ;;  %v4818_v22 = vmul.f32 %v4433_v60, %v4608_v49 }
 0x1a4   :  { %7648 = vst [vmem:[#allocation54_spill] sm:$0xff] %v4813_v28  ;;  %v724_v45 = vmax.f32 %v4640_v6, 0.0  ;;  %v4822_v15 = vadd.f32 %v935_v30, %v934_v40  ;;  %v1010_v61 = vmax.f32 %v994_v59, 0.0  ;;  %v1022_v12 = vsel %vm349_vm0, %v1006_v33, 0.0 }
 0x1a5   :  { %7649 = vst [vmem:[#allocation55_spill] sm:$0xff] %v4818_v22  ;;  %v1023_v53 = vsel %vm349_vm0, %v1007_v63, 0.0  ;;  %v1011_v21 = vmax.f32 %v995_v50, 0.0  ;;  %v1025_v41 = vsel %vm349_vm0, %v1008_v7, 0.0  ;;  %v1027_v55 = vsel %vm349_vm0, %v1009_v34, 0.0 }
 0x1a6   :  { %7650 = vst [vmem:[#allocation56_spill] sm:$0xff] %v4822_v15  ;;  %v1024_v26 = vadd.f32 %v1023_v53, %v1022_v12  ;;  %v1066_v6 = vmul.f32 %v4495_v27, %v4449_v18  ;;  %v1067_v40 = vmul.f32 %v4495_v27, %v4453_v35  ;;  %v1068_v30 = vmul.f32 %v4495_v27, %v4457_v36 }
 0x1a7   :  { %v1069_v59 = vmul.f32 %v4495_v27, %v4461_v16  ;;  %v1070_v50 = vmul.f32 %v4495_v27, %v4467_v38  ;;  %v1071_v63 = vmul.f32 %v4495_v27, %v4471_v1  ;;  %v1072_v7 = vmul.f32 %v4495_v27, %v4475_v2 }
 0x1a8   :  { %v1026_v33 = vadd.f32 %v1025_v41, %v1024_v26  ;;  %v1029_v34 = vsel %vm349_vm0, %v1010_v61, 0.0  ;;  %v1073_v12 = vmul.f32 %v4495_v27, %v4479_v3  ;;  %v1074_v53 = vmul.f32 %v4495_v27, %v4483_v5 }
 0x1a9   :  { %v1086_v51 = vadd.f32 %v4497_v11, %v1066_v6  ;;  %v1087_v41 = vadd.f32 %v4497_v11, %v1067_v40  ;;  %v1088_v48 = vadd.f32 %v4497_v11, %v1068_v30  ;;  %v1089_v24 = vadd.f32 %v4497_v11, %v1069_v59 }
 0x1aa   :  { %v1028_v26 = vadd.f32 %v1027_v55, %v1026_v33  ;;  %v1090_v15 = vadd.f32 %v4497_v11, %v1070_v50  ;;  %v1091_v39 = vadd.f32 %v4497_v11, %v1071_v63  ;;  %v4855_v61 = vadd.f32 %v4497_v11, %v1072_v7 }
 0x1ab   :  { %v4858_v56 = vadd.f32 %v4497_v11, %v1073_v12  ;;  %v4861_v6 = vadd.f32 %v4497_v11, %v1074_v53  ;;  %v1102_v55 = vmax.f32 %v1086_v51, 0.0  ;;  %v1103_v40 = vmax.f32 %v1087_v41, 0.0 }
 0x1ac   :  { %v1030_v22 = vadd.f32 %v1029_v34, %v1028_v26  ;;  %v4864_v30 = vsel %vm349_vm0, %v724_v45, 0.0  ;;  %v1031_v59 = vsel %vm349_vm0, %v1011_v21, 0.0  ;;  %v1104_v33 = vmax.f32 %v1088_v48, 0.0 }
 0x1ad   :  { %7651 = vst [vmem:[#allocation57_spill] sm:$0xff] %v4858_v56  ;;  %7652 = vst [vmem:[#allocation58_spill] sm:$0xff] %v4861_v6  ;;  %v1105_v50 = vmax.f32 %v1089_v24, 0.0  ;;  %v4869_v63 = vmul.f32 %v4441_v4, %v4608_v49  ;;  %v820_v7 = vmax.f32 %v4701_v58, 0.0  ;;  %v1106_v53 = vmax.f32 %v1090_v15, 0.0 }
 0x1ae   :  { %7653 = vst [vmem:[#allocation59_spill] sm:$0xff] %v4864_v30  ;;  %v4873_v12 = vadd.f32 %v1031_v59, %v1030_v22  ;;  %v1118_v45 = vsel %vm349_vm0, %v1102_v55, 0.0  ;;  %v1119_v26 = vsel %vm349_vm0, %v1103_v40, 0.0  ;;  %v1107_v21 = vmax.f32 %v1091_v39, 0.0 }
 0x1af   :  { %7654 = vst [vmem:[#allocation60_spill] sm:$0xff] %v4869_v63  ;;  %v1120_v48 = vadd.f32 %v1119_v26, %v1118_v45  ;;  %v1121_v24 = vsel %vm349_vm0, %v1104_v33, 0.0  ;;  %v1123_v41 = vsel %vm349_vm0, %v1105_v50, 0.0  ;;  %v1162_v58 = vmul.f32 %v4499_v43, %v4449_v18 }
 0x1b0   :  { %7655 = vst [vmem:[#allocation61_spill] sm:$0xff] %v4873_v12  ;;  %v1163_v22 = vmul.f32 %v4499_v43, %v4453_v35  ;;  %v1164_v59 = vmul.f32 %v4499_v43, %v4457_v36  ;;  %v1165_v15 = vmul.f32 %v4499_v43, %v4461_v16  ;;  %v1166_v39 = vmul.f32 %v4499_v43, %v4467_v38 }
 0x1b1   :  { %v1122_v55 = vadd.f32 %v1121_v24, %v1120_v48  ;;  %v1167_v40 = vmul.f32 %v4499_v43, %v4471_v1  ;;  %v1168_v33 = vmul.f32 %v4499_v43, %v4475_v2  ;;  %v1125_v50 = vsel %vm349_vm0, %v1106_v53, 0.0 }
 0x1b2   :  { %v1169_v45 = vmul.f32 %v4499_v43, %v4479_v3  ;;  %v1170_v26 = vmul.f32 %v4499_v43, %v4483_v5  ;;  %v1182_v51 = vadd.f32 %v4501_v54, %v1162_v58  ;;  %v1183_v24 = vadd.f32 %v4501_v54, %v1163_v22 }
 0x1b3   :  { %v1124_v48 = vadd.f32 %v1123_v41, %v1122_v55  ;;  %v1184_v34 = vadd.f32 %v4501_v54, %v1164_v59  ;;  %v1185_v11 = vadd.f32 %v4501_v54, %v1165_v15  ;;  %v1186_v12 = vadd.f32 %v4501_v54, %v1166_v39 }
 0x1b4   :  { %v1187_v42 = vadd.f32 %v4501_v54, %v1167_v40  ;;  %v4906_v53 = vadd.f32 %v4501_v54, %v1168_v33  ;;  %v4909_v29 = vadd.f32 %v4501_v54, %v1169_v45  ;;  %v4912_v58 = vadd.f32 %v4501_v54, %v1170_v26 }
 0x1b5   :  { %v1126_v63 = vadd.f32 %v1125_v50, %v1124_v48  ;;  %v1198_v41 = vmax.f32 %v1182_v51, 0.0  ;;  %v1199_v22 = vmax.f32 %v1183_v24, 0.0  ;;  %v4915_v59 = vsel %vm349_vm0, %v820_v7, 0.0 }
 0x1b6   :  { %7656 = vst [vmem:[#allocation62_spill] sm:$0xff] %v4909_v29  ;;  %7657 = vst [vmem:[#allocation63_spill] sm:$0xff] %v4912_v58  ;;  %v1127_v15 = vsel %vm349_vm0, %v1107_v21, 0.0  ;;  %v1200_v55 = vmax.f32 %v1184_v34, 0.0  ;;  %v1201_v39 = vmax.f32 %v1185_v11, 0.0  ;;  %v4920_v40 = vmul.f32 %v4445_v31, %v4608_v49 }
 0x1b7   :  { %7658 = vst [vmem:[#allocation64_spill] sm:$0xff] %v4915_v59  ;;  %v916_v33 = vmax.f32 %v4753_v13, 0.0  ;;  %v4924_v45 = vadd.f32 %v1127_v15, %v1126_v63  ;;  %v1202_v26 = vmax.f32 %v1186_v12, 0.0  ;;  %v1214_v7 = vsel %vm349_vm0, %v1198_v41, 0.0 }
 0x1b8   :  { %7659 = vst [vmem:[#allocation65_spill] sm:$0xff] %v4920_v40  ;;  %v1215_v48 = vsel %vm349_vm0, %v1199_v22, 0.0  ;;  %v1203_v21 = vmax.f32 %v1187_v42, 0.0  ;;  %v1217_v11 = vsel %vm349_vm0, %v1200_v55, 0.0  ;;  %v1219_v24 = vsel %vm349_vm0, %v1201_v39, 0.0 }
 0x1b9   :  { %7660 = vst [vmem:[#allocation66_spill] sm:$0xff] %v4924_v45  ;;  %v1216_v34 = vadd.f32 %v1215_v48, %v1214_v7  ;;  %v1258_v13 = vmul.f32 %v4524_v57, %v4449_v18  ;;  %v1259_v63 = vmul.f32 %v4524_v57, %v4453_v35  ;;  %v1260_v15 = vmul.f32 %v4524_v57, %v4457_v36 }
 0x1ba   :  { %v1261_v12 = vmul.f32 %v4524_v57, %v4461_v16  ;;  %v1262_v42 = vmul.f32 %v4524_v57, %v4467_v38  ;;  %v1263_v22 = vmul.f32 %v4524_v57, %v4471_v1  ;;  %v1264_v55 = vmul.f32 %v4524_v57, %v4475_v2 }
 0x1bb   :  { %v1218_v41 = vadd.f32 %v1217_v11, %v1216_v34  ;;  %v1221_v39 = vsel %vm349_vm0, %v1202_v26, 0.0  ;;  %v1265_v7 = vmul.f32 %v4524_v57, %v4479_v3  ;;  %v1266_v48 = vmul.f32 %v4524_v57, %v4483_v5 }
 0x1bc   :  { %v1278_v51 = vadd.f32 %v4540_v32, %v1258_v13  ;;  %v1279_v11 = vadd.f32 %v4540_v32, %v1259_v63  ;;  %v1280_v50 = vadd.f32 %v4540_v32, %v1260_v15  ;;  %v1281_v54 = vadd.f32 %v4540_v32, %v1261_v12 }
 0x1bd   :  { %v1220_v34 = vadd.f32 %v1219_v24, %v1218_v41  ;;  %v1282_v45 = vadd.f32 %v4540_v32, %v1262_v42  ;;  %v1283_v62 = vadd.f32 %v4540_v32, %v1263_v22  ;;  %v4957_v26 = vadd.f32 %v4540_v32, %v1264_v55 }
 0x1be   :  { %v4960_v0 = vadd.f32 %v4540_v32, %v1265_v7  ;;  %v4963_v13 = vadd.f32 %v4540_v32, %v1266_v48  ;;  %v1294_v24 = vmax.f32 %v1278_v51, 0.0  ;;  %v1295_v63 = vmax.f32 %v1279_v11, 0.0 }
 0x1bf   :  { %v1222_v40 = vadd.f32 %v1221_v39, %v1220_v34  ;;  %v4966_v15 = vsel %vm349_vm0, %v916_v33, 0.0  ;;  %v1223_v12 = vsel %vm349_vm0, %v1203_v21, 0.0  ;;  %v1296_v41 = vmax.f32 %v1280_v50, 0.0 }
 0x1c0   :  { %7661 = vst [vmem:[#allocation67_spill] sm:$0xff] %v4960_v0  ;;  %7662 = vst [vmem:[#allocation68_spill] sm:$0xff] %v4963_v13  ;;  %v1297_v42 = vmax.f32 %v1281_v54, 0.0  ;;  %v4971_v22 = vmul.f32 %v4489_v8, %v4608_v49  ;;  %v1012_v55 = vmax.f32 %v4804_v25, 0.0  ;;  %v1298_v48 = vmax.f32 %v1282_v45, 0.0 }
 0x1c1   :  { %7663 = vst [vmem:[#allocation69_spill] sm:$0xff] %v4966_v15  ;;  %v4975_v7 = vadd.f32 %v1223_v12, %v1222_v40  ;;  %v1310_v33 = vsel %vm349_vm0, %v1294_v24, 0.0  ;;  %v1311_v34 = vsel %vm349_vm0, %v1295_v63, 0.0  ;;  %v1299_v21 = vmax.f32 %v1283_v62, 0.0 }
 0x1c2   :  { %7664 = vst [vmem:[#allocation70_spill] sm:$0xff] %v4971_v22  ;;  %v1312_v50 = vadd.f32 %v1311_v34, %v1310_v33  ;;  %v1313_v54 = vsel %vm349_vm0, %v1296_v41, 0.0  ;;  %v1315_v11 = vsel %vm349_vm0, %v1297_v42, 0.0  ;;  %v1354_v25 = vmul.f32 %v4543_v9, %v4449_v18 }
 0x1c3   :  { %7665 = vst [vmem:[#allocation71_spill] sm:$0xff] %v4975_v7  ;;  %v1355_v40 = vmul.f32 %v4543_v9, %v4453_v35  ;;  %v1356_v12 = vmul.f32 %v4543_v9, %v4457_v36  ;;  %v1357_v45 = vmul.f32 %v4543_v9, %v4461_v16  ;;  %v1358_v62 = vmul.f32 %v4543_v9, %v4467_v38 }
 0x1c4   :  { %v1314_v24 = vadd.f32 %v1313_v54, %v1312_v50  ;;  %v1359_v63 = vmul.f32 %v4543_v9, %v4471_v1  ;;  %v1360_v41 = vmul.f32 %v4543_v9, %v4475_v2  ;;  %v1317_v42 = vsel %vm349_vm0, %v1298_v48, 0.0 }
 0x1c5   :  { %v1361_v33 = vmul.f32 %v4543_v9, %v4479_v3  ;;  %v1362_v34 = vmul.f32 %v4543_v9, %v4483_v5  ;;  %v1374_v51 = vadd.f32 %v4546_v10, %v1354_v25  ;;  %v1375_v54 = vadd.f32 %v4546_v10, %v1355_v40 }
 0x1c6   :  { %v1316_v50 = vadd.f32 %v1315_v11, %v1314_v24  ;;  %v1376_v39 = vadd.f32 %v4546_v10, %v1356_v12  ;;  %v1377_v32 = vadd.f32 %v4546_v10, %v1357_v45  ;;  %v1378_v7 = vadd.f32 %v4546_v10, %v1358_v62 }
 0x1c7   :  { %v1379_v47 = vadd.f32 %v4546_v10, %v1359_v63  ;;  %v5008_v48 = vadd.f32 %v4546_v10, %v1360_v41  ;;  %v5011_v52 = vadd.f32 %v4546_v10, %v1361_v33  ;;  %v5014_v25 = vadd.f32 %v4546_v10, %v1362_v34  ;;  %v7671_v10 = vld [vmem:[#allocation28_spill] sm:$0xff] }
 0x1c8   :  { %v1318_v22 = vadd.f32 %v1317_v42, %v1316_v50  ;;  %v1390_v11 = vmax.f32 %v1374_v51, 0.0  ;;  %v1391_v40 = vmax.f32 %v1375_v54, 0.0  ;;  %v5017_v12 = vsel %vm349_vm0, %v1012_v55, 0.0  ;;  %v7672_v51 = vld [vmem:[#allocation29_spill] sm:$0xff] }
 0x1c9   :  { %7666 = vst [vmem:[#allocation72_spill] sm:$0xff] %v5011_v52  ;;  %7667 = vst [vmem:[#allocation73_spill] sm:$0xff] %v5014_v25  ;;  %v1319_v45 = vsel %vm349_vm0, %v1299_v21, 0.0  ;;  %v1392_v24 = vmax.f32 %v1376_v39, 0.0  ;;  %v1393_v62 = vmax.f32 %v1377_v32, 0.0  ;;  %v5022_v63 = vmul.f32 %v4495_v27, %v4608_v49 }
 0x1ca   :  { %7668 = vst [vmem:[#allocation74_spill] sm:$0xff] %v5017_v12  ;;  %v1108_v41 = vmax.f32 %v4855_v61, 0.0  ;;  %v5026_v33 = vadd.f32 %v1319_v45, %v1318_v22  ;;  %v1394_v34 = vmax.f32 %v1378_v7, 0.0  ;;  %v1406_v55 = vsel %vm349_vm0, %v1390_v11, 0.0 }
 0x1cb   :  { %7669 = vst [vmem:[#allocation75_spill] sm:$0xff] %v5022_v63  ;;  %v1407_v50 = vsel %vm349_vm0, %v1391_v40, 0.0  ;;  %v1395_v21 = vmax.f32 %v1379_v47, 0.0  ;;  %v1409_v32 = vsel %vm349_vm0, %v1392_v24, 0.0  ;;  %v1411_v54 = vsel %vm349_vm0, %v1393_v62, 0.0 }
 0x1cc   :  { %7670 = vst [vmem:[#allocation76_spill] sm:$0xff] %v5026_v33  ;;  %v1408_v39 = vadd.f32 %v1407_v50, %v1406_v55  ;;  %v1450_v61 = vmul.f32 %v7671_v10, %v4449_v18  ;;  %v1451_v22 = vmul.f32 %v7671_v10, %v4453_v35  ;;  %v1452_v45 = vmul.f32 %v7671_v10, %v4457_v36 }
 0x1cd   :  { %v1453_v7 = vmul.f32 %v7671_v10, %v4461_v16  ;;  %v1454_v47 = vmul.f32 %v7671_v10, %v4467_v38  ;;  %v1455_v40 = vmul.f32 %v7671_v10, %v4471_v1  ;;  %v1456_v24 = vmul.f32 %v7671_v10, %v4475_v2 }
 0x1ce   :  { %v1410_v11 = vadd.f32 %v1409_v32, %v1408_v39  ;;  %v1413_v62 = vsel %vm349_vm0, %v1394_v34, 0.0  ;;  %v1457_v55 = vmul.f32 %v7671_v10, %v4479_v3  ;;  %v1458_v50 = vmul.f32 %v7671_v10, %v4483_v5 }
 0x1cf   :  { %v1470_v42 = vadd.f32 %v7672_v51, %v1450_v61  ;;  %v1471_v32 = vadd.f32 %v7672_v51, %v1451_v22  ;;  %v1472_v33 = vadd.f32 %v7672_v51, %v1452_v45  ;;  %v1473_v6 = vadd.f32 %v7672_v51, %v1453_v7 }
 0x1d0   :  { %v1412_v39 = vadd.f32 %v1411_v54, %v1410_v11  ;;  %v1474_v56 = vadd.f32 %v7672_v51, %v1454_v47  ;;  %v1475_v63 = vadd.f32 %v7672_v51, %v1455_v40  ;;  %v5059_v34 = vadd.f32 %v7672_v51, %v1456_v24 }
 0x1d1   :  { %v5062_v27 = vadd.f32 %v7672_v51, %v1457_v55  ;;  %v5065_v61 = vadd.f32 %v7672_v51, %v1458_v50  ;;  %v1486_v54 = vmax.f32 %v1470_v42, 0.0  ;;  %v1487_v22 = vmax.f32 %v1471_v32, 0.0  ;;  %v7678_v51 = vld [vmem:[#allocation30_spill] sm:$0xff]  ;;  %v7679_v42 = vld [vmem:[#allocation33_spill] sm:$0xff] }
 0x1d2   :  { %v1414_v12 = vadd.f32 %v1413_v62, %v1412_v39  ;;  %v5068_v45 = vsel %vm349_vm0, %v1108_v41, 0.0  ;;  %v1415_v7 = vsel %vm349_vm0, %v1395_v21, 0.0  ;;  %v1488_v11 = vmax.f32 %v1472_v33, 0.0 }
 0x1d3   :  { %7673 = vst [vmem:[#allocation77_spill] sm:$0xff] %v5062_v27  ;;  %7674 = vst [vmem:[#allocation78_spill] sm:$0xff] %v5065_v61  ;;  %v1489_v47 = vmax.f32 %v1473_v6, 0.0  ;;  %v5073_v40 = vmul.f32 %v4499_v43, %v4608_v49  ;;  %v1204_v24 = vmax.f32 %v4906_v53, 0.0  ;;  %v1490_v50 = vmax.f32 %v1474_v56, 0.0 }
 0x1d4   :  { %7675 = vst [vmem:[#allocation79_spill] sm:$0xff] %v5068_v45  ;;  %v5077_v55 = vadd.f32 %v1415_v7, %v1414_v12  ;;  %v1502_v41 = vsel %vm349_vm0, %v1486_v54, 0.0  ;;  %v1503_v39 = vsel %vm349_vm0, %v1487_v22, 0.0  ;;  %v1491_v21 = vmax.f32 %v1475_v63, 0.0 }
 0x1d5   :  { %7676 = vst [vmem:[#allocation80_spill] sm:$0xff] %v5073_v40  ;;  %v1504_v33 = vadd.f32 %v1503_v39, %v1502_v41  ;;  %v1505_v6 = vsel %vm349_vm0, %v1488_v11, 0.0  ;;  %v1507_v32 = vsel %vm349_vm0, %v1489_v47, 0.0  ;;  %v1546_v53 = vmul.f32 %v7678_v51, %v4449_v18 }
 0x1d6   :  { %7677 = vst [vmem:[#allocation81_spill] sm:$0xff] %v5077_v55  ;;  %v1547_v12 = vmul.f32 %v7678_v51, %v4453_v35  ;;  %v1548_v7 = vmul.f32 %v7678_v51, %v4457_v36  ;;  %v1549_v56 = vmul.f32 %v7678_v51, %v4461_v16  ;;  %v1550_v63 = vmul.f32 %v7678_v51, %v4467_v38 }
 0x1d7   :  { %v1506_v54 = vadd.f32 %v1505_v6, %v1504_v33  ;;  %v1551_v22 = vmul.f32 %v7678_v51, %v4471_v1  ;;  %v1552_v11 = vmul.f32 %v7678_v51, %v4475_v2  ;;  %v1509_v47 = vsel %vm349_vm0, %v1490_v50, 0.0 }
 0x1d8   :  { %v1553_v41 = vmul.f32 %v7678_v51, %v4479_v3  ;;  %v1554_v39 = vmul.f32 %v7678_v51, %v4483_v5  ;;  %v1566_v62 = vadd.f32 %v7679_v42, %v1546_v53  ;;  %v1567_v6 = vadd.f32 %v7679_v42, %v1547_v12 }
 0x1d9   :  { %v1508_v33 = vadd.f32 %v1507_v32, %v1506_v54  ;;  %v1568_v55 = vadd.f32 %v7679_v42, %v1548_v7  ;;  %v1569_v58 = vadd.f32 %v7679_v42, %v1549_v56  ;;  %v1570_v29 = vadd.f32 %v7679_v42, %v1550_v63 }
 0x1da   :  { %v1571_v40 = vadd.f32 %v7679_v42, %v1551_v22  ;;  %v5110_v50 = vadd.f32 %v7679_v42, %v1552_v11  ;;  %v5113_v43 = vadd.f32 %v7679_v42, %v1553_v41  ;;  %v5116_v53 = vadd.f32 %v7679_v42, %v1554_v39  ;;  %v7685_v42 = vld [vmem:[#allocation35_spill] sm:$0xff] }
 0x1db   :  { %v1510_v45 = vadd.f32 %v1509_v47, %v1508_v33  ;;  %v1582_v32 = vmax.f32 %v1566_v62, 0.0  ;;  %v1583_v12 = vmax.f32 %v1567_v6, 0.0  ;;  %v5119_v7 = vsel %vm349_vm0, %v1204_v24, 0.0 }
 0x1dc   :  { %7680 = vst [vmem:[#allocation82_spill] sm:$0xff] %v5113_v43  ;;  %7681 = vst [vmem:[#allocation83_spill] sm:$0xff] %v5116_v53  ;;  %v1511_v56 = vsel %vm349_vm0, %v1491_v21, 0.0  ;;  %v1584_v54 = vmax.f32 %v1568_v55, 0.0  ;;  %v1585_v63 = vmax.f32 %v1569_v58, 0.0  ;;  %v5124_v22 = vmul.f32 %v4524_v57, %v4608_v49 }
 0x1dd   :  { %7682 = vst [vmem:[#allocation84_spill] sm:$0xff] %v5119_v7  ;;  %v1300_v11 = vmax.f32 %v4957_v26, 0.0  ;;  %v5128_v41 = vadd.f32 %v1511_v56, %v1510_v45  ;;  %v1396_v62 = vmax.f32 %v5008_v48, 0.0  ;;  %v1586_v39 = vmax.f32 %v1570_v29, 0.0 }
 0x1de   :  { %7683 = vst [vmem:[#allocation85_spill] sm:$0xff] %v5124_v22  ;;  %v1598_v24 = vsel %vm349_vm0, %v1582_v32, 0.0  ;;  %v1599_v33 = vsel %vm349_vm0, %v1583_v12, 0.0  ;;  %v1587_v21 = vmax.f32 %v1571_v40, 0.0  ;;  %v1601_v58 = vsel %vm349_vm0, %v1584_v54, 0.0 }
 0x1df   :  { %7684 = vst [vmem:[#allocation86_spill] sm:$0xff] %v5128_v41  ;;  %v1600_v55 = vadd.f32 %v1599_v33, %v1598_v24  ;;  %v1603_v6 = vsel %vm349_vm0, %v1585_v63, 0.0  ;;  %v1642_v26 = vmul.f32 %v7685_v42, %v4449_v18  ;;  %v1643_v45 = vmul.f32 %v7685_v42, %v4453_v35  ;;  %v7686_v33 = vld [vmem:[#allocation36_spill] sm:$0xff] }
 0x1e0   :  { %v1644_v48 = vmul.f32 %v7685_v42, %v4457_v36  ;;  %v1645_v29 = vmul.f32 %v7685_v42, %v4461_v16  ;;  %v1646_v40 = vmul.f32 %v7685_v42, %v4467_v38  ;;  %v1647_v12 = vmul.f32 %v7685_v42, %v4471_v1 }
 0x1e1   :  { %v1602_v32 = vadd.f32 %v1601_v58, %v1600_v55  ;;  %v1648_v56 = vmul.f32 %v7685_v42, %v4475_v2  ;;  %v1605_v54 = vsel %vm349_vm0, %v1586_v39, 0.0  ;;  %v1649_v63 = vmul.f32 %v7685_v42, %v4479_v3 }
 0x1e2   :  { %v1650_v24 = vmul.f32 %v7685_v42, %v4483_v5  ;;  %v1662_v47 = vadd.f32 %v7686_v33, %v1642_v26  ;;  %v1663_v58 = vadd.f32 %v7686_v33, %v1643_v45  ;;  %v1664_v41 = vadd.f32 %v7686_v33, %v1644_v48 }
 0x1e3   :  { %v1604_v55 = vadd.f32 %v1603_v6, %v1602_v32  ;;  %v1665_v0 = vadd.f32 %v7686_v33, %v1645_v29  ;;  %v1666_v22 = vadd.f32 %v7686_v33, %v1646_v40  ;;  %v1667_v57 = vadd.f32 %v7686_v33, %v1647_v12 }
 0x1e4   :  { %v5161_v39 = vadd.f32 %v7686_v33, %v1648_v56  ;;  %v5164_v7 = vadd.f32 %v7686_v33, %v1649_v63  ;;  %v5167_v26 = vadd.f32 %v7686_v33, %v1650_v24  ;;  %v1678_v6 = vmax.f32 %v1662_v47, 0.0 }
 0x1e5   :  { %v1606_v8 = vadd.f32 %v1605_v54, %v1604_v55  ;;  %v1679_v45 = vmax.f32 %v1663_v58, 0.0  ;;  %v5171_v29 = vsel %vm349_vm0, %v1300_v11, 0.0  ;;  %v1607_v32 = vsel %vm349_vm0, %v1587_v21, 0.0 }
 0x1e6   :  { %7687 = vst [vmem:[#allocation87_spill] sm:$0xff] %v5164_v7  ;;  %7688 = vst [vmem:[#allocation88_spill] sm:$0xff] %v5167_v26  ;;  %v1680_v40 = vmax.f32 %v1664_v41, 0.0  ;;  %v5176_v12 = vmul.f32 %v4543_v9, %v4608_v49  ;;  %v5183_v47 = vsel %vm349_vm0, %v1396_v62, 0.0  ;;  %v1681_v24 = vmax.f32 %v1665_v0, 0.0 }
 0x1e7   :  { %7689 = vst [vmem:[#allocation89_spill] sm:$0xff] %v5171_v29  ;;  %v5180_v63 = vadd.f32 %v1607_v32, %v1606_v8  ;;  %7692 = vst [vmem:[#allocation92_spill] sm:$0xff] %v5183_v47  ;;  %v1694_v11 = vsel %vm349_vm0, %v1678_v6, 0.0  ;;  %v1695_v55 = vsel %vm349_vm0, %v1679_v45, 0.0  ;;  %v5189_v41 = vmul.f32 %v7671_v10, %v4608_v49  ;;  %v7694_v32 = vld [vmem:[#allocation37_spill] sm:$0xff] }
 0x1e8   :  { %7690 = vst [vmem:[#allocation90_spill] sm:$0xff] %v5176_v12  ;;  %v1492_v21 = vmax.f32 %v5059_v34, 0.0  ;;  %v1682_v58 = vmax.f32 %v1666_v22, 0.0  ;;  %v1696_v56 = vadd.f32 %v1695_v55, %v1694_v11  ;;  %v1697_v8 = vsel %vm349_vm0, %v1680_v40, 0.0 }
 0x1e9   :  { %7691 = vst [vmem:[#allocation91_spill] sm:$0xff] %v5180_v63  ;;  %7693 = vst [vmem:[#allocation93_spill] sm:$0xff] %v5189_v41  ;;  %v1738_v62 = vmul.f32 %v7694_v32, %v4449_v18  ;;  %v1739_v0 = vmul.f32 %v7694_v32, %v4453_v35  ;;  %v1740_v6 = vmul.f32 %v7694_v32, %v4457_v36  ;;  %v1588_v34 = vmax.f32 %v5110_v50, 0.0 }
 0x1ea   :  { %v1698_v22 = vadd.f32 %v1697_v8, %v1696_v56  ;;  %v1683_v11 = vmax.f32 %v1667_v57, 0.0  ;;  %v1699_v55 = vsel %vm349_vm0, %v1681_v24, 0.0  ;;  %v1741_v40 = vmul.f32 %v7694_v32, %v4461_v16 }
 0x1eb   :  { %v5205_v48 = vstv %s3792_s13  ;;  %v5211_v54 = vsel %vm349_vm0, %v1492_v21, 0.0  ;;  %v5215_v57 = vmul.f32 %v7678_v51, %v4608_v49  ;;  %v1701_v56 = vsel %vm349_vm0, %v1682_v58, 0.0  ;;  %s3850_s13 = spop %3849 }
 0x1ec   :  { %7695 = vst [vmem:[#allocation94_spill] sm:$0xff] %v5205_v48  ;;  %v1700_v33 = vadd.f32 %v1699_v55, %v1698_v22  ;;  %v1758_v63 = vadd.f32 %v5205_v48, %v1738_v62  ;;  %v1759_v41 = vadd.f32 %v5205_v48, %v1739_v0  ;;  %v1760_v45 = vadd.f32 %v5205_v48, %v1740_v6 }
 0x1ed   :  { %7696 = vst [vmem:[#allocation95_spill] sm:$0xff] %v5211_v54  ;;  %7697 = vst [vmem:[#allocation96_spill] sm:$0xff] %v5215_v57  ;;  %v1742_v62 = vmul.f32 %v7694_v32, %v4467_v38  ;;  %v1703_v6 = vsel %vm349_vm0, %v1683_v11, 0.0  ;;  %v1761_v21 = vadd.f32 %v5205_v48, %v1741_v40  ;;  %v5225_v51 = vsel %vm349_vm0, %v1588_v34, 0.0 }
 0x1ee   :  { %v1702_v8 = vadd.f32 %v1701_v56, %v1700_v33  ;;  %v1774_v0 = vmax.f32 %v1758_v63, 0.0  ;;  %v1775_v22 = vmax.f32 %v1759_v41, 0.0  ;;  %v1776_v55 = vmax.f32 %v1760_v45, 0.0  ;;  %7698 = vst [vmem:[#allocation97_spill] sm:$0xff] %v5225_v51 }
 0x1ef   :  { %v5229_v50 = vmul.f32 %v7685_v42, %v4608_v49  ;;  %v1684_v58 = vmax.f32 %v5161_v39, 0.0  ;;  %v1743_v63 = vmul.f32 %v7694_v32, %v4471_v1  ;;  %v1744_v11 = vmul.f32 %v7694_v32, %v4475_v2 }
 0x1f0   :  { %v5232_v33 = vadd.f32 %v1703_v6, %v1702_v8  ;;  %v1790_v41 = vsel %vm349_vm0, %v1774_v0, 0.0  ;;  %v1791_v45 = vsel %vm349_vm0, %v1775_v22, 0.0  ;;  %v1745_v40 = vmul.f32 %v7694_v32, %v4479_v3 }
 0x1f1   :  { %7699 = vst [vmem:[#allocation98_spill] sm:$0xff] %v5229_v50  ;;  %v1762_v39 = vadd.f32 %v5205_v48, %v1742_v62  ;;  %v1792_v56 = vadd.f32 %v1791_v45, %v1790_v41  ;;  %v1746_v8 = vmul.f32 %v7694_v32, %v4483_v5  ;;  %v1777_v6 = vmax.f32 %v1761_v21, 0.0 }
 0x1f2   :  { %7700 = vst [vmem:[#allocation99_spill] sm:$0xff] %v5232_v33  ;;  %v1793_v24 = vsel %vm349_vm0, %v1776_v55, 0.0  ;;  %v5247_v33 = vstv %s3794_s14  ;;  %v5257_v45 = vsel %vm349_vm0, %v1684_v58, 0.0  ;;  %v1763_v21 = vadd.f32 %v5205_v48, %v1743_v63  ;;  %s3852_s14 = spop %3851 }
 0x1f3   :  { %7701 = vst [vmem:[#allocation100_spill] sm:$0xff] %v5247_v33  ;;  %v1794_v0 = vadd.f32 %v1793_v24, %v1792_v56  ;;  %v1834_v22 = vmul.f32 %v5247_v33, %v4449_v18  ;;  %v1835_v34 = vmul.f32 %v5247_v33, %v4453_v35  ;;  %v1836_v62 = vmul.f32 %v5247_v33, %v4457_v36 }
 0x1f4   :  { %7702 = vst [vmem:[#allocation101_spill] sm:$0xff] %v5257_v45  ;;  %v1764_v55 = vadd.f32 %v5205_v48, %v1744_v11  ;;  %v5262_v24 = vadd.f32 %v5205_v48, %v1745_v40  ;;  %v1778_v56 = vmax.f32 %v1762_v39, 0.0  ;;  %v1837_v7 = vmul.f32 %v5247_v33, %v4461_v16 }
 0x1f5   :  { %v5266_v50 = vstv %s3796_s3  ;;  %v1795_v42 = vsel %vm349_vm0, %v1777_v6, 0.0  ;;  %v5274_v63 = vmul.f32 %v7694_v32, %v4608_v49  ;;  %v5277_v11 = vadd.f32 %v5205_v48, %v1746_v8  ;;  %s3854_s3 = spop %3853 }
 0x1f6   :  { %7703 = vst [vmem:[#allocation102_spill] sm:$0xff] %v5262_v24  ;;  %7704 = vst [vmem:[#allocation103_spill] sm:$0xff] %v5266_v50  ;;  %v1854_v41 = vadd.f32 %v5266_v50, %v1834_v22  ;;  %v1855_v58 = vadd.f32 %v5266_v50, %v1835_v34  ;;  %v1856_v26 = vadd.f32 %v5266_v50, %v1836_v62  ;;  %v1779_v45 = vmax.f32 %v1763_v21, 0.0 }
 0x1f7   :  { %7705 = vst [vmem:[#allocation104_spill] sm:$0xff] %v5274_v63  ;;  %7706 = vst [vmem:[#allocation105_spill] sm:$0xff] %v5277_v11  ;;  %v1796_v40 = vadd.f32 %v1795_v42, %v1794_v0  ;;  %v1838_v39 = vmul.f32 %v5247_v33, %v4467_v38  ;;  %v1839_v6 = vmul.f32 %v5247_v33, %v4471_v1  ;;  %v1780_v53 = vmax.f32 %v1764_v55, 0.0 }
 0x1f8   :  { %v1840_v34 = vmul.f32 %v5247_v33, %v4475_v2  ;;  %v1870_v22 = vmax.f32 %v1854_v41, 0.0  ;;  %v1871_v62 = vmax.f32 %v1855_v58, 0.0  ;;  %v1857_v63 = vadd.f32 %v5266_v50, %v1837_v7 }
 0x1f9   :  { %v1872_v32 = vmax.f32 %v1856_v26, 0.0  ;;  %v1797_v42 = vsel %vm349_vm0, %v1778_v56, 0.0  ;;  %v1841_v0 = vmul.f32 %v5247_v33, %v4479_v3  ;;  %v5290_v48 = vstv %s3798_s4  ;;  %s3856_s4 = spop %3855 }
 0x1fa   :  { %7707 = vst [vmem:[#allocation106_spill] sm:$0xff] %v5290_v48  ;;  %v1798_v43 = vadd.f32 %v1797_v42, %v1796_v40  ;;  %v1842_v51 = vmul.f32 %v5247_v33, %v4483_v5  ;;  %v1886_v41 = vsel %vm349_vm0, %v1870_v22, 0.0  ;;  %v1887_v21 = vsel %vm349_vm0, %v1871_v62, 0.0 }
 0x1fb   :  { %v1858_v7 = vadd.f32 %v5266_v50, %v1838_v39  ;;  %v1859_v26 = vadd.f32 %v5266_v50, %v1839_v6  ;;  %v1860_v55 = vadd.f32 %v5266_v50, %v1840_v34  ;;  %v1888_v56 = vadd.f32 %v1887_v21, %v1886_v41 }
 0x1fc   :  { %v1799_v8 = vsel %vm349_vm0, %v1779_v45, 0.0  ;;  %v1873_v24 = vmax.f32 %v1857_v63, 0.0  ;;  %v1889_v40 = vsel %vm349_vm0, %v1872_v32, 0.0  ;;  %v5303_v42 = vsel %vm349_vm0, %v1780_v53, 0.0 }
 0x1fd   :  { %7708 = vst [vmem:[#allocation107_spill] sm:$0xff] %v5303_v42  ;;  %v5307_v22 = vmul.f32 %v5247_v33, %v4608_v49  ;;  %v5310_v39 = vadd.f32 %v5266_v50, %v1841_v0  ;;  %v1890_v6 = vadd.f32 %v1889_v40, %v1888_v56  ;;  %v5312_v34 = vadd.f32 %v1799_v8, %v1798_v43 }
 0x1fe   :  { %v5315_v62 = vadd.f32 %v5266_v50, %v1842_v51  ;;  %v1930_v45 = vmul.f32 %v5290_v48, %v4449_v18  ;;  %v1931_v53 = vmul.f32 %v5290_v48, %v4453_v35  ;;  %v1874_v32 = vmax.f32 %v1858_v7, 0.0 }
 0x1ff   :  { %7709 = vst [vmem:[#allocation108_spill] sm:$0xff] %v5307_v22  ;;  %7710 = vst [vmem:[#allocation109_spill] sm:$0xff] %v5310_v39  ;;  %v1875_v63 = vmax.f32 %v1859_v26, 0.0  ;;  %v1876_v41 = vmax.f32 %v1860_v55, 0.0  ;;  %v1932_v0 = vmul.f32 %v5290_v48, %v4457_v36  ;;  %v1891_v21 = vsel %vm349_vm0, %v1873_v24, 0.0 }
 0x200   :  { %7711 = vst [vmem:[#allocation110_spill] sm:$0xff] %v5312_v34  ;;  %7712 = vst [vmem:[#allocation111_spill] sm:$0xff] %v5315_v62  ;;  %v1933_v43 = vmul.f32 %v5290_v48, %v4461_v16  ;;  %v1934_v51 = vmul.f32 %v5290_v48, %v4467_v38  ;;  %v1935_v8 = vmul.f32 %v5290_v48, %v4471_v1  ;;  %v5334_v55 = vstv %s3800_s15  ;;  %s3858_s15 = spop %3857 }
 0x201   :  { %v1892_v56 = vadd.f32 %v1891_v21, %v1890_v6  ;;  %v1936_v7 = vmul.f32 %v5290_v48, %v4475_v2  ;;  %v1937_v26 = vmul.f32 %v5290_v48, %v4479_v3  ;;  %7713 = vst [vmem:[#allocation112_spill] sm:$0xff] %v5334_v55  ;;  %v1938_v40 = vmul.f32 %v5290_v48, %v4483_v5 }
 0x202   :  { %v1950_v58 = vadd.f32 %v5334_v55, %v1930_v45  ;;  %v1951_v50 = vadd.f32 %v5334_v55, %v1931_v53  ;;  %v1893_v6 = vsel %vm349_vm0, %v1874_v32, 0.0  ;;  %v1895_v21 = vsel %vm349_vm0, %v1875_v63, 0.0 }
 0x203   :  { %v1952_v33 = vadd.f32 %v5334_v55, %v1932_v0  ;;  %v5346_v11 = vsel %vm349_vm0, %v1876_v41, 0.0  ;;  %v5350_v24 = vmul.f32 %v5290_v48, %v4608_v49  ;;  %v5353_v45 = vadd.f32 %v5334_v55, %v1933_v43 }
 0x204   :  { %7714 = vst [vmem:[#allocation113_spill] sm:$0xff] %v5346_v11  ;;  %v5356_v53 = vadd.f32 %v5334_v55, %v1934_v51  ;;  %v1894_v22 = vadd.f32 %v1893_v6, %v1892_v56  ;;  %v5359_v32 = vadd.f32 %v5334_v55, %v1935_v8  ;;  %v5362_v63 = vadd.f32 %v5334_v55, %v1936_v7 }
 0x205   :  { %7715 = vst [vmem:[#allocation114_spill] sm:$0xff] %v5350_v24  ;;  %7716 = vst [vmem:[#allocation115_spill] sm:$0xff] %v5353_v45  ;;  %v5365_v41 = vadd.f32 %v5334_v55, %v1937_v26  ;;  %v5368_v0 = vadd.f32 %v5334_v55, %v1938_v40  ;;  %v1966_v24 = vmax.f32 %v1950_v58, 0.0  ;;  %v1967_v48 = vmax.f32 %v1951_v50, 0.0 }
 0x206   :  { %7717 = vst [vmem:[#allocation116_spill] sm:$0xff] %v5356_v53  ;;  %7718 = vst [vmem:[#allocation117_spill] sm:$0xff] %v5359_v32  ;;  %v5370_v43 = vstv %s3802_s0  ;;  %v1968_v51 = vmax.f32 %v1952_v33, 0.0  ;;  %v5391_v62 = vstv %s3804_s16  ;;  %v5446_v53 = vstv %s3808_s18  ;;  %s3860_s0 = spop %3859 }
 0x207   :  { %7719 = vst [vmem:[#allocation118_spill] sm:$0xff] %v5362_v63  ;;  %7720 = vst [vmem:[#allocation119_spill] sm:$0xff] %v5365_v41  ;;  %v2026_v56 = vmul.f32 %v5370_v43, %v4449_v18  ;;  %v2027_v8 = vmul.f32 %v5370_v43, %v4453_v35  ;;  %v2028_v7 = vmul.f32 %v5370_v43, %v4457_v36  ;;  %v5517_v31 = vstv %s3814_s21  ;;  %s3862_s16 = spop %3861 }
 0x208   :  { %7721 = vst [vmem:[#allocation120_spill] sm:$0xff] %v5368_v0  ;;  %v2029_v26 = vmul.f32 %v5370_v43, %v4461_v16  ;;  %v2030_v58 = vmul.f32 %v5370_v43, %v4467_v38  ;;  %v2031_v50 = vmul.f32 %v5370_v43, %v4471_v1  ;;  %v2032_v33 = vmul.f32 %v5370_v43, %v4475_v2 }
 0x209   :  { %v2033_v6 = vmul.f32 %v5370_v43, %v4479_v3  ;;  %v2034_v55 = vmul.f32 %v5370_v43, %v4483_v5  ;;  %v2046_v39 = vadd.f32 %v5391_v62, %v2026_v56  ;;  %v2047_v11 = vadd.f32 %v5391_v62, %v2027_v8  ;;  %7726 = vst [vmem:[#allocation125_spill] sm:$0xff] %v5517_v31 }
 0x20a   :  { %v2048_v42 = vadd.f32 %v5391_v62, %v2028_v7  ;;  %v2049_v34 = vadd.f32 %v5391_v62, %v2029_v26  ;;  %v5397_v0 = vadd.f32 %v1895_v21, %v1894_v22  ;;  %v2050_v41 = vadd.f32 %v5391_v62, %v2030_v58 }
 0x20b   :  { %v2051_v45 = vadd.f32 %v5391_v62, %v2031_v50  ;;  %v2052_v63 = vadd.f32 %v5391_v62, %v2032_v33  ;;  %v5404_v32 = vadd.f32 %v5391_v62, %v2033_v6  ;;  %v2062_v56 = vmax.f32 %v2046_v39, 0.0 }
 0x20c   :  { %7722 = vst [vmem:[#allocation121_spill] sm:$0xff] %v5397_v0  ;;  %v2063_v8 = vmax.f32 %v2047_v11, 0.0  ;;  %v5407_v7 = vsel %vm349_vm0, %v1966_v24, 0.0  ;;  %v5410_v22 = vsel %vm349_vm0, %v1967_v48, 0.0  ;;  %v5413_v21 = vsel %vm349_vm0, %v1968_v51, 0.0 }
 0x20d   :  { %7723 = vst [vmem:[#allocation122_spill] sm:$0xff] %v5407_v7  ;;  %7724 = vst [vmem:[#allocation123_spill] sm:$0xff] %v5410_v22  ;;  %v2064_v26 = vmax.f32 %v2048_v42, 0.0  ;;  %v5417_v58 = vmul.f32 %v5370_v43, %v4608_v49  ;;  %v5420_v50 = vadd.f32 %v5391_v62, %v2034_v55  ;;  %v2065_v33 = vmax.f32 %v2049_v34, 0.0 }
 0x20e   :  { %7725 = vst [vmem:[#allocation124_spill] sm:$0xff] %v5413_v21  ;;  %v5422_v39 = vstv %s3806_s17  ;;  %v2066_v11 = vmax.f32 %v2050_v41, 0.0  ;;  %v2067_v24 = vmax.f32 %v2051_v45, 0.0  ;;  %v2078_v6 = vsel %vm349_vm0, %v2062_v56, 0.0  ;;  %s3864_s17 = spop %3863 }
 0x20f   :  { %v2079_v48 = vsel %vm349_vm0, %v2063_v8, 0.0  ;;  %v2068_v40 = vmax.f32 %v2052_v63, 0.0  ;;  %v2081_v0 = vsel %vm349_vm0, %v2064_v26, 0.0  ;;  %v2122_v55 = vmul.f32 %v5422_v39, %v4449_v18 }
 0x210   :  { %v2080_v42 = vadd.f32 %v2079_v48, %v2078_v6  ;;  %v2123_v34 = vmul.f32 %v5422_v39, %v4453_v35  ;;  %v2124_v45 = vmul.f32 %v5422_v39, %v4457_v36  ;;  %v2125_v41 = vmul.f32 %v5422_v39, %v4461_v16 }
 0x211   :  { %v2126_v63 = vmul.f32 %v5422_v39, %v4467_v38  ;;  %v2127_v8 = vmul.f32 %v5422_v39, %v4471_v1  ;;  %v2128_v26 = vmul.f32 %v5422_v39, %v4475_v2  ;;  %v2083_v6 = vsel %vm349_vm0, %v2065_v33, 0.0 }
 0x212   :  { %v2082_v56 = vadd.f32 %v2081_v0, %v2080_v42  ;;  %v2085_v48 = vsel %vm349_vm0, %v2066_v11, 0.0  ;;  %v2129_v51 = vmul.f32 %v5422_v39, %v4479_v3  ;;  %v2142_v0 = vadd.f32 %v5446_v53, %v2122_v55 }
 0x213   :  { %v2143_v42 = vadd.f32 %v5446_v53, %v2123_v34  ;;  %v2144_v57 = vadd.f32 %v5446_v53, %v2124_v45  ;;  %v2130_v61 = vmul.f32 %v5422_v39, %v4483_v5  ;;  %v2145_v27 = vadd.f32 %v5446_v53, %v2125_v41 }
 0x214   :  { %v2084_v21 = vadd.f32 %v2083_v6, %v2082_v56  ;;  %v2146_v33 = vadd.f32 %v5446_v53, %v2126_v63  ;;  %v2147_v11 = vadd.f32 %v5446_v53, %v2127_v8  ;;  %v2148_v10 = vadd.f32 %v5446_v53, %v2128_v26 }
 0x215   :  { %v5458_v56 = vadd.f32 %v5446_v53, %v2129_v51  ;;  %v2158_v55 = vmax.f32 %v2142_v0, 0.0  ;;  %v2159_v6 = vmax.f32 %v2143_v42, 0.0  ;;  %v2160_v34 = vmax.f32 %v2144_v57, 0.0 }
 0x216   :  { %v2086_v54 = vadd.f32 %v2085_v48, %v2084_v21  ;;  %v2161_v25 = vmax.f32 %v2145_v27, 0.0  ;;  %v2162_v45 = vmax.f32 %v2146_v33, 0.0  ;;  %v2087_v47 = vsel %vm349_vm0, %v2067_v24, 0.0 }
 0x217   :  { %v5463_v41 = vsel %vm349_vm0, %v2068_v40, 0.0  ;;  %v5467_v21 = vmul.f32 %v5422_v39, %v4608_v49  ;;  %v5472_v51 = vadd.f32 %v5446_v53, %v2130_v61  ;;  %v2174_v27 = vsel %vm349_vm0, %v2158_v55, 0.0 }
 0x218   :  { %v5469_v63 = vadd.f32 %v2087_v47, %v2086_v54  ;;  %v2175_v57 = vsel %vm349_vm0, %v2159_v6, 0.0  ;;  %v2163_v8 = vmax.f32 %v2147_v11, 0.0  ;;  %v2164_v26 = vmax.f32 %v2148_v10, 0.0 }
 0x219   :  { %v2176_v40 = vadd.f32 %v2175_v57, %v2174_v27  ;;  %v2177_v48 = vsel %vm349_vm0, %v2160_v34, 0.0  ;;  %v2179_v0 = vsel %vm349_vm0, %v2161_v25, 0.0  ;;  %v2181_v42 = vsel %vm349_vm0, %v2162_v45, 0.0 }
 0x21a   :  { %v5480_v54 = vstv %s3810_s19  ;;  %v5500_v57 = vstv %s3812_s20  ;;  %v2322_v22 = vmul.f32 %v5517_v31, %v4483_v5  ;;  %s3919_s20 = smov [#allocation3]  }
 0x21b   :  { %v2178_v61 = vadd.f32 %v2177_v48, %v2176_v40  ;;  %v2218_v47 = vmul.f32 %v5480_v54, %v4449_v18  ;;  %v2219_v33 = vmul.f32 %v5480_v54, %v4453_v35  ;;  %v2220_v10 = vmul.f32 %v5480_v54, %v4457_v36  ;;  %s3633_s21 = sshll.u32 %s3919_s20, 4  ;;  %s3634_s21 = int_to_ptr.vmem [resolvable:$true] %s3633_s21 }
 0x21c   :  { %v2221_v11 = vmul.f32 %v5480_v54, %v4461_v16  ;;  %v2222_v25 = vmul.f32 %v5480_v54, %v4467_v38  ;;  %v2223_v55 = vmul.f32 %v5480_v54, %v4471_v1  ;;  %v2224_v6 = vmul.f32 %v5480_v54, %v4475_v2  ;;  %p3899_p1 = scmp.lt.s32.totalorder %s3634_s21, %s3634_s21 }
 0x21d   :  { %v2180_v34 = vadd.f32 %v2179_v0, %v2178_v61  ;;  %v2225_v45 = vmul.f32 %v5480_v54, %v4479_v3  ;;  %v2226_v27 = vmul.f32 %v5480_v54, %v4483_v5  ;;  %v2238_v40 = vadd.f32 %v5500_v57, %v2218_v47 }
 0x21e   :  { %v2239_v48 = vadd.f32 %v5500_v57, %v2219_v33  ;;  %v2240_v24 = vadd.f32 %v5500_v57, %v2220_v10  ;;  %v2241_v52 = vadd.f32 %v5500_v57, %v2221_v11  ;;  %v2242_v61 = vadd.f32 %v5500_v57, %v2222_v25 }
 0x21f   :  { %v2182_v0 = vadd.f32 %v2181_v42, %v2180_v34  ;;  %v2243_v9 = vadd.f32 %v5500_v57, %v2223_v55  ;;  %v2244_v13 = vadd.f32 %v5500_v57, %v2224_v6  ;;  %v5511_v29 = vadd.f32 %v5500_v57, %v2225_v45 }
 0x220   :  { %v2254_v47 = vmax.f32 %v2238_v40, 0.0  ;;  %v2255_v15 = vmax.f32 %v2239_v48, 0.0  ;;  %v2183_v33 = vsel %vm349_vm0, %v2163_v8, 0.0  ;;  %v5515_v10 = vsel %vm349_vm0, %v2164_v26, 0.0 }
 0x221   :  { %v2256_v11 = vmax.f32 %v2240_v24, 0.0  ;;  %v5519_v42 = vadd.f32 %v2183_v33, %v2182_v0  ;;  %v5523_v25 = vmul.f32 %v5480_v54, %v4608_v49  ;;  %v5526_v55 = vadd.f32 %v5500_v57, %v2226_v27 }
 0x222   :  { %v2257_v6 = vmax.f32 %v2241_v52, 0.0  ;;  %v2258_v34 = vmax.f32 %v2242_v61, 0.0  ;;  %v2259_v45 = vmax.f32 %v2243_v9, 0.0  ;;  %v2270_v8 = vsel %vm349_vm0, %v2254_v47, 0.0 }
 0x223   :  { %v2271_v26 = vsel %vm349_vm0, %v2255_v15, 0.0  ;;  %v2260_v40 = vmax.f32 %v2244_v13, 0.0  ;;  %v2273_v0 = vsel %vm349_vm0, %v2256_v11, 0.0  ;;  %v2314_v33 = vmul.f32 %v5517_v31, %v4449_v18 }
 0x224   :  { %v2272_v48 = vadd.f32 %v2271_v26, %v2270_v8  ;;  %v2315_v27 = vmul.f32 %v5517_v31, %v4453_v35  ;;  %v2316_v52 = vmul.f32 %v5517_v31, %v4457_v36  ;;  %v2317_v9 = vmul.f32 %v5517_v31, %v4461_v16 }
 0x225   :  { %v2318_v13 = vmul.f32 %v5517_v31, %v4467_v38  ;;  %v2319_v61 = vmul.f32 %v5517_v31, %v4471_v1  ;;  %v2320_v47 = vmul.f32 %v5517_v31, %v4475_v2  ;;  %v2275_v11 = vsel %vm349_vm0, %v2257_v6, 0.0 }
 0x226   :  { %v2274_v15 = vadd.f32 %v2273_v0, %v2272_v48  ;;  %v2277_v8 = vsel %vm349_vm0, %v2258_v34, 0.0  ;;  %v2321_v26 = vmul.f32 %v5517_v31, %v4479_v3  ;;  %v5550_v24 = vstv %s3816_s2  ;;  %s3894_s2 = scalar_lea.vmem %s3634_s21, 256 }
 0x227   :  { %7727 = vst [vmem:[#allocation126_spill] sm:$0xff] %v5550_v24  ;;  %v2334_v48 = vadd.f32 %v5550_v24, %v2314_v33  ;;  %v2335_v0 = vadd.f32 %v5550_v24, %v2315_v27  ;;  %v2336_v59 = vadd.f32 %v5550_v24, %v2316_v52  ;;  %v2337_v7 = vadd.f32 %v5550_v24, %v2317_v9  ;;  %p3895_p0 = scmp.ne.s32.totalorder %s3634_s21, %s3894_s2  ;;  %p3900_p2 = scmp.lt.s32.totalorder %s3894_s2, %s3894_s2 }
 0x228   :  { %v2276_v12 = vadd.f32 %v2275_v11, %v2274_v15  ;;  %v2338_v6 = vadd.f32 %v5550_v24, %v2318_v13  ;;  %v2339_v34 = vadd.f32 %v5550_v24, %v2319_v61  ;;  %v2340_v30 = vadd.f32 %v5550_v24, %v2320_v47 }
 0x229   :  { %v5562_v15 = vadd.f32 %v5550_v24, %v2321_v26  ;;  %v2350_v33 = vmax.f32 %v2334_v48, 0.0  ;;  %v2351_v11 = vmax.f32 %v2335_v0, 0.0  ;;  %v2352_v27 = vmax.f32 %v2336_v59, 0.0  ;;  %p3901_p3 = por %p3900_p2, %p3899_p1 }
 0x22a   :  { %v2278_v4 = vadd.f32 %v2277_v8, %v2276_v12  ;;  %v2353_v60 = vmax.f32 %v2337_v7, 0.0  ;;  %v2354_v52 = vmax.f32 %v2338_v6, 0.0  ;;  %v2279_v20 = vsel %vm349_vm0, %v2259_v45, 0.0 }
 0x22b   :  { %7728 = vst [vmem:[#allocation127_spill] sm:$0xff] %v5562_v15  ;;  %v5567_v9 = vsel %vm349_vm0, %v2260_v40, 0.0  ;;  %v5571_v12 = vmul.f32 %v5517_v31, %v4608_v49  ;;  %v5576_v61 = vadd.f32 %v5550_v24, %v2322_v22  ;;  %v2366_v59 = vsel %vm349_vm0, %v2350_v33, 0.0  ;;  %p3902_p4 = pnand %p3901_p3, %p3895_p0 }
 0x22c   :  { %v5573_v13 = vadd.f32 %v2279_v20, %v2278_v4  ;;  %v2367_v7 = vsel %vm349_vm0, %v2351_v11, 0.0  ;;  %v2355_v47 = vmax.f32 %v2339_v34, 0.0  ;;  %v2356_v8 = vmax.f32 %v2340_v30, 0.0 }
 0x22d   :  { %7729 = vst [vmem:[#allocation128_spill] sm:$0xff] %v5571_v12  ;;  %7730 = vst [vmem:[#allocation129_spill] sm:$0xff] %v5576_v61  ;;  %v2368_v40 = vadd.f32 %v2367_v7, %v2366_v59  ;;  %v2369_v26 = vsel %vm349_vm0, %v2352_v27, 0.0  ;;  %v2371_v48 = vsel %vm349_vm0, %v2353_v60, 0.0  ;;  %v2373_v0 = vsel %vm349_vm0, %v2354_v52, 0.0 }
 0x22e   :  { %v5584_v20 = vstv %s3818_s22  ;;  %v5604_v7 = vstv %s3820_s23  ;;  %v5621_v12 = vstv %s3822_s1 }
 0x22f   :  { %7731 = vst [vmem:[#allocation130_spill] sm:$0xff] %v5584_v20  ;;  %v2370_v4 = vadd.f32 %v2369_v26, %v2368_v40  ;;  %v2410_v22 = vmul.f32 %v5584_v20, %v4449_v18  ;;  %v2411_v6 = vmul.f32 %v5584_v20, %v4453_v35  ;;  %v2412_v30 = vmul.f32 %v5584_v20, %v4457_v36 }
 0x230   :  { %v2413_v34 = vmul.f32 %v5584_v20, %v4461_v16  ;;  %v2414_v60 = vmul.f32 %v5584_v20, %v4467_v38  ;;  %v2415_v33 = vmul.f32 %v5584_v20, %v4471_v1  ;;  %v2416_v11 = vmul.f32 %v5584_v20, %v4475_v2  ;;  %7732 = vst [vmem:[#allocation131_spill] sm:$0xff] %v5604_v7 }
 0x231   :  { %v2372_v27 = vadd.f32 %v2371_v48, %v2370_v4  ;;  %v2417_v52 = vmul.f32 %v5584_v20, %v4479_v3  ;;  %v2418_v59 = vmul.f32 %v5584_v20, %v4483_v5  ;;  %v2430_v40 = vadd.f32 %v5604_v7, %v2410_v22  ;;  %7735 = vst [vmem:[#allocation134_spill] sm:$0xff] %v5621_v12 }
 0x232   :  { %v2431_v26 = vadd.f32 %v5604_v7, %v2411_v6  ;;  %v2432_v45 = vadd.f32 %v5604_v7, %v2412_v30  ;;  %v2433_v28 = vadd.f32 %v5604_v7, %v2413_v34  ;;  %v2434_v4 = vadd.f32 %v5604_v7, %v2414_v60 }
 0x233   :  { %v2374_v48 = vadd.f32 %v2373_v0, %v2372_v27  ;;  %v2435_v14 = vadd.f32 %v5604_v7, %v2415_v33  ;;  %v2436_v17 = vadd.f32 %v5604_v7, %v2416_v11  ;;  %v5615_v15 = vadd.f32 %v5604_v7, %v2417_v52 }
 0x234   :  { %v2446_v22 = vmax.f32 %v2430_v40, 0.0  ;;  %v2447_v24 = vmax.f32 %v2431_v26, 0.0  ;;  %v2375_v6 = vsel %vm349_vm0, %v2355_v47, 0.0  ;;  %v5619_v30 = vsel %vm349_vm0, %v2356_v8, 0.0 }
 0x235   :  { %7733 = vst [vmem:[#allocation132_spill] sm:$0xff] %v5615_v15  ;;  %7734 = vst [vmem:[#allocation133_spill] sm:$0xff] %v5619_v30  ;;  %v2448_v34 = vmax.f32 %v2432_v45, 0.0  ;;  %v5623_v0 = vadd.f32 %v2375_v6, %v2374_v48  ;;  %v5627_v60 = vmul.f32 %v5584_v20, %v4608_v49  ;;  %v5630_v33 = vadd.f32 %v5604_v7, %v2418_v59 }
 0x236   :  { %v2449_v11 = vmax.f32 %v2433_v28, 0.0  ;;  %v2450_v27 = vmax.f32 %v2434_v4, 0.0  ;;  %v2451_v52 = vmax.f32 %v2435_v14, 0.0  ;;  %v2462_v47 = vsel %vm349_vm0, %v2446_v22, 0.0 }
 0x237   :  { %7736 = vst [vmem:[#allocation135_spill] sm:$0xff] %v5623_v0  ;;  %7737 = vst [vmem:[#allocation136_spill] sm:$0xff] %v5627_v60  ;;  %v2463_v8 = vsel %vm349_vm0, %v2447_v24, 0.0  ;;  %v2452_v40 = vmax.f32 %v2436_v17, 0.0  ;;  %v2465_v48 = vsel %vm349_vm0, %v2448_v34, 0.0  ;;  %v2506_v6 = vmul.f32 %v5621_v12, %v4449_v18 }
 0x238   :  { %7738 = vst [vmem:[#allocation137_spill] sm:$0xff] %v5630_v33  ;;  %v2464_v26 = vadd.f32 %v2463_v8, %v2462_v47  ;;  %v2507_v59 = vmul.f32 %v5621_v12, %v4453_v35  ;;  %v2508_v14 = vmul.f32 %v5621_v12, %v4457_v36  ;;  %v2509_v28 = vmul.f32 %v5621_v12, %v4461_v16 }
 0x239   :  { %v2510_v17 = vmul.f32 %v5621_v12, %v4467_v38  ;;  %v2511_v4 = vmul.f32 %v5621_v12, %v4471_v1  ;;  %v2512_v22 = vmul.f32 %v5621_v12, %v4475_v2  ;;  %v2467_v34 = vsel %vm349_vm0, %v2449_v11, 0.0 }
 0x23a   :  { %v2466_v24 = vadd.f32 %v2465_v48, %v2464_v26  ;;  %v2469_v47 = vsel %vm349_vm0, %v2450_v27, 0.0  ;;  %v2513_v8 = vmul.f32 %v5621_v12, %v4479_v3  ;;  %v5654_v45 = vstv %s3824_s24 }
 0x23b   :  { %7739 = vst [vmem:[#allocation138_spill] sm:$0xff] %v5654_v45  ;;  %v2526_v26 = vadd.f32 %v5654_v45, %v2506_v6  ;;  %v2527_v48 = vadd.f32 %v5654_v45, %v2507_v59  ;;  %v2528_v15 = vadd.f32 %v5654_v45, %v2508_v14  ;;  %v2514_v7 = vmul.f32 %v5621_v12, %v4483_v5 }
 0x23c   :  { %v2468_v37 = vadd.f32 %v2467_v34, %v2466_v24  ;;  %v2529_v60 = vadd.f32 %v5654_v45, %v2509_v28  ;;  %v2530_v11 = vadd.f32 %v5654_v45, %v2510_v17  ;;  %v2531_v27 = vadd.f32 %v5654_v45, %v2511_v4 }
 0x23d   :  { %v2532_v61 = vadd.f32 %v5654_v45, %v2512_v22  ;;  %v5666_v24 = vadd.f32 %v5654_v45, %v2513_v8  ;;  %v2542_v6 = vmax.f32 %v2526_v26, 0.0  ;;  %v2543_v34 = vmax.f32 %v2527_v48, 0.0 }
 0x23e   :  { %v2470_v20 = vadd.f32 %v2469_v47, %v2468_v37  ;;  %v2544_v59 = vmax.f32 %v2528_v15, 0.0  ;;  %v2545_v30 = vmax.f32 %v2529_v60, 0.0  ;;  %v2546_v14 = vmax.f32 %v2530_v11, 0.0 }
 0x23f   :  { %7740 = vst [vmem:[#allocation139_spill] sm:$0xff] %v5666_v24  ;;  %v2471_v31 = vsel %vm349_vm0, %v2451_v52, 0.0  ;;  %v5671_v28 = vsel %vm349_vm0, %v2452_v40, 0.0  ;;  %v5675_v37 = vmul.f32 %v5621_v12, %v4608_v49  ;;  %v5680_v4 = vadd.f32 %v5654_v45, %v2514_v7 }
 0x240   :  { %7741 = vst [vmem:[#allocation140_spill] sm:$0xff] %v5671_v28  ;;  %v5677_v17 = vadd.f32 %v2471_v31, %v2470_v20  ;;  %v2558_v15 = vsel %vm349_vm0, %v2542_v6, 0.0  ;;  %v2559_v60 = vsel %vm349_vm0, %v2543_v34, 0.0  ;;  %v2547_v22 = vmax.f32 %v2531_v27, 0.0 }
 0x241   :  { %7742 = vst [vmem:[#allocation141_spill] sm:$0xff] %v5675_v37  ;;  %7744 = vst [vmem:[#allocation143_spill] sm:$0xff] %v5680_v4  ;;  %v2548_v47 = vmax.f32 %v2532_v61, 0.0  ;;  %v2560_v40 = vadd.f32 %v2559_v60, %v2558_v15  ;;  %v2561_v8 = vsel %vm349_vm0, %v2544_v59, 0.0  ;;  %v2563_v26 = vsel %vm349_vm0, %v2545_v30, 0.0 }
 0x242   :  { %7743 = vst [vmem:[#allocation142_spill] sm:$0xff] %v5677_v17  ;;  %v2565_v48 = vsel %vm349_vm0, %v2546_v14, 0.0  ;;  %v5688_v31 = vstv %s3826_s25  ;;  %v5708_v60 = vstv %s3828_s26  ;;  %v5725_v28 = vstv %s3830_s6 }
 0x243   :  { %7745 = vst [vmem:[#allocation144_spill] sm:$0xff] %v5688_v31  ;;  %v2562_v20 = vadd.f32 %v2561_v8, %v2560_v40  ;;  %v2602_v7 = vmul.f32 %v5688_v31, %v4449_v18  ;;  %v2603_v11 = vmul.f32 %v5688_v31, %v4453_v35  ;;  %v2604_v61 = vmul.f32 %v5688_v31, %v4457_v36 }
 0x244   :  { %v2605_v27 = vmul.f32 %v5688_v31, %v4461_v16  ;;  %v2606_v30 = vmul.f32 %v5688_v31, %v4467_v38  ;;  %v2607_v6 = vmul.f32 %v5688_v31, %v4471_v1  ;;  %v2608_v34 = vmul.f32 %v5688_v31, %v4475_v2  ;;  %7746 = vst [vmem:[#allocation145_spill] sm:$0xff] %v5708_v60 }
 0x245   :  { %v2564_v59 = vadd.f32 %v2563_v26, %v2562_v20  ;;  %v2609_v14 = vmul.f32 %v5688_v31, %v4479_v3  ;;  %v2610_v15 = vmul.f32 %v5688_v31, %v4483_v5  ;;  %v2622_v40 = vadd.f32 %v5708_v60, %v2602_v7  ;;  %7749 = vst [vmem:[#allocation148_spill] sm:$0xff] %v5725_v28 }
 0x246   :  { %v2623_v8 = vadd.f32 %v5708_v60, %v2603_v11  ;;  %v2624_v52 = vadd.f32 %v5708_v60, %v2604_v61  ;;  %v2625_v0 = vadd.f32 %v5708_v60, %v2605_v27  ;;  %v2626_v20 = vadd.f32 %v5708_v60, %v2606_v30 }
 0x247   :  { %v2566_v26 = vadd.f32 %v2565_v48, %v2564_v59  ;;  %v2627_v45 = vadd.f32 %v5708_v60, %v2607_v6  ;;  %v2628_v37 = vadd.f32 %v5708_v60, %v2608_v34  ;;  %v5719_v12 = vadd.f32 %v5708_v60, %v2609_v14 }
 0x248   :  { %v2638_v7 = vmax.f32 %v2622_v40, 0.0  ;;  %v2639_v33 = vmax.f32 %v2623_v8, 0.0  ;;  %v2567_v11 = vsel %vm349_vm0, %v2547_v22, 0.0  ;;  %v5723_v61 = vsel %vm349_vm0, %v2548_v47, 0.0 }
 0x249   :  { %7747 = vst [vmem:[#allocation146_spill] sm:$0xff] %v5719_v12  ;;  %7748 = vst [vmem:[#allocation147_spill] sm:$0xff] %v5723_v61  ;;  %v2640_v27 = vmax.f32 %v2624_v52, 0.0  ;;  %v5727_v48 = vadd.f32 %v2567_v11, %v2566_v26  ;;  %v5731_v30 = vmul.f32 %v5688_v31, %v4608_v49  ;;  %v5734_v6 = vadd.f32 %v5708_v60, %v2610_v15 }
 0x24a   :  { %v2641_v34 = vmax.f32 %v2625_v0, 0.0  ;;  %v2642_v59 = vmax.f32 %v2626_v20, 0.0  ;;  %v2643_v14 = vmax.f32 %v2627_v45, 0.0  ;;  %v2654_v22 = vsel %vm349_vm0, %v2638_v7, 0.0 }
 0x24b   :  { %7750 = vst [vmem:[#allocation149_spill] sm:$0xff] %v5727_v48  ;;  %7751 = vst [vmem:[#allocation150_spill] sm:$0xff] %v5731_v30  ;;  %v2655_v47 = vsel %vm349_vm0, %v2639_v33, 0.0  ;;  %v2644_v40 = vmax.f32 %v2628_v37, 0.0  ;;  %v2657_v26 = vsel %vm349_vm0, %v2640_v27, 0.0  ;;  %v2698_v11 = vmul.f32 %v5725_v28, %v4449_v18 }
 0x24c   :  { %7752 = vst [vmem:[#allocation151_spill] sm:$0xff] %v5734_v6  ;;  %v2656_v8 = vadd.f32 %v2655_v47, %v2654_v22  ;;  %v2699_v15 = vmul.f32 %v5725_v28, %v4453_v35  ;;  %v2700_v0 = vmul.f32 %v5725_v28, %v4457_v36  ;;  %v2701_v45 = vmul.f32 %v5725_v28, %v4461_v16 }
 0x24d   :  { %v2702_v37 = vmul.f32 %v5725_v28, %v4467_v38  ;;  %v2703_v20 = vmul.f32 %v5725_v28, %v4471_v1  ;;  %v2704_v7 = vmul.f32 %v5725_v28, %v4475_v2  ;;  %v2659_v27 = vsel %vm349_vm0, %v2641_v34, 0.0 }
 0x24e   :  { %v2658_v33 = vadd.f32 %v2657_v26, %v2656_v8  ;;  %v2661_v22 = vsel %vm349_vm0, %v2642_v59, 0.0  ;;  %v2705_v47 = vmul.f32 %v5725_v28, %v4479_v3  ;;  %v5758_v52 = vstv %s3832_s27 }
 0x24f   :  { %7753 = vst [vmem:[#allocation152_spill] sm:$0xff] %v5758_v52  ;;  %v2718_v8 = vadd.f32 %v5758_v52, %v2698_v11  ;;  %v2719_v26 = vadd.f32 %v5758_v52, %v2699_v15  ;;  %v2720_v12 = vadd.f32 %v5758_v52, %v2700_v0  ;;  %v2706_v60 = vmul.f32 %v5725_v28, %v4483_v5 }
 0x250   :  { %v2660_v24 = vadd.f32 %v2659_v27, %v2658_v33  ;;  %v2721_v30 = vadd.f32 %v5758_v52, %v2701_v45  ;;  %v2722_v34 = vadd.f32 %v5758_v52, %v2702_v37  ;;  %v2723_v59 = vadd.f32 %v5758_v52, %v2703_v20 }
 0x251   :  { %v2724_v4 = vadd.f32 %v5758_v52, %v2704_v7  ;;  %v5770_v33 = vadd.f32 %v5758_v52, %v2705_v47  ;;  %v2734_v11 = vmax.f32 %v2718_v8, 0.0  ;;  %v2735_v27 = vmax.f32 %v2719_v26, 0.0 }
 0x252   :  { %v2662_v31 = vadd.f32 %v2661_v22, %v2660_v24  ;;  %v2736_v15 = vmax.f32 %v2720_v12, 0.0  ;;  %v2737_v61 = vmax.f32 %v2721_v30, 0.0  ;;  %v2738_v0 = vmax.f32 %v2722_v34, 0.0 }
 0x253   :  { %7754 = vst [vmem:[#allocation153_spill] sm:$0xff] %v5770_v33  ;;  %v2663_v17 = vsel %vm349_vm0, %v2643_v14, 0.0  ;;  %v5775_v45 = vsel %vm349_vm0, %v2644_v40, 0.0  ;;  %v5779_v24 = vmul.f32 %v5725_v28, %v4608_v49  ;;  %v5784_v20 = vadd.f32 %v5758_v52, %v2706_v60 }
 0x254   :  { %7755 = vst [vmem:[#allocation154_spill] sm:$0xff] %v5775_v45  ;;  %v5781_v37 = vadd.f32 %v2663_v17, %v2662_v31  ;;  %v2750_v12 = vsel %vm349_vm0, %v2734_v11, 0.0  ;;  %v2751_v30 = vsel %vm349_vm0, %v2735_v27, 0.0  ;;  %v2739_v7 = vmax.f32 %v2723_v59, 0.0 }
 0x255   :  { %7756 = vst [vmem:[#allocation155_spill] sm:$0xff] %v5779_v24  ;;  %7758 = vst [vmem:[#allocation157_spill] sm:$0xff] %v5784_v20  ;;  %v2740_v22 = vmax.f32 %v2724_v4, 0.0  ;;  %v2752_v40 = vadd.f32 %v2751_v30, %v2750_v12  ;;  %v2753_v47 = vsel %vm349_vm0, %v2736_v15, 0.0  ;;  %v2755_v8 = vsel %vm349_vm0, %v2737_v61, 0.0 }
 0x256   :  { %7757 = vst [vmem:[#allocation156_spill] sm:$0xff] %v5781_v37  ;;  %v2757_v26 = vsel %vm349_vm0, %v2738_v0, 0.0  ;;  %v5792_v17 = vstv %s3834_s28  ;;  %v5812_v30 = vstv %s3836_s29  ;;  %v5829_v45 = vstv %s3838_s30 }
 0x257   :  { %7759 = vst [vmem:[#allocation158_spill] sm:$0xff] %v5792_v17  ;;  %v2754_v31 = vadd.f32 %v2753_v47, %v2752_v40  ;;  %v2794_v60 = vmul.f32 %v5792_v17, %v4449_v18  ;;  %v2795_v34 = vmul.f32 %v5792_v17, %v4453_v35  ;;  %v2796_v4 = vmul.f32 %v5792_v17, %v4457_v36 }
 0x258   :  { %v2797_v59 = vmul.f32 %v5792_v17, %v4461_v16  ;;  %v2798_v61 = vmul.f32 %v5792_v17, %v4467_v38  ;;  %v2799_v11 = vmul.f32 %v5792_v17, %v4471_v1  ;;  %v2800_v27 = vmul.f32 %v5792_v17, %v4475_v2  ;;  %7760 = vst [vmem:[#allocation159_spill] sm:$0xff] %v5812_v30 }
 0x259   :  { %v2756_v15 = vadd.f32 %v2755_v8, %v2754_v31  ;;  %v2801_v0 = vmul.f32 %v5792_v17, %v4479_v3  ;;  %v2802_v12 = vmul.f32 %v5792_v17, %v4483_v5  ;;  %v2814_v40 = vadd.f32 %v5812_v30, %v2794_v60  ;;  %7763 = vst [vmem:[#allocation162_spill] sm:$0xff] %v5829_v45 }
 0x25a   :  { %v2815_v47 = vadd.f32 %v5812_v30, %v2795_v34  ;;  %v2816_v14 = vadd.f32 %v5812_v30, %v2796_v4  ;;  %v2817_v48 = vadd.f32 %v5812_v30, %v2797_v59  ;;  %v2818_v31 = vadd.f32 %v5812_v30, %v2798_v61 }
 0x25b   :  { %v2758_v8 = vadd.f32 %v2757_v26, %v2756_v15  ;;  %v2819_v52 = vadd.f32 %v5812_v30, %v2799_v11  ;;  %v2820_v24 = vadd.f32 %v5812_v30, %v2800_v27  ;;  %v5823_v28 = vadd.f32 %v5812_v30, %v2801_v0 }
 0x25c   :  { %v2830_v60 = vmax.f32 %v2814_v40, 0.0  ;;  %v2831_v6 = vmax.f32 %v2815_v47, 0.0  ;;  %v2759_v34 = vsel %vm349_vm0, %v2739_v7, 0.0  ;;  %v5827_v4 = vsel %vm349_vm0, %v2740_v22, 0.0 }
 0x25d   :  { %7761 = vst [vmem:[#allocation160_spill] sm:$0xff] %v5823_v28  ;;  %7762 = vst [vmem:[#allocation161_spill] sm:$0xff] %v5827_v4  ;;  %v2832_v59 = vmax.f32 %v2816_v14, 0.0  ;;  %v5831_v26 = vadd.f32 %v2759_v34, %v2758_v8  ;;  %v5835_v61 = vmul.f32 %v5792_v17, %v4608_v49  ;;  %v5838_v11 = vadd.f32 %v5812_v30, %v2802_v12 }
 0x25e   :  { %v2833_v27 = vmax.f32 %v2817_v48, 0.0  ;;  %v2834_v15 = vmax.f32 %v2818_v31, 0.0  ;;  %v2835_v0 = vmax.f32 %v2819_v52, 0.0  ;;  %v2846_v7 = vsel %vm349_vm0, %v2830_v60, 0.0 }
 0x25f   :  { %7764 = vst [vmem:[#allocation163_spill] sm:$0xff] %v5831_v26  ;;  %7765 = vst [vmem:[#allocation164_spill] sm:$0xff] %v5835_v61  ;;  %v2847_v22 = vsel %vm349_vm0, %v2831_v6, 0.0  ;;  %v2836_v40 = vmax.f32 %v2820_v24, 0.0  ;;  %v2849_v8 = vsel %vm349_vm0, %v2832_v59, 0.0  ;;  %v2890_v34 = vmul.f32 %v5829_v45, %v4449_v18 }
 0x260   :  { %7766 = vst [vmem:[#allocation165_spill] sm:$0xff] %v5838_v11  ;;  %v2848_v47 = vadd.f32 %v2847_v22, %v2846_v7  ;;  %v2891_v12 = vmul.f32 %v5829_v45, %v4453_v35  ;;  %v2892_v48 = vmul.f32 %v5829_v45, %v4457_v36  ;;  %v2893_v52 = vmul.f32 %v5829_v45, %v4461_v16 }
 0x261   :  { %v2894_v24 = vmul.f32 %v5829_v45, %v4467_v38  ;;  %v2895_v31 = vmul.f32 %v5829_v45, %v4471_v1  ;;  %v2896_v60 = vmul.f32 %v5829_v45, %v4475_v2  ;;  %v2851_v59 = vsel %vm349_vm0, %v2833_v27, 0.0 }
 0x262   :  { %v2850_v6 = vadd.f32 %v2849_v8, %v2848_v47  ;;  %v2853_v7 = vsel %vm349_vm0, %v2834_v15, 0.0  ;;  %v2897_v22 = vmul.f32 %v5829_v45, %v4479_v3  ;;  %v5862_v14 = vstv %s3840_s8 }
 0x263   :  { %7767 = vst [vmem:[#allocation166_spill] sm:$0xff] %v5862_v14  ;;  %v2910_v47 = vadd.f32 %v5862_v14, %v2890_v34  ;;  %v2911_v8 = vadd.f32 %v5862_v14, %v2891_v12  ;;  %v2912_v28 = vadd.f32 %v5862_v14, %v2892_v48  ;;  %v2898_v30 = vmul.f32 %v5829_v45, %v4483_v5 }
 0x264   :  { %v2852_v33 = vadd.f32 %v2851_v59, %v2850_v6  ;;  %v2913_v61 = vadd.f32 %v5862_v14, %v2893_v52  ;;  %v2914_v27 = vadd.f32 %v5862_v14, %v2894_v24  ;;  %v2915_v15 = vadd.f32 %v5862_v14, %v2895_v31 }
 0x265   :  { %v2916_v20 = vadd.f32 %v5862_v14, %v2896_v60  ;;  %v5874_v6 = vadd.f32 %v5862_v14, %v2897_v22  ;;  %v2926_v34 = vmax.f32 %v2910_v47, 0.0  ;;  %v2927_v59 = vmax.f32 %v2911_v8, 0.0 }
 0x266   :  { %v2854_v17 = vadd.f32 %v2853_v7, %v2852_v33  ;;  %v2928_v12 = vmax.f32 %v2912_v28, 0.0  ;;  %v2929_v4 = vmax.f32 %v2913_v61, 0.0  ;;  %v2930_v48 = vmax.f32 %v2914_v27, 0.0 }
 0x267   :  { %7768 = vst [vmem:[#allocation167_spill] sm:$0xff] %v5874_v6  ;;  %v2855_v37 = vsel %vm349_vm0, %v2835_v0, 0.0  ;;  %v5879_v52 = vsel %vm349_vm0, %v2836_v40, 0.0  ;;  %v5883_v33 = vmul.f32 %v5829_v45, %v4608_v49  ;;  %v5888_v31 = vadd.f32 %v5862_v14, %v2898_v30 }
 0x268   :  { %7769 = vst [vmem:[#allocation168_spill] sm:$0xff] %v5879_v52  ;;  %v5885_v24 = vadd.f32 %v2855_v37, %v2854_v17  ;;  %v2942_v28 = vsel %vm349_vm0, %v2926_v34, 0.0  ;;  %v2943_v61 = vsel %vm349_vm0, %v2927_v59, 0.0  ;;  %v2931_v60 = vmax.f32 %v2915_v15, 0.0 }
 0x269   :  { %7770 = vst [vmem:[#allocation169_spill] sm:$0xff] %v5883_v33  ;;  %7772 = vst [vmem:[#allocation171_spill] sm:$0xff] %v5888_v31  ;;  %v2932_v7 = vmax.f32 %v2916_v20, 0.0  ;;  %v2944_v40 = vadd.f32 %v2943_v61, %v2942_v28  ;;  %v2945_v22 = vsel %vm349_vm0, %v2928_v12, 0.0  ;;  %v2947_v47 = vsel %vm349_vm0, %v2929_v4, 0.0 }
 0x26a   :  { %7771 = vst [vmem:[#allocation170_spill] sm:$0xff] %v5885_v24  ;;  %v2949_v8 = vsel %vm349_vm0, %v2930_v48, 0.0  ;;  %v5896_v37 = vstv %s3842_s9  ;;  %v5916_v61 = vstv %s3844_s10  ;;  %v5933_v52 = vstv %s3846_s11 }
 0x26b   :  { %7773 = vst [vmem:[#allocation172_spill] sm:$0xff] %v5896_v37  ;;  %v2946_v17 = vadd.f32 %v2945_v22, %v2944_v40  ;;  %v2986_v30 = vmul.f32 %v5896_v37, %v4449_v18  ;;  %v2987_v27 = vmul.f32 %v5896_v37, %v4453_v35  ;;  %v2988_v20 = vmul.f32 %v5896_v37, %v4457_v36 }
 0x26c   :  { %v2989_v15 = vmul.f32 %v5896_v37, %v4461_v16  ;;  %v2990_v4 = vmul.f32 %v5896_v37, %v4467_v38  ;;  %v2991_v34 = vmul.f32 %v5896_v37, %v4471_v1  ;;  %v2992_v59 = vmul.f32 %v5896_v37, %v4475_v2  ;;  %7774 = vst [vmem:[#allocation173_spill] sm:$0xff] %v5916_v61 }
 0x26d   :  { %v2948_v12 = vadd.f32 %v2947_v47, %v2946_v17  ;;  %v2993_v48 = vmul.f32 %v5896_v37, %v4479_v3  ;;  %v2994_v28 = vmul.f32 %v5896_v37, %v4483_v5  ;;  %v3006_v40 = vadd.f32 %v5916_v61, %v2986_v30  ;;  %7777 = vst [vmem:[#allocation176_spill] sm:$0xff] %v5933_v52 }
 0x26e   :  { %v3007_v22 = vadd.f32 %v5916_v61, %v2987_v27  ;;  %v3008_v0 = vadd.f32 %v5916_v61, %v2988_v20  ;;  %v3009_v26 = vadd.f32 %v5916_v61, %v2989_v15  ;;  %v3010_v17 = vadd.f32 %v5916_v61, %v2990_v4 }
 0x26f   :  { %v2950_v47 = vadd.f32 %v2949_v8, %v2948_v12  ;;  %v3011_v14 = vadd.f32 %v5916_v61, %v2991_v34  ;;  %v3012_v33 = vadd.f32 %v5916_v61, %v2992_v59  ;;  %v5927_v45 = vadd.f32 %v5916_v61, %v2993_v48 }
 0x270   :  { %v3022_v30 = vmax.f32 %v3006_v40, 0.0  ;;  %v3023_v11 = vmax.f32 %v3007_v22, 0.0  ;;  %v2951_v27 = vsel %vm349_vm0, %v2931_v60, 0.0  ;;  %v5931_v20 = vsel %vm349_vm0, %v2932_v7, 0.0 }
 0x271   :  { %7775 = vst [vmem:[#allocation174_spill] sm:$0xff] %v5927_v45  ;;  %7776 = vst [vmem:[#allocation175_spill] sm:$0xff] %v5931_v20  ;;  %v3024_v15 = vmax.f32 %v3008_v0, 0.0  ;;  %v5935_v8 = vadd.f32 %v2951_v27, %v2950_v47  ;;  %v5939_v4 = vmul.f32 %v5896_v37, %v4608_v49  ;;  %v5942_v34 = vadd.f32 %v5916_v61, %v2994_v28 }
 0x272   :  { %v3025_v59 = vmax.f32 %v3009_v26, 0.0  ;;  %v3026_v12 = vmax.f32 %v3010_v17, 0.0  ;;  %v3027_v48 = vmax.f32 %v3011_v14, 0.0  ;;  %v3038_v60 = vsel %vm349_vm0, %v3022_v30, 0.0 }
 0x273   :  { %7778 = vst [vmem:[#allocation177_spill] sm:$0xff] %v5935_v8  ;;  %7779 = vst [vmem:[#allocation178_spill] sm:$0xff] %v5939_v4  ;;  %v3039_v7 = vsel %vm349_vm0, %v3023_v11, 0.0  ;;  %v3028_v40 = vmax.f32 %v3012_v33, 0.0  ;;  %v3041_v47 = vsel %vm349_vm0, %v3024_v15, 0.0  ;;  %v3082_v27 = vmul.f32 %v5933_v52, %v4449_v18 }
 0x274   :  { %7780 = vst [vmem:[#allocation179_spill] sm:$0xff] %v5942_v34  ;;  %v3040_v22 = vadd.f32 %v3039_v7, %v3038_v60  ;;  %v3083_v28 = vmul.f32 %v5933_v52, %v4453_v35  ;;  %v3084_v26 = vmul.f32 %v5933_v52, %v4457_v36  ;;  %v3085_v14 = vmul.f32 %v5933_v52, %v4461_v16 }
 0x275   :  { %v3086_v33 = vmul.f32 %v5933_v52, %v4467_v38  ;;  %v3087_v17 = vmul.f32 %v5933_v52, %v4471_v1  ;;  %v3088_v30 = vmul.f32 %v5933_v52, %v4475_v2  ;;  %v3043_v15 = vsel %vm349_vm0, %v3025_v59, 0.0 }
 0x276   :  { %v3042_v11 = vadd.f32 %v3041_v47, %v3040_v22  ;;  %v3045_v60 = vsel %vm349_vm0, %v3026_v12, 0.0  ;;  %v3089_v7 = vmul.f32 %v5933_v52, %v4479_v3  ;;  %v5966_v0 = vstv %s3848_s12 }
 0x277   :  { %7781 = vst [vmem:[#allocation180_spill] sm:$0xff] %v5966_v0  ;;  %v3102_v22 = vadd.f32 %v5966_v0, %v3082_v27  ;;  %v3103_v47 = vadd.f32 %v5966_v0, %v3083_v28  ;;  %v3104_v45 = vadd.f32 %v5966_v0, %v3084_v26  ;;  %v3090_v61 = vmul.f32 %v5933_v52, %v4483_v5 }
 0x278   :  { %v3044_v6 = vadd.f32 %v3043_v15, %v3042_v11  ;;  %v3105_v4 = vadd.f32 %v5966_v0, %v3085_v14  ;;  %v3106_v59 = vadd.f32 %v5966_v0, %v3086_v33  ;;  %v3107_v12 = vadd.f32 %v5966_v0, %v3087_v17 }
 0x279   :  { %v3108_v31 = vadd.f32 %v5966_v0, %v3088_v30  ;;  %v5978_v11 = vadd.f32 %v5966_v0, %v3089_v7  ;;  %v3118_v27 = vmax.f32 %v3102_v22, 0.0  ;;  %v3119_v15 = vmax.f32 %v3103_v47, 0.0 }
 0x27a   :  { %v3046_v37 = vadd.f32 %v3045_v60, %v3044_v6  ;;  %v3120_v28 = vmax.f32 %v3104_v45, 0.0  ;;  %v3121_v20 = vmax.f32 %v3105_v4, 0.0  ;;  %v3122_v26 = vmax.f32 %v3106_v59, 0.0 }
 0x27b   :  { %7782 = vst [vmem:[#allocation181_spill] sm:$0xff] %v5978_v11  ;;  %v3047_v24 = vsel %vm349_vm0, %v3027_v48, 0.0  ;;  %v5983_v14 = vsel %vm349_vm0, %v3028_v40, 0.0  ;;  %v5987_v6 = vmul.f32 %v5933_v52, %v4608_v49  ;;  %v5992_v17 = vadd.f32 %v5966_v0, %v3090_v61 }
 0x27c   :  { %7783 = vst [vmem:[#allocation182_spill] sm:$0xff] %v5983_v14  ;;  %v5989_v33 = vadd.f32 %v3047_v24, %v3046_v37  ;;  %v3134_v45 = vsel %vm349_vm0, %v3118_v27, 0.0  ;;  %v3135_v4 = vsel %vm349_vm0, %v3119_v15, 0.0  ;;  %v3123_v30 = vmax.f32 %v3107_v12, 0.0 }
 0x27d   :  { %7784 = vst [vmem:[#allocation183_spill] sm:$0xff] %v5987_v6  ;;  %7786 = vst [vmem:[#allocation185_spill] sm:$0xff] %v5992_v17  ;;  %v3124_v60 = vmax.f32 %v3108_v31, 0.0  ;;  %v3136_v40 = vadd.f32 %v3135_v4, %v3134_v45  ;;  %v3137_v7 = vsel %vm349_vm0, %v3120_v28, 0.0  ;;  %v3139_v22 = vsel %vm349_vm0, %v3121_v20, 0.0 }
 0x27e   :  { %7785 = vst [vmem:[#allocation184_spill] sm:$0xff] %v5989_v33  ;;  %v3141_v47 = vsel %vm349_vm0, %v3122_v26, 0.0  ;;  %v6000_v24 = vstv %s3850_s13  ;;  %v6020_v4 = vstv %s3852_s14  ;;  %v6037_v14 = vstv %s3854_s3 }
 0x27f   :  { %7787 = vst [vmem:[#allocation186_spill] sm:$0xff] %v6000_v24  ;;  %v3138_v37 = vadd.f32 %v3137_v7, %v3136_v40  ;;  %v3178_v61 = vmul.f32 %v6000_v24, %v4449_v18  ;;  %v3179_v59 = vmul.f32 %v6000_v24, %v4453_v35  ;;  %v3180_v31 = vmul.f32 %v6000_v24, %v4457_v36 }
 0x280   :  { %v3181_v12 = vmul.f32 %v6000_v24, %v4461_v16  ;;  %v3182_v20 = vmul.f32 %v6000_v24, %v4467_v38  ;;  %v3183_v27 = vmul.f32 %v6000_v24, %v4471_v1  ;;  %v3184_v15 = vmul.f32 %v6000_v24, %v4475_v2  ;;  %7788 = vst [vmem:[#allocation187_spill] sm:$0xff] %v6020_v4 }
 0x281   :  { %v3140_v28 = vadd.f32 %v3139_v22, %v3138_v37  ;;  %v3185_v26 = vmul.f32 %v6000_v24, %v4479_v3  ;;  %v3186_v45 = vmul.f32 %v6000_v24, %v4483_v5  ;;  %v3198_v40 = vadd.f32 %v6020_v4, %v3178_v61  ;;  %7791 = vst [vmem:[#allocation190_spill] sm:$0xff] %v6037_v14 }
 0x282   :  { %v3199_v7 = vadd.f32 %v6020_v4, %v3179_v59  ;;  %v3200_v48 = vadd.f32 %v6020_v4, %v3180_v31  ;;  %v3201_v8 = vadd.f32 %v6020_v4, %v3181_v12  ;;  %v3202_v37 = vadd.f32 %v6020_v4, %v3182_v20 }
 0x283   :  { %v3142_v22 = vadd.f32 %v3141_v47, %v3140_v28  ;;  %v3203_v0 = vadd.f32 %v6020_v4, %v3183_v27  ;;  %v3204_v6 = vadd.f32 %v6020_v4, %v3184_v15  ;;  %v6031_v52 = vadd.f32 %v6020_v4, %v3185_v26 }
 0x284   :  { %v3214_v61 = vmax.f32 %v3198_v40, 0.0  ;;  %v3215_v34 = vmax.f32 %v3199_v7, 0.0  ;;  %v3143_v59 = vsel %vm349_vm0, %v3123_v30, 0.0  ;;  %v6035_v31 = vsel %vm349_vm0, %v3124_v60, 0.0 }
 0x285   :  { %7789 = vst [vmem:[#allocation188_spill] sm:$0xff] %v6031_v52  ;;  %7790 = vst [vmem:[#allocation189_spill] sm:$0xff] %v6035_v31  ;;  %v3216_v12 = vmax.f32 %v3200_v48, 0.0  ;;  %v6039_v47 = vadd.f32 %v3143_v59, %v3142_v22  ;;  %v6043_v20 = vmul.f32 %v6000_v24, %v4608_v49  ;;  %v6046_v27 = vadd.f32 %v6020_v4, %v3186_v45 }
 0x286   :  { %v3217_v15 = vmax.f32 %v3201_v8, 0.0  ;;  %v3218_v28 = vmax.f32 %v3202_v37, 0.0  ;;  %v3219_v26 = vmax.f32 %v3203_v0, 0.0  ;;  %v3230_v30 = vsel %vm349_vm0, %v3214_v61, 0.0 }
 0x287   :  { %7792 = vst [vmem:[#allocation191_spill] sm:$0xff] %v6039_v47  ;;  %7793 = vst [vmem:[#allocation192_spill] sm:$0xff] %v6043_v20  ;;  %v3231_v60 = vsel %vm349_vm0, %v3215_v34, 0.0  ;;  %v3220_v40 = vmax.f32 %v3204_v6, 0.0  ;;  %v3233_v22 = vsel %vm349_vm0, %v3216_v12, 0.0  ;;  %v3274_v59 = vmul.f32 %v6037_v14, %v4449_v18 }
 0x288   :  { %7794 = vst [vmem:[#allocation193_spill] sm:$0xff] %v6046_v27  ;;  %v3232_v7 = vadd.f32 %v3231_v60, %v3230_v30  ;;  %v3275_v45 = vmul.f32 %v6037_v14, %v4453_v35  ;;  %v3276_v8 = vmul.f32 %v6037_v14, %v4457_v36  ;;  %v3277_v0 = vmul.f32 %v6037_v14, %v4461_v16 }
 0x289   :  { %v3278_v6 = vmul.f32 %v6037_v14, %v4467_v38  ;;  %v3279_v37 = vmul.f32 %v6037_v14, %v4471_v1  ;;  %v3280_v61 = vmul.f32 %v6037_v14, %v4475_v2  ;;  %v3235_v12 = vsel %vm349_vm0, %v3217_v15, 0.0 }
 0x28a   :  { %v3234_v34 = vadd.f32 %v3233_v22, %v3232_v7  ;;  %v3237_v30 = vsel %vm349_vm0, %v3218_v28, 0.0  ;;  %v3281_v60 = vmul.f32 %v6037_v14, %v4479_v3  ;;  %v6070_v48 = vstv %s3856_s4 }
 0x28b   :  { %7795 = vst [vmem:[#allocation194_spill] sm:$0xff] %v6070_v48  ;;  %v3294_v7 = vadd.f32 %v6070_v48, %v3274_v59  ;;  %v3295_v22 = vadd.f32 %v6070_v48, %v3275_v45  ;;  %v3296_v52 = vadd.f32 %v6070_v48, %v3276_v8  ;;  %v3282_v4 = vmul.f32 %v6037_v14, %v4483_v5 }
 0x28c   :  { %v3236_v11 = vadd.f32 %v3235_v12, %v3234_v34  ;;  %v3297_v20 = vadd.f32 %v6070_v48, %v3277_v0  ;;  %v3298_v15 = vadd.f32 %v6070_v48, %v3278_v6  ;;  %v3299_v28 = vadd.f32 %v6070_v48, %v3279_v37 }
 0x28d   :  { %v3300_v17 = vadd.f32 %v6070_v48, %v3280_v61  ;;  %v6082_v34 = vadd.f32 %v6070_v48, %v3281_v60  ;;  %v3310_v59 = vmax.f32 %v3294_v7, 0.0  ;;  %v3311_v12 = vmax.f32 %v3295_v22, 0.0 }
 0x28e   :  { %v3238_v24 = vadd.f32 %v3237_v30, %v3236_v11  ;;  %v3312_v45 = vmax.f32 %v3296_v52, 0.0  ;;  %v3313_v31 = vmax.f32 %v3297_v20, 0.0  ;;  %v3314_v8 = vmax.f32 %v3298_v15, 0.0 }
 0x28f   :  { %7796 = vst [vmem:[#allocation195_spill] sm:$0xff] %v6082_v34  ;;  %v3239_v33 = vsel %vm349_vm0, %v3219_v26, 0.0  ;;  %v6087_v0 = vsel %vm349_vm0, %v3220_v40, 0.0  ;;  %v6091_v11 = vmul.f32 %v6037_v14, %v4608_v49  ;;  %v6096_v37 = vadd.f32 %v6070_v48, %v3282_v4 }
 0x290   :  { %7797 = vst [vmem:[#allocation196_spill] sm:$0xff] %v6087_v0  ;;  %v6093_v6 = vadd.f32 %v3239_v33, %v3238_v24  ;;  %v3326_v52 = vsel %vm349_vm0, %v3310_v59, 0.0  ;;  %v3327_v20 = vsel %vm349_vm0, %v3311_v12, 0.0  ;;  %v3315_v61 = vmax.f32 %v3299_v28, 0.0 }
 0x291   :  { %7798 = vst [vmem:[#allocation197_spill] sm:$0xff] %v6091_v11  ;;  %v3316_v30 = vmax.f32 %v3300_v17, 0.0  ;;  %v3328_v40 = vadd.f32 %v3327_v20, %v3326_v52  ;;  %v3329_v60 = vsel %vm349_vm0, %v3312_v45, 0.0  ;;  %v3331_v7 = vsel %vm349_vm0, %v3313_v31, 0.0 }
 0x292   :  { %v3333_v22 = vsel %vm349_vm0, %v3314_v8, 0.0  ;;  %v6104_v33 = vstv %s3858_s15  ;;  %v6124_v20 = vstv %s3860_s0  ;;  %v6141_v0 = vstv %s3862_s16 }
 0x293   :  { %v3330_v24 = vadd.f32 %v3329_v60, %v3328_v40  ;;  %v3370_v4 = vmul.f32 %v6104_v33, %v4449_v18  ;;  %v3371_v15 = vmul.f32 %v6104_v33, %v4453_v35  ;;  %v3372_v17 = vmul.f32 %v6104_v33, %v4457_v36 }
 0x294   :  { %v3373_v28 = vmul.f32 %v6104_v33, %v4461_v16  ;;  %v3374_v31 = vmul.f32 %v6104_v33, %v4467_v38  ;;  %v3375_v59 = vmul.f32 %v6104_v33, %v4471_v1  ;;  %v3376_v12 = vmul.f32 %v6104_v33, %v4475_v2 }
 0x295   :  { %v3332_v45 = vadd.f32 %v3331_v7, %v3330_v24  ;;  %v3377_v8 = vmul.f32 %v6104_v33, %v4479_v3  ;;  %v3378_v52 = vmul.f32 %v6104_v33, %v4483_v5  ;;  %v3390_v40 = vadd.f32 %v6124_v20, %v3370_v4 }
 0x296   :  { %v3391_v60 = vadd.f32 %v6124_v20, %v3371_v15  ;;  %v3392_v26 = vadd.f32 %v6124_v20, %v3372_v17  ;;  %v3393_v47 = vadd.f32 %v6124_v20, %v3373_v28  ;;  %v3394_v24 = vadd.f32 %v6124_v20, %v3374_v31 }
 0x297   :  { %v3334_v7 = vadd.f32 %v3333_v22, %v3332_v45  ;;  %v3395_v48 = vadd.f32 %v6124_v20, %v3375_v59  ;;  %v3396_v11 = vadd.f32 %v6124_v20, %v3376_v12  ;;  %v6135_v14 = vadd.f32 %v6124_v20, %v3377_v8 }
 0x298   :  { %v3406_v4 = vmax.f32 %v3390_v40, 0.0  ;;  %v3407_v27 = vmax.f32 %v3391_v60, 0.0  ;;  %v3335_v15 = vsel %vm349_vm0, %v3315_v61, 0.0  ;;  %v6139_v17 = vsel %vm349_vm0, %v3316_v30, 0.0 }
 0x299   :  { %v3408_v28 = vmax.f32 %v3392_v26, 0.0  ;;  %v6143_v22 = vadd.f32 %v3335_v15, %v3334_v7  ;;  %v6147_v31 = vmul.f32 %v6104_v33, %v4608_v49  ;;  %v6150_v59 = vadd.f32 %v6124_v20, %v3378_v52 }
 0x29a   :  { %v3409_v12 = vmax.f32 %v3393_v47, 0.0  ;;  %v3410_v45 = vmax.f32 %v3394_v24, 0.0  ;;  %v3411_v8 = vmax.f32 %v3395_v48, 0.0  ;;  %v3422_v61 = vsel %vm349_vm0, %v3406_v4, 0.0 }
 0x29b   :  { %v3423_v30 = vsel %vm349_vm0, %v3407_v27, 0.0  ;;  %v3412_v40 = vmax.f32 %v3396_v11, 0.0  ;;  %v3425_v7 = vsel %vm349_vm0, %v3408_v28, 0.0  ;;  %v3466_v15 = vmul.f32 %v6141_v0, %v4449_v18 }
 0x29c   :  { %v3424_v60 = vadd.f32 %v3423_v30, %v3422_v61  ;;  %v3467_v52 = vmul.f32 %v6141_v0, %v4453_v35  ;;  %v3468_v47 = vmul.f32 %v6141_v0, %v4457_v36  ;;  %v3469_v48 = vmul.f32 %v6141_v0, %v4461_v16 }
 0x29d   :  { %v3470_v11 = vmul.f32 %v6141_v0, %v4467_v38  ;;  %v3471_v24 = vmul.f32 %v6141_v0, %v4471_v1  ;;  %v3472_v4 = vmul.f32 %v6141_v0, %v4475_v2  ;;  %v3427_v18 = vsel %vm349_vm0, %v3409_v12, 0.0 }
 0x29e   :  { %v3426_v27 = vadd.f32 %v3425_v7, %v3424_v60  ;;  %v3473_v35 = vmul.f32 %v6141_v0, %v4479_v3  ;;  %v3474_v36 = vmul.f32 %v6141_v0, %v4483_v5  ;;  %v6175_v28 = vstv %s3864_s17 }
 0x29f   :  { %v3486_v61 = vadd.f32 %v6175_v28, %v3466_v15  ;;  %v3487_v38 = vadd.f32 %v6175_v28, %v3467_v52  ;;  %v3488_v1 = vadd.f32 %v6175_v28, %v3468_v47  ;;  %v3429_v30 = vsel %vm349_vm0, %v3410_v45, 0.0 }
 0x2a0   :  { %v3428_v16 = vadd.f32 %v3427_v18, %v3426_v27  ;;  %v3475_v2 = vmul.f32 %v6141_v0, %v4608_v49  ;;  %v3489_v12 = vadd.f32 %v6175_v28, %v3469_v48  ;;  %v3490_v3 = vadd.f32 %v6175_v28, %v3470_v11 }
 0x2a1   :  { %v3491_v5 = vadd.f32 %v6175_v28, %v3471_v24  ;;  %v3492_v7 = vadd.f32 %v6175_v28, %v3472_v4  ;;  %v6188_v15 = vadd.f32 %v6175_v28, %v3473_v35  ;;  %v3502_v52 = vmax.f32 %v3486_v61, 0.0 }
 0x2a2   :  { %v3430_v60 = vadd.f32 %v3429_v30, %v3428_v16  ;;  %v3503_v27 = vmax.f32 %v3487_v38, 0.0  ;;  %v3504_v47 = vmax.f32 %v3488_v1, 0.0  ;;  %v3505_v18 = vmax.f32 %v3489_v12, 0.0 }
 0x2a3   :  { %7799 = vst [vmem:[#allocation198_spill] sm:$0xff] %v6188_v15  ;;  %v3431_v49 = vsel %vm349_vm0, %v3411_v8, 0.0  ;;  %v6193_v48 = vsel %vm349_vm0, %v3412_v40, 0.0  ;;  %v6196_v11 = vadd.f32 %v6175_v28, %v3474_v36  ;;  %v6201_v4 = vadd.f32 %v6175_v28, %v3475_v2 }
 0x2a4   :  { %v6198_v24 = vadd.f32 %v3431_v49, %v3430_v60  ;;  %v3518_v35 = vsel %vm349_vm0, %v3502_v52, 0.0  ;;  %v3519_v16 = vsel %vm349_vm0, %v3503_v27, 0.0  ;;  %v3506_v61 = vmax.f32 %v3490_v3, 0.0  ;;  %v7802_v27 = vld [vmem:[#allocation42_spill] sm:$0xff] }
 0x2a5   :  { %7800 = vst [vmem:[#allocation199_spill] sm:$0xff] %v6201_v4  ;;  %v3507_v38 = vmax.f32 %v3491_v5, 0.0  ;;  %v3508_v1 = vmax.f32 %v3492_v7, 0.0  ;;  %v3520_v30 = vadd.f32 %v3519_v16, %v3518_v35  ;;  %v3521_v40 = vsel %vm349_vm0, %v3504_v47, 0.0  ;;  %v7801_v5 = vld [vmem:[#allocation40_spill] sm:$0xff] }
 0x2a6   :  { %v3523_v36 = vsel %vm349_vm0, %v3505_v18, 0.0  ;;  %v7597_v60 = vmov 0.0   ;;  %v2036_v2 = vmul.f32 %v5370_v43, %v4650_v23  ;;  %v2037_v52 = vmul.f32 %v5370_v43, %v4655_v44 }
 0x2a7   :  { %v3522_v12 = vadd.f32 %v3521_v40, %v3520_v30  ;;  %3713 = vmatprep.subr.bf16.mxu1 %v7597_v60  ;;  %v2038_v3 = vmul.f32 %v5370_v43, %v4659_v19  ;;  %v2039_v7 = vmul.f32 %v5370_v43, %v7801_v5  ;;  %v2040_v47 = vmul.f32 %v5370_v43, %v7802_v27 }
 0x2a8   :  { %v2041_v18 = vmul.f32 %v5370_v43, %v4711_v46  ;;  %v2055_v49 = vadd.f32 %v5391_v62, %v5417_v58  ;;  %v2056_v16 = vadd.f32 %v5391_v62, %v2036_v2  ;;  %v2057_v30 = vadd.f32 %v5391_v62, %v2037_v52 }
 0x2a9   :  { %v3524_v35 = vadd.f32 %v3523_v36, %v3522_v12  ;;  %v2058_v40 = vadd.f32 %v5391_v62, %v2038_v3  ;;  %v3525_v60 = vsel %vm349_vm0, %v3506_v61, 0.0  ;;  %v2059_v8 = vadd.f32 %v5391_v62, %v2039_v7 }
 0x2aa   :  { %v2060_v45 = vadd.f32 %v5391_v62, %v2040_v47  ;;  %v2061_v26 = vadd.f32 %v5391_v62, %v2041_v18  ;;  %v2071_v43 = vmax.f32 %v2055_v49, 0.0  ;;  %v2072_v15 = vmax.f32 %v2056_v16, 0.0 }
 0x2ab   :  { %v3526_v34 = vadd.f32 %v3525_v60, %v3524_v35  ;;  %v2073_v4 = vmax.f32 %v2057_v30, 0.0  ;;  %v3510_v58 = vmax.f32 %v6196_v11, 0.0  ;;  %v3527_v36 = vsel %vm349_vm0, %v3507_v38, 0.0 }
 0x2ac   :  { %v6233_v12 = vsel %vm349_vm0, %v3508_v1, 0.0  ;;  %v2090_v61 = vadd.f32 %v5463_v41, %v5469_v63  ;;  %v2074_v2 = vmax.f32 %v2058_v40, 0.0  ;;  %v2075_v52 = vmax.f32 %v2059_v8, 0.0 }
 0x2ad   :  { %v2076_v3 = vmax.f32 %v2060_v45, 0.0  ;;  %v7803_v7 = vmax.f32 %v5404_v32, 0.0  ;;  %v6240_v60 = vadd.f32 %v3527_v36, %v3526_v34  ;;  %v2077_v47 = vmax.f32 %v2061_v26, 0.0 }
 0x2ae   :  { %v7804_v49 = vmax.f32 %v5420_v50, 0.0  ;;  %v2095_v1 = vsel %vm349_vm0, %v2071_v43, 0.0  ;;  %v2097_v35 = vsel %vm349_vm0, %v2072_v15, 0.0  ;;  %v2099_v41 = vsel %vm349_vm0, %v2073_v4, 0.0 }
 0x2af   :  { %v2091_v62 = vsel %vm349_vm0, %v7803_v7, 0.0  ;;  %v2132_v63 = vmul.f32 %v5422_v39, %v4650_v23  ;;  %v2133_v34 = vmul.f32 %v5422_v39, %v4655_v44  ;;  %v2134_v26 = vmul.f32 %v5422_v39, %v4659_v19 }
 0x2b0   :  { %v2092_v18 = vadd.f32 %v2091_v62, %v2090_v61  ;;  %v2093_v38 = vsel %vm349_vm0, %v7804_v49, 0.0  ;;  %v2135_v50 = vmul.f32 %v5422_v39, %v7801_v5  ;;  %v2136_v45 = vmul.f32 %v5422_v39, %v7802_v27 }
 0x2b1   :  { %v2137_v15 = vmul.f32 %v5422_v39, %v4711_v46  ;;  %v2151_v4 = vadd.f32 %v5446_v53, %v5467_v21  ;;  %v2152_v8 = vadd.f32 %v5446_v53, %v2132_v63  ;;  %v2153_v30 = vadd.f32 %v5446_v53, %v2133_v34 }
 0x2b2   :  { %v2094_v32 = vadd.f32 %v2093_v38, %v2092_v18  ;;  %v2154_v40 = vadd.f32 %v5446_v53, %v2134_v26  ;;  %v2155_v43 = vadd.f32 %v5446_v53, %v2135_v50  ;;  %v2101_v36 = vsel %vm349_vm0, %v2074_v2, 0.0 }
 0x2b3   :  { %v2156_v61 = vadd.f32 %v5446_v53, %v2136_v45  ;;  %v2157_v7 = vadd.f32 %v5446_v53, %v2137_v15  ;;  %v2167_v62 = vmax.f32 %v2151_v4, 0.0  ;;  %v2103_v18 = vsel %vm349_vm0, %v2075_v52, 0.0 }
 0x2b4   :  { %v2096_v16 = vadd.f32 %v2095_v1, %v2094_v32  ;;  %v2168_v21 = vmax.f32 %v2152_v8, 0.0  ;;  %v2169_v49 = vmax.f32 %v2153_v30, 0.0  ;;  %v2105_v38 = vsel %vm349_vm0, %v2076_v3, 0.0 }
 0x2b5   :  { %v2107_v1 = vsel %vm349_vm0, %v2077_v47, 0.0  ;;  %v2170_v63 = vmax.f32 %v2154_v40, 0.0  ;;  %v2186_v32 = vadd.f32 %v5515_v10, %v5519_v42  ;;  %v2171_v2 = vmax.f32 %v2155_v43, 0.0 }
 0x2b6   :  { %v2098_v39 = vadd.f32 %v2097_v35, %v2096_v16  ;;  %v2172_v26 = vmax.f32 %v2156_v61, 0.0  ;;  %v7805_v50 = vmax.f32 %v5458_v56, 0.0  ;;  %v2173_v35 = vmax.f32 %v2157_v7, 0.0 }
 0x2b7   :  { %v7806_v52 = vmax.f32 %v5472_v51, 0.0  ;;  %v2191_v3 = vsel %vm349_vm0, %v2167_v62, 0.0  ;;  %v2193_v4 = vsel %vm349_vm0, %v2168_v21, 0.0  ;;  %v2195_v10 = vsel %vm349_vm0, %v2169_v49, 0.0 }
 0x2b8   :  { %v2100_v34 = vadd.f32 %v2099_v41, %v2098_v39  ;;  %v2187_v53 = vsel %vm349_vm0, %v7805_v50, 0.0  ;;  %v2228_v42 = vmul.f32 %v5480_v54, %v4650_v23  ;;  %v2229_v56 = vmul.f32 %v5480_v54, %v4655_v44 }
 0x2b9   :  { %v2188_v45 = vadd.f32 %v2187_v53, %v2186_v32  ;;  %v2189_v15 = vsel %vm349_vm0, %v7806_v52, 0.0  ;;  %v2230_v8 = vmul.f32 %v5480_v54, %v4659_v19  ;;  %v2231_v51 = vmul.f32 %v5480_v54, %v7801_v5 }
 0x2ba   :  { %v2102_v47 = vadd.f32 %v2101_v36, %v2100_v34  ;;  %v2232_v30 = vmul.f32 %v5480_v54, %v7802_v27  ;;  %v2233_v40 = vmul.f32 %v5480_v54, %v4711_v46  ;;  %v2247_v43 = vadd.f32 %v5500_v57, %v5523_v25 }
 0x2bb   :  { %v2190_v41 = vadd.f32 %v2189_v15, %v2188_v45  ;;  %v2248_v61 = vadd.f32 %v5500_v57, %v2228_v42  ;;  %v2249_v7 = vadd.f32 %v5500_v57, %v2229_v56  ;;  %v2250_v62 = vadd.f32 %v5500_v57, %v2230_v8 }
 0x2bc   :  { %v2104_v16 = vadd.f32 %v2103_v18, %v2102_v47  ;;  %v2197_v21 = vsel %vm349_vm0, %v2170_v63, 0.0  ;;  %v2251_v18 = vadd.f32 %v5500_v57, %v2231_v51  ;;  %v2252_v49 = vadd.f32 %v5500_v57, %v2232_v30 }
 0x2bd   :  { %v2192_v36 = vadd.f32 %v2191_v3, %v2190_v41  ;;  %v2199_v54 = vsel %vm349_vm0, %v2171_v2, 0.0  ;;  %v2201_v34 = vsel %vm349_vm0, %v2172_v26, 0.0  ;;  %v2253_v25 = vadd.f32 %v5500_v57, %v2233_v40 }
 0x2be   :  { %v2106_v39 = vadd.f32 %v2105_v38, %v2104_v16  ;;  %v2263_v53 = vmax.f32 %v2247_v43, 0.0  ;;  %v2264_v45 = vmax.f32 %v2248_v61, 0.0  ;;  %v2265_v52 = vmax.f32 %v2249_v7, 0.0 }
 0x2bf   :  { %v2194_v32 = vadd.f32 %v2193_v4, %v2192_v36  ;;  %v2203_v38 = vsel %vm349_vm0, %v2173_v35, 0.0  ;;  %v2266_v3 = vmax.f32 %v2250_v62, 0.0  ;;  %v2282_v63 = vadd.f32 %v5567_v9, %v5573_v13 }
 0x2c0   :  { %v2108_v50 = vadd.f32 %v2107_v1, %v2106_v39  ;;  %v2267_v42 = vmax.f32 %v2251_v18, 0.0  ;;  %v2268_v4 = vmax.f32 %v2252_v49, 0.0  ;;  %v7807_v2 = vmax.f32 %v5511_v29, 0.0  ;;  %v7809_v29 = vld [vmem:[#allocation125_spill] sm:$0xff]  ;;  %v7810_v49 = vld [vmem:[#allocation128_spill] sm:$0xff] }
 0x2c1   :  { %v2196_v15 = vadd.f32 %v2195_v10, %v2194_v32  ;;  %v2269_v1 = vmax.f32 %v2253_v25, 0.0  ;;  %v7808_v56 = vmax.f32 %v5526_v55, 0.0  ;;  %v2287_v8 = vsel %vm349_vm0, %v2263_v53, 0.0  ;;  %v7811_v32 = vld [vmem:[#allocation126_spill] sm:$0xff] }
 0x2c2   :  { %v2109_v47 = vrot.slane %v2108_v50, 4  ;;  %v2283_v26 = vsel %vm349_vm0, %v7807_v2, 0.0  ;;  %v2289_v9 = vsel %vm349_vm0, %v2264_v45, 0.0  ;;  %v2291_v13 = vsel %vm349_vm0, %v2265_v52, 0.0 }
 0x2c3   :  { %v2198_v57 = vadd.f32 %v2197_v21, %v2196_v15  ;;  %v2284_v41 = vadd.f32 %v2283_v26, %v2282_v63  ;;  %v2285_v10 = vsel %vm349_vm0, %v7808_v56, 0.0  ;;  %v2324_v30 = vmul.f32 %v7809_v29, %v4650_v23 }
 0x2c4   :  { %v2110_v35 = vadd.f32 %v2109_v47, %v2108_v50  ;;  %v2325_v40 = vmul.f32 %v7809_v29, %v4655_v44  ;;  %v2326_v55 = vmul.f32 %v7809_v29, %v4659_v19  ;;  %v2327_v36 = vmul.f32 %v7809_v29, %v7801_v5 }
 0x2c5   :  { %v2200_v51 = vadd.f32 %v2199_v54, %v2198_v57  ;;  %v2286_v16 = vadd.f32 %v2285_v10, %v2284_v41  ;;  %v2328_v61 = vmul.f32 %v7809_v29, %v7802_v27  ;;  %v2293_v39 = vsel %vm349_vm0, %v2266_v3, 0.0 }
 0x2c6   :  { %v2111_v43 = vrot.slane %v2110_v35, 2  ;;  %v2329_v21 = vmul.f32 %v7809_v29, %v4711_v46  ;;  %v2343_v54 = vadd.f32 %v7811_v32, %v7810_v49  ;;  %v2344_v25 = vadd.f32 %v7811_v32, %v2324_v30 }
 0x2c7   :  { %v2202_v7 = vadd.f32 %v2201_v34, %v2200_v51  ;;  %v2288_v62 = vadd.f32 %v2287_v8, %v2286_v16  ;;  %v2345_v50 = vadd.f32 %v7811_v32, %v2325_v40  ;;  %v2295_v52 = vsel %vm349_vm0, %v2267_v42, 0.0  ;;  %v7812_v51 = vld [vmem:[#allocation135_spill] sm:$0xff]  ;;  %v7813_v16 = vld [vmem:[#allocation133_spill] sm:$0xff] }
 0x2c8   :  { %v2112_v18 = vadd.f32 %v2111_v43, %v2110_v35  ;;  %v2346_v34 = vadd.f32 %v7811_v32, %v2326_v55  ;;  %v2347_v3 = vadd.f32 %v7811_v32, %v2327_v36  ;;  %v2348_v63 = vadd.f32 %v7811_v32, %v2328_v61 }
 0x2c9   :  { %v2204_v53 = vadd.f32 %v2203_v38, %v2202_v7  ;;  %v2290_v45 = vadd.f32 %v2289_v9, %v2288_v62  ;;  %v2349_v47 = vadd.f32 %v7811_v32, %v2329_v21  ;;  %v2297_v57 = vsel %vm349_vm0, %v2268_v4, 0.0  ;;  %v7816_v7 = vld [vmem:[#allocation129_spill] sm:$0xff]  ;;  %v7818_v32 = vld [vmem:[#allocation130_spill] sm:$0xff] }
 0x2ca   :  { %v2113_v15 = vrot.slane %v2112_v18, 1  ;;  %v2299_v41 = vsel %vm349_vm0, %v2269_v1, 0.0  ;;  %v2359_v38 = vmax.f32 %v2343_v54, 0.0  ;;  %v2360_v10 = vmax.f32 %v2344_v25, 0.0 }
 0x2cb   :  { %v2205_v2 = vrot.slane %v2204_v53, 4  ;;  %v2292_v26 = vadd.f32 %v2291_v13, %v2290_v45  ;;  %v2361_v35 = vmax.f32 %v2345_v50, 0.0  ;;  %v2362_v9 = vmax.f32 %v2346_v34, 0.0  ;;  %v7814_v13 = vld [vmem:[#allocation127_spill] sm:$0xff] }
 0x2cc   :  { %v2114_v56 = vadd.f32 %v2113_v15, %v2112_v18  ;;  %v2378_v29 = vadd.f32 %v7813_v16, %v7812_v51  ;;  %v2363_v30 = vmax.f32 %v2347_v3, 0.0  ;;  %v2364_v40 = vmax.f32 %v2348_v63, 0.0 }
 0x2cd   :  { %v2206_v42 = vadd.f32 %v2205_v2, %v2204_v53  ;;  %v2294_v8 = vadd.f32 %v2293_v39, %v2292_v26  ;;  %v2365_v43 = vmax.f32 %v2349_v47, 0.0  ;;  %v7815_v55 = vmax.f32 %v7814_v13, 0.0  ;;  %v7819_v26 = vld [vmem:[#allocation136_spill] sm:$0xff] }
 0x2ce   :  { %2115 = vst.msk [vmem:[#allocation2 + $0x10] sm:$0x1] %vm578_vm3, %v2114_v56  ;;  %v7817_v62 = vmax.f32 %v7816_v7, 0.0  ;;  %v2383_v21 = vsel %vm349_vm0, %v2359_v38, 0.0  ;;  %v2385_v18 = vsel %vm349_vm0, %v2360_v10, 0.0  ;;  %v2387_v49 = vsel %vm349_vm0, %v2361_v35, 0.0 }
 0x2cf   :  { %v2379_v4 = vsel %vm349_vm0, %v7815_v55, 0.0  ;;  %v2207_v1 = vrot.slane %v2206_v42, 2  ;;  %v2296_v36 = vadd.f32 %v2295_v52, %v2294_v8  ;;  %v2420_v54 = vmul.f32 %v7818_v32, %v4650_v23 }
 0x2d0   :  { %v2380_v61 = vadd.f32 %v2379_v4, %v2378_v29  ;;  %v2381_v39 = vsel %vm349_vm0, %v7817_v62, 0.0  ;;  %v2421_v45 = vmul.f32 %v7818_v32, %v4655_v44  ;;  %v2422_v52 = vmul.f32 %v7818_v32, %v4659_v19 }
 0x2d1   :  { %v2208_v25 = vadd.f32 %v2207_v1, %v2206_v42  ;;  %v2298_v50 = vadd.f32 %v2297_v57, %v2296_v36  ;;  %v2423_v34 = vmul.f32 %v7818_v32, %v7801_v5  ;;  %v2424_v15 = vmul.f32 %v7818_v32, %v7802_v27  ;;  %v7820_v57 = vld [vmem:[#allocation131_spill] sm:$0xff] }
 0x2d2   :  { %v2382_v53 = vadd.f32 %v2381_v39, %v2380_v61  ;;  %v2425_v3 = vmul.f32 %v7818_v32, %v4711_v46  ;;  %v2439_v56 = vadd.f32 %v7820_v57, %v7819_v26  ;;  %v2389_v38 = vsel %vm349_vm0, %v2362_v9, 0.0 }
 0x2d3   :  { %v2209_v63 = vrot.slane %v2208_v25, 1  ;;  %v2300_v47 = vadd.f32 %v2299_v41, %v2298_v50  ;;  %v2440_v10 = vadd.f32 %v7820_v57, %v2420_v54  ;;  %v2441_v35 = vadd.f32 %v7820_v57, %v2421_v45 }
 0x2d4   :  { %v2384_v2 = vadd.f32 %v2383_v21, %v2382_v53  ;;  %v2442_v42 = vadd.f32 %v7820_v57, %v2422_v52  ;;  %v2443_v29 = vadd.f32 %v7820_v57, %v2423_v34  ;;  %v2391_v13 = vsel %vm349_vm0, %v2363_v30, 0.0  ;;  %v7821_v21 = vld [vmem:[#allocation142_spill] sm:$0xff] }
 0x2d5   :  { %v2210_v8 = vadd.f32 %v2209_v63, %v2208_v25  ;;  %v2301_v51 = vrot.slane %v2300_v47, 4  ;;  %v2393_v41 = vsel %vm349_vm0, %v2364_v40, 0.0  ;;  %v2444_v55 = vadd.f32 %v7820_v57, %v2424_v15  ;;  %v7823_v25 = vld [vmem:[#allocation132_spill] sm:$0xff] }
 0x2d6   :  { %v2386_v16 = vadd.f32 %v2385_v18, %v2384_v2  ;;  %v2445_v4 = vadd.f32 %v7820_v57, %v2425_v3  ;;  %v2455_v36 = vmax.f32 %v2439_v56, 0.0  ;;  %v2456_v61 = vmax.f32 %v2440_v10, 0.0  ;;  %v7822_v18 = vld [vmem:[#allocation140_spill] sm:$0xff]  ;;  %v7827_v56 = vld [vmem:[#allocation134_spill] sm:$0xff] }
 0x2d7   :  { %2211 = vst.msk [vmem:[#allocation2 + $0x11] sm:$0x1] %vm578_vm3, %v2210_v8  ;;  %v2302_v9 = vadd.f32 %v2301_v51, %v2300_v47  ;;  %v2395_v7 = vsel %vm349_vm0, %v2365_v43, 0.0  ;;  %v2457_v62 = vmax.f32 %v2441_v35, 0.0  ;;  %v2458_v39 = vmax.f32 %v2442_v42, 0.0 }
 0x2d8   :  { %v2388_v1 = vadd.f32 %v2387_v49, %v2386_v16  ;;  %v2474_v32 = vadd.f32 %v7822_v18, %v7821_v21  ;;  %v2459_v40 = vmax.f32 %v2443_v29, 0.0  ;;  %v7824_v50 = vmax.f32 %v7823_v25, 0.0  ;;  %v7825_v49 = vld [vmem:[#allocation137_spill] sm:$0xff] }
 0x2d9   :  { %v2303_v30 = vrot.slane %v2302_v9, 2  ;;  %v2460_v45 = vmax.f32 %v2444_v55, 0.0  ;;  %v2461_v52 = vmax.f32 %v2445_v4, 0.0  ;;  %v7826_v15 = vmax.f32 %v7825_v49, 0.0  ;;  %v7828_v55 = vld [vmem:[#allocation141_spill] sm:$0xff]  ;;  %v7829_v4 = vld [vmem:[#allocation138_spill] sm:$0xff] }
 0x2da   :  { %v2390_v54 = vadd.f32 %v2389_v38, %v2388_v1  ;;  %v2475_v53 = vsel %vm349_vm0, %v7824_v50, 0.0  ;;  %v2479_v47 = vsel %vm349_vm0, %v2455_v36, 0.0  ;;  %v2481_v2 = vsel %vm349_vm0, %v2456_v61, 0.0 }
 0x2db   :  { %v2476_v34 = vadd.f32 %v2475_v53, %v2474_v32  ;;  %v2477_v3 = vsel %vm349_vm0, %v7826_v15, 0.0  ;;  %v2304_v43 = vadd.f32 %v2303_v30, %v2302_v9  ;;  %v2483_v57 = vsel %vm349_vm0, %v2457_v62, 0.0 }
 0x2dc   :  { %v2392_v63 = vadd.f32 %v2391_v13, %v2390_v54  ;;  %v2516_v38 = vmul.f32 %v7827_v56, %v4650_v23  ;;  %v2517_v10 = vmul.f32 %v7827_v56, %v4655_v44  ;;  %v2518_v8 = vmul.f32 %v7827_v56, %v4659_v19 }
 0x2dd   :  { %v2478_v26 = vadd.f32 %v2477_v3, %v2476_v34  ;;  %v2305_v35 = vrot.slane %v2304_v43, 1  ;;  %v2519_v51 = vmul.f32 %v7827_v56, %v7801_v5  ;;  %v2520_v29 = vmul.f32 %v7827_v56, %v7802_v27 }
 0x2de   :  { %v2394_v42 = vadd.f32 %v2393_v41, %v2392_v63  ;;  %v2521_v13 = vmul.f32 %v7827_v56, %v4711_v46  ;;  %v2535_v9 = vadd.f32 %v7829_v4, %v7828_v55  ;;  %v2536_v41 = vadd.f32 %v7829_v4, %v2516_v38  ;;  %v7831_v63 = vld [vmem:[#allocation147_spill] sm:$0xff] }
 0x2df   :  { %v2480_v16 = vadd.f32 %v2479_v47, %v2478_v26  ;;  %v2306_v1 = vadd.f32 %v2305_v35, %v2304_v43  ;;  %v2537_v61 = vadd.f32 %v7829_v4, %v2517_v10  ;;  %v2485_v21 = vsel %vm349_vm0, %v2458_v39, 0.0  ;;  %v7830_v43 = vld [vmem:[#allocation149_spill] sm:$0xff] }
 0x2e0   :  { %v2396_v36 = vadd.f32 %v2395_v7, %v2394_v42  ;;  %v2538_v18 = vadd.f32 %v7829_v4, %v2518_v8  ;;  %v2539_v32 = vadd.f32 %v7829_v4, %v2519_v51  ;;  %v2487_v54 = vsel %vm349_vm0, %v2459_v40, 0.0  ;;  %v7832_v40 = vld [vmem:[#allocation139_spill] sm:$0xff] }
 0x2e1   :  { %v2482_v62 = vadd.f32 %v2481_v2, %v2480_v16  ;;  %2307 = vst.msk [vmem:[#allocation2 + $0x12] sm:$0x1] %vm578_vm3, %v2306_v1  ;;  %v2540_v25 = vadd.f32 %v7829_v4, %v2520_v29  ;;  %v2541_v7 = vadd.f32 %v7829_v4, %v2521_v13  ;;  %v2489_v53 = vsel %vm349_vm0, %v2460_v45, 0.0  ;;  %v7834_v51 = vld [vmem:[#allocation143_spill] sm:$0xff]  ;;  %v7836_v1 = vld [vmem:[#allocation144_spill] sm:$0xff] }
 0x2e2   :  { %v2397_v30 = vrot.slane %v2396_v36, 4  ;;  %v2551_v34 = vmax.f32 %v2535_v9, 0.0  ;;  %v2552_v49 = vmax.f32 %v2536_v41, 0.0  ;;  %v2491_v39 = vsel %vm349_vm0, %v2461_v52, 0.0 }
 0x2e3   :  { %v2484_v50 = vadd.f32 %v2483_v57, %v2482_v62  ;;  %v2553_v3 = vmax.f32 %v2537_v61, 0.0  ;;  %v2570_v47 = vadd.f32 %v7831_v63, %v7830_v43  ;;  %v2554_v26 = vmax.f32 %v2538_v18, 0.0 }
 0x2e4   :  { %v2398_v15 = vadd.f32 %v2397_v30, %v2396_v36  ;;  %v2555_v56 = vmax.f32 %v2539_v32, 0.0  ;;  %v7833_v38 = vmax.f32 %v7832_v40, 0.0  ;;  %v2556_v57 = vmax.f32 %v2540_v25, 0.0 }
 0x2e5   :  { %v2486_v2 = vadd.f32 %v2485_v21, %v2484_v50  ;;  %v2557_v42 = vmax.f32 %v2541_v7, 0.0  ;;  %v7835_v16 = vmax.f32 %v7834_v51, 0.0  ;;  %v2575_v29 = vsel %vm349_vm0, %v2551_v34, 0.0  ;;  %v7837_v7 = vld [vmem:[#allocation150_spill] sm:$0xff]  ;;  %v7838_v50 = vld [vmem:[#allocation145_spill] sm:$0xff] }
 0x2e6   :  { %v2571_v10 = vsel %vm349_vm0, %v7833_v38, 0.0  ;;  %v2399_v35 = vrot.slane %v2398_v15, 2  ;;  %v2577_v13 = vsel %vm349_vm0, %v2552_v49, 0.0  ;;  %v2579_v9 = vsel %vm349_vm0, %v2553_v3, 0.0 }
 0x2e7   :  { %v2572_v45 = vadd.f32 %v2571_v10, %v2570_v47  ;;  %v2488_v8 = vadd.f32 %v2487_v54, %v2486_v2  ;;  %v2573_v52 = vsel %vm349_vm0, %v7835_v16, 0.0  ;;  %v2612_v36 = vmul.f32 %v7836_v1, %v4650_v23 }
 0x2e8   :  { %v2400_v55 = vadd.f32 %v2399_v35, %v2398_v15  ;;  %v2613_v61 = vmul.f32 %v7836_v1, %v4655_v44  ;;  %v2614_v62 = vmul.f32 %v7836_v1, %v4659_v19  ;;  %v2615_v21 = vmul.f32 %v7836_v1, %v7801_v5 }
 0x2e9   :  { %v2574_v4 = vadd.f32 %v2573_v52, %v2572_v45  ;;  %v2490_v41 = vadd.f32 %v2489_v53, %v2488_v8  ;;  %v2616_v30 = vmul.f32 %v7836_v1, %v7802_v27  ;;  %v2617_v54 = vmul.f32 %v7836_v1, %v4711_v46 }
 0x2ea   :  { %v2401_v18 = vrot.slane %v2400_v55, 1  ;;  %v2631_v53 = vadd.f32 %v7838_v50, %v7837_v7  ;;  %v2632_v34 = vadd.f32 %v7838_v50, %v2612_v36  ;;  %v2633_v49 = vadd.f32 %v7838_v50, %v2613_v61 }
 0x2eb   :  { %v2576_v32 = vadd.f32 %v2575_v29, %v2574_v4  ;;  %v2492_v25 = vadd.f32 %v2491_v39, %v2490_v41  ;;  %v2634_v43 = vadd.f32 %v7838_v50, %v2614_v62  ;;  %v2635_v63 = vadd.f32 %v7838_v50, %v2615_v21  ;;  %v7840_v4 = vld [vmem:[#allocation154_spill] sm:$0xff] }
 0x2ec   :  { %v2402_v15 = vadd.f32 %v2401_v18, %v2400_v55  ;;  %v2581_v2 = vsel %vm349_vm0, %v2554_v26, 0.0  ;;  %v2636_v40 = vadd.f32 %v7838_v50, %v2616_v30  ;;  %v2637_v39 = vadd.f32 %v7838_v50, %v2617_v54  ;;  %v7839_v55 = vld [vmem:[#allocation156_spill] sm:$0xff]  ;;  %v7843_v18 = vld [vmem:[#allocation151_spill] sm:$0xff] }
 0x2ed   :  { %v2578_v3 = vadd.f32 %v2577_v13, %v2576_v32  ;;  %v2493_v47 = vrot.slane %v2492_v25, 4  ;;  %v2583_v10 = vsel %vm349_vm0, %v2555_v56, 0.0  ;;  %v2585_v35 = vsel %vm349_vm0, %v2556_v57, 0.0  ;;  %v7845_v50 = vld [vmem:[#allocation148_spill] sm:$0xff] }
 0x2ee   :  { %2403 = vst.msk [vmem:[#allocation2 + $0x13] sm:$0x1] %vm578_vm3, %v2402_v15  ;;  %v2647_v45 = vmax.f32 %v2631_v53, 0.0  ;;  %v2587_v51 = vsel %vm349_vm0, %v2557_v42, 0.0  ;;  %v2648_v16 = vmax.f32 %v2632_v34, 0.0  ;;  %v2649_v52 = vmax.f32 %v2633_v49, 0.0 }
 0x2ef   :  { %v2580_v38 = vadd.f32 %v2579_v9, %v2578_v3  ;;  %v2494_v8 = vadd.f32 %v2493_v47, %v2492_v25  ;;  %v2650_v13 = vmax.f32 %v2634_v43, 0.0  ;;  %v2651_v26 = vmax.f32 %v2635_v63, 0.0  ;;  %v7841_v9 = vld [vmem:[#allocation146_spill] sm:$0xff] }
 0x2f0   :  { %v2666_v1 = vadd.f32 %v7840_v4, %v7839_v55  ;;  %v2652_v41 = vmax.f32 %v2636_v40, 0.0  ;;  %v2653_v61 = vmax.f32 %v2637_v39, 0.0  ;;  %v7842_v62 = vmax.f32 %v7841_v9, 0.0 }
 0x2f1   :  { %v2582_v29 = vadd.f32 %v2581_v2, %v2580_v38  ;;  %v2495_v36 = vrot.slane %v2494_v8, 2  ;;  %v7844_v32 = vmax.f32 %v7843_v18, 0.0  ;;  %v2671_v30 = vsel %vm349_vm0, %v2647_v45, 0.0  ;;  %v7846_v38 = vld [vmem:[#allocation155_spill] sm:$0xff] }
 0x2f2   :  { %v2667_v56 = vsel %vm349_vm0, %v7842_v62, 0.0  ;;  %v2673_v25 = vsel %vm349_vm0, %v2648_v16, 0.0  ;;  %v2675_v7 = vsel %vm349_vm0, %v2649_v52, 0.0  ;;  %v2708_v53 = vmul.f32 %v7845_v50, %v4650_v23 }
 0x2f3   :  { %v2584_v57 = vadd.f32 %v2583_v10, %v2582_v29  ;;  %v2668_v21 = vadd.f32 %v2667_v56, %v2666_v1  ;;  %v2669_v42 = vsel %vm349_vm0, %v7844_v32, 0.0  ;;  %v2496_v54 = vadd.f32 %v2495_v36, %v2494_v8  ;;  %v7847_v10 = vld [vmem:[#allocation152_spill] sm:$0xff] }
 0x2f4   :  { %v2709_v15 = vmul.f32 %v7845_v50, %v4655_v44  ;;  %v2710_v3 = vmul.f32 %v7845_v50, %v4659_v19  ;;  %v2711_v63 = vmul.f32 %v7845_v50, %v7801_v5  ;;  %v2712_v47 = vmul.f32 %v7845_v50, %v7802_v27 }
 0x2f5   :  { %v2586_v34 = vadd.f32 %v2585_v35, %v2584_v57  ;;  %v2670_v49 = vadd.f32 %v2669_v42, %v2668_v21  ;;  %v2497_v43 = vrot.slane %v2496_v54, 1  ;;  %v2713_v2 = vmul.f32 %v7845_v50, %v4711_v46 }
 0x2f6   :  { %v2727_v35 = vadd.f32 %v7847_v10, %v7846_v38  ;;  %v2728_v45 = vadd.f32 %v7847_v10, %v2708_v53  ;;  %v2729_v16 = vadd.f32 %v7847_v10, %v2709_v15  ;;  %v2730_v52 = vadd.f32 %v7847_v10, %v2710_v3 }
 0x2f7   :  { %v2588_v40 = vadd.f32 %v2587_v51, %v2586_v34  ;;  %v2672_v39 = vadd.f32 %v2671_v30, %v2670_v49  ;;  %v2498_v8 = vadd.f32 %v2497_v43, %v2496_v54  ;;  %v2731_v29 = vadd.f32 %v7847_v10, %v2711_v63  ;;  %v7852_v63 = vld [vmem:[#allocation157_spill] sm:$0xff] }
 0x2f8   :  { %v2677_v1 = vsel %vm349_vm0, %v2650_v13, 0.0  ;;  %v2732_v36 = vadd.f32 %v7847_v10, %v2712_v47  ;;  %v2679_v51 = vsel %vm349_vm0, %v2651_v26, 0.0  ;;  %v2681_v9 = vsel %vm349_vm0, %v2652_v41, 0.0  ;;  %v7848_v13 = vld [vmem:[#allocation163_spill] sm:$0xff]  ;;  %v7850_v26 = vld [vmem:[#allocation153_spill] sm:$0xff] }
 0x2f9   :  { %v2589_v55 = vrot.slane %v2588_v40, 4  ;;  %v2674_v4 = vadd.f32 %v2673_v25, %v2672_v39  ;;  %2499 = vst.msk [vmem:[#allocation2 + $0x14] sm:$0x1] %vm578_vm3, %v2498_v8  ;;  %v2733_v62 = vadd.f32 %v7847_v10, %v2713_v2  ;;  %v2743_v56 = vmax.f32 %v2727_v35, 0.0  ;;  %v7849_v25 = vld [vmem:[#allocation161_spill] sm:$0xff]  ;;  %v7854_v35 = vld [vmem:[#allocation158_spill] sm:$0xff] }
 0x2fa   :  { %v2744_v18 = vmax.f32 %v2728_v45, 0.0  ;;  %v2745_v32 = vmax.f32 %v2729_v16, 0.0  ;;  %v2683_v42 = vsel %vm349_vm0, %v2653_v61, 0.0  ;;  %v2746_v30 = vmax.f32 %v2730_v52, 0.0 }
 0x2fb   :  { %v2590_v57 = vadd.f32 %v2589_v55, %v2588_v40  ;;  %v2676_v21 = vadd.f32 %v2675_v7, %v2674_v4  ;;  %v2747_v54 = vmax.f32 %v2731_v29, 0.0  ;;  %v2762_v50 = vadd.f32 %v7849_v25, %v7848_v13 }
 0x2fc   :  { %v2748_v49 = vmax.f32 %v2732_v36, 0.0  ;;  %v7851_v15 = vmax.f32 %v7850_v26, 0.0  ;;  %v2749_v3 = vmax.f32 %v2733_v62, 0.0  ;;  %v7853_v7 = vmax.f32 %v7852_v63, 0.0  ;;  %v7856_v62 = vld [vmem:[#allocation159_spill] sm:$0xff] }
 0x2fd   :  { %v2591_v53 = vrot.slane %v2590_v57, 2  ;;  %v2678_v34 = vadd.f32 %v2677_v1, %v2676_v21  ;;  %v2767_v61 = vsel %vm349_vm0, %v2743_v56, 0.0  ;;  %v2769_v39 = vsel %vm349_vm0, %v2744_v18, 0.0 }
 0x2fe   :  { %v2763_v41 = vsel %vm349_vm0, %v7851_v15, 0.0  ;;  %v2765_v47 = vsel %vm349_vm0, %v7853_v7, 0.0  ;;  %v2771_v38 = vsel %vm349_vm0, %v2745_v32, 0.0  ;;  %v2804_v45 = vmul.f32 %v7854_v35, %v4650_v23 }
 0x2ff   :  { %v2764_v43 = vadd.f32 %v2763_v41, %v2762_v50  ;;  %v2592_v2 = vadd.f32 %v2591_v53, %v2590_v57  ;;  %v2680_v40 = vadd.f32 %v2679_v51, %v2678_v34  ;;  %v2805_v8 = vmul.f32 %v7854_v35, %v4655_v44  ;;  %v7855_v51 = vld [vmem:[#allocation164_spill] sm:$0xff] }
 0x300   :  { %v2806_v16 = vmul.f32 %v7854_v35, %v4659_v19  ;;  %v2807_v55 = vmul.f32 %v7854_v35, %v7801_v5  ;;  %v2808_v4 = vmul.f32 %v7854_v35, %v7802_v27  ;;  %v2809_v36 = vmul.f32 %v7854_v35, %v4711_v46 }
 0x301   :  { %v2766_v10 = vadd.f32 %v2765_v47, %v2764_v43  ;;  %v2593_v52 = vrot.slane %v2592_v2, 1  ;;  %v2682_v29 = vadd.f32 %v2681_v9, %v2680_v40  ;;  %v2823_v56 = vadd.f32 %v7856_v62, %v7855_v51  ;;  %v7858_v40 = vld [vmem:[#allocation168_spill] sm:$0xff] }
 0x302   :  { %v2824_v57 = vadd.f32 %v7856_v62, %v2804_v45  ;;  %v2825_v32 = vadd.f32 %v7856_v62, %v2805_v8  ;;  %v2826_v9 = vadd.f32 %v7856_v62, %v2806_v16  ;;  %v2773_v25 = vsel %vm349_vm0, %v2746_v30, 0.0  ;;  %v7859_v8 = vld [vmem:[#allocation160_spill] sm:$0xff] }
 0x303   :  { %v2768_v1 = vadd.f32 %v2767_v61, %v2766_v10  ;;  %v2594_v21 = vadd.f32 %v2593_v52, %v2592_v2  ;;  %v2684_v18 = vadd.f32 %v2683_v42, %v2682_v29  ;;  %v2827_v50 = vadd.f32 %v7856_v62, %v2807_v55  ;;  %v7857_v2 = vld [vmem:[#allocation170_spill] sm:$0xff]  ;;  %v7861_v29 = vld [vmem:[#allocation165_spill] sm:$0xff] }
 0x304   :  { %v2828_v53 = vadd.f32 %v7856_v62, %v2808_v4  ;;  %v2775_v26 = vsel %vm349_vm0, %v2747_v54, 0.0  ;;  %v2777_v15 = vsel %vm349_vm0, %v2748_v49, 0.0  ;;  %v2829_v42 = vadd.f32 %v7856_v62, %v2809_v36 }
 0x305   :  { %v2770_v13 = vadd.f32 %v2769_v39, %v2768_v1  ;;  %2595 = vst.msk [vmem:[#allocation2 + $0x15] sm:$0x1] %vm578_vm3, %v2594_v21  ;;  %v2685_v34 = vrot.slane %v2684_v18, 4  ;;  %v2839_v43 = vmax.f32 %v2823_v56, 0.0  ;;  %v2840_v63 = vmax.f32 %v2824_v57, 0.0  ;;  %v7863_v57 = vld [vmem:[#allocation162_spill] sm:$0xff] }
 0x306   :  { %v2841_v7 = vmax.f32 %v2825_v32, 0.0  ;;  %v2779_v30 = vsel %vm349_vm0, %v2749_v3, 0.0  ;;  %v2842_v61 = vmax.f32 %v2826_v9, 0.0  ;;  %v2858_v39 = vadd.f32 %v7858_v40, %v7857_v2 }
 0x307   :  { %v2772_v41 = vadd.f32 %v2771_v38, %v2770_v13  ;;  %v2686_v47 = vadd.f32 %v2685_v34, %v2684_v18  ;;  %v2843_v35 = vmax.f32 %v2827_v50, 0.0  ;;  %v2844_v45 = vmax.f32 %v2828_v53, 0.0 }
 0x308   :  { %v7860_v54 = vmax.f32 %v7859_v8, 0.0  ;;  %v2845_v52 = vmax.f32 %v2829_v42, 0.0  ;;  %v7862_v55 = vmax.f32 %v7861_v29, 0.0  ;;  %v2863_v3 = vsel %vm349_vm0, %v2839_v43, 0.0  ;;  %v7865_v42 = vld [vmem:[#allocation166_spill] sm:$0xff] }
 0x309   :  { %v2774_v10 = vadd.f32 %v2773_v25, %v2772_v41  ;;  %v2687_v16 = vrot.slane %v2686_v47, 2  ;;  %v2865_v36 = vsel %vm349_vm0, %v2840_v63, 0.0  ;;  %v2867_v51 = vsel %vm349_vm0, %v2841_v7, 0.0 }
 0x30a   :  { %v2859_v49 = vsel %vm349_vm0, %v7860_v54, 0.0  ;;  %v2861_v4 = vsel %vm349_vm0, %v7862_v55, 0.0  ;;  %v2900_v21 = vmul.f32 %v7863_v57, %v4650_v23  ;;  %v2901_v18 = vmul.f32 %v7863_v57, %v4655_v44 }
 0x30b   :  { %v2860_v38 = vadd.f32 %v2859_v49, %v2858_v39  ;;  %v2776_v1 = vadd.f32 %v2775_v26, %v2774_v10  ;;  %v2688_v62 = vadd.f32 %v2687_v16, %v2686_v47  ;;  %v2902_v9 = vmul.f32 %v7863_v57, %v4659_v19  ;;  %v7864_v26 = vld [vmem:[#allocation169_spill] sm:$0xff] }
 0x30c   :  { %v2903_v13 = vmul.f32 %v7863_v57, %v7801_v5  ;;  %v2904_v25 = vmul.f32 %v7863_v57, %v7802_v27  ;;  %v2905_v34 = vmul.f32 %v7863_v57, %v4711_v46  ;;  %v2919_v41 = vadd.f32 %v7865_v42, %v7864_v26  ;;  %v7868_v57 = vld [vmem:[#allocation167_spill] sm:$0xff] }
 0x30d   :  { %v2862_v56 = vadd.f32 %v2861_v4, %v2860_v38  ;;  %v2778_v32 = vadd.f32 %v2777_v15, %v2776_v1  ;;  %v2689_v50 = vrot.slane %v2688_v62, 1  ;;  %v2869_v15 = vsel %vm349_vm0, %v2842_v61, 0.0  ;;  %v7866_v1 = vld [vmem:[#allocation177_spill] sm:$0xff] }
 0x30e   :  { %v2920_v63 = vadd.f32 %v7865_v42, %v2900_v21  ;;  %v2921_v7 = vadd.f32 %v7865_v42, %v2901_v18  ;;  %v2922_v40 = vadd.f32 %v7865_v42, %v2902_v9  ;;  %v2923_v39 = vadd.f32 %v7865_v42, %v2903_v13 }
 0x30f   :  { %v2864_v53 = vadd.f32 %v2863_v3, %v2862_v56  ;;  %v2780_v43 = vadd.f32 %v2779_v30, %v2778_v32  ;;  %v2690_v47 = vadd.f32 %v2689_v50, %v2688_v62  ;;  %v2871_v8 = vsel %vm349_vm0, %v2843_v35, 0.0  ;;  %v7867_v3 = vld [vmem:[#allocation175_spill] sm:$0xff] }
 0x310   :  { %v2924_v54 = vadd.f32 %v7865_v42, %v2904_v25  ;;  %v2925_v49 = vadd.f32 %v7865_v42, %v2905_v34  ;;  %v2873_v61 = vsel %vm349_vm0, %v2844_v45, 0.0  ;;  %v2935_v16 = vmax.f32 %v2919_v41, 0.0  ;;  %v7870_v25 = vld [vmem:[#allocation171_spill] sm:$0xff] }
 0x311   :  { %v2866_v2 = vadd.f32 %v2865_v36, %v2864_v53  ;;  %v2781_v10 = vrot.slane %v2780_v43, 4  ;;  %2691 = vst.msk [vmem:[#allocation2 + $0x16] sm:$0x1] %vm578_vm3, %v2690_v47  ;;  %v2936_v38 = vmax.f32 %v2920_v63, 0.0  ;;  %v2875_v55 = vsel %vm349_vm0, %v2845_v52, 0.0 }
 0x312   :  { %v2937_v4 = vmax.f32 %v2921_v7, 0.0  ;;  %v2954_v36 = vadd.f32 %v7867_v3, %v7866_v1  ;;  %v2938_v35 = vmax.f32 %v2922_v40, 0.0  ;;  %v2939_v56 = vmax.f32 %v2923_v39, 0.0 }
 0x313   :  { %v2868_v30 = vadd.f32 %v2867_v51, %v2866_v2  ;;  %v2782_v29 = vadd.f32 %v2781_v10, %v2780_v43  ;;  %v7869_v21 = vmax.f32 %v7868_v57, 0.0  ;;  %v2940_v51 = vmax.f32 %v2924_v54, 0.0  ;;  %v7872_v43 = vld [vmem:[#allocation172_spill] sm:$0xff] }
 0x314   :  { %v2941_v9 = vmax.f32 %v2925_v49, 0.0  ;;  %v7871_v50 = vmax.f32 %v7870_v25, 0.0  ;;  %v2959_v53 = vsel %vm349_vm0, %v2935_v16, 0.0  ;;  %v2961_v34 = vsel %vm349_vm0, %v2936_v38, 0.0  ;;  %v7873_v49 = vld [vmem:[#allocation178_spill] sm:$0xff] }
 0x315   :  { %v2870_v62 = vadd.f32 %v2869_v15, %v2868_v30  ;;  %v2955_v18 = vsel %vm349_vm0, %v7869_v21, 0.0  ;;  %v2783_v32 = vrot.slane %v2782_v29, 2  ;;  %v2963_v41 = vsel %vm349_vm0, %v2937_v4, 0.0  ;;  %v7874_v30 = vld [vmem:[#allocation173_spill] sm:$0xff] }
 0x316   :  { %v2956_v45 = vadd.f32 %v2955_v18, %v2954_v36  ;;  %v2957_v52 = vsel %vm349_vm0, %v7871_v50, 0.0  ;;  %v2996_v15 = vmul.f32 %v7872_v43, %v4650_v23  ;;  %v2997_v7 = vmul.f32 %v7872_v43, %v4655_v44 }
 0x317   :  { %v2872_v13 = vadd.f32 %v2871_v8, %v2870_v62  ;;  %v2784_v26 = vadd.f32 %v2783_v32, %v2782_v29  ;;  %v2998_v47 = vmul.f32 %v7872_v43, %v4659_v19  ;;  %v2999_v2 = vmul.f32 %v7872_v43, %v7801_v5 }
 0x318   :  { %v2958_v42 = vadd.f32 %v2957_v52, %v2956_v45  ;;  %v3000_v10 = vmul.f32 %v7872_v43, %v7802_v27  ;;  %v3001_v8 = vmul.f32 %v7872_v43, %v4711_v46  ;;  %v3016_v16 = vadd.f32 %v7874_v30, %v2996_v15 }
 0x319   :  { %v2874_v63 = vadd.f32 %v2873_v61, %v2872_v13  ;;  %v2785_v40 = vrot.slane %v2784_v26, 1  ;;  %v3015_v61 = vadd.f32 %v7874_v30, %v7873_v49  ;;  %v3017_v38 = vadd.f32 %v7874_v30, %v2997_v7 }
 0x31a   :  { %v2960_v39 = vadd.f32 %v2959_v53, %v2958_v42  ;;  %v3018_v1 = vadd.f32 %v7874_v30, %v2998_v47  ;;  %v3019_v3 = vadd.f32 %v7874_v30, %v2999_v2  ;;  %v2965_v62 = vsel %vm349_vm0, %v2938_v35, 0.0  ;;  %v7876_v42 = vld [vmem:[#allocation182_spill] sm:$0xff] }
 0x31b   :  { %v2876_v54 = vadd.f32 %v2875_v55, %v2874_v63  ;;  %v2786_v29 = vadd.f32 %v2785_v40, %v2784_v26  ;;  %v3020_v57 = vadd.f32 %v7874_v30, %v3000_v10  ;;  %v3021_v55 = vadd.f32 %v7874_v30, %v3001_v8  ;;  %v7875_v26 = vld [vmem:[#allocation184_spill] sm:$0xff]  ;;  %v7879_v40 = vld [vmem:[#allocation179_spill] sm:$0xff] }
 0x31c   :  { %v2962_v4 = vadd.f32 %v2961_v34, %v2960_v39  ;;  %v2967_v18 = vsel %vm349_vm0, %v2939_v56, 0.0  ;;  %v2969_v32 = vsel %vm349_vm0, %v2940_v51, 0.0  ;;  %v3031_v45 = vmax.f32 %v3015_v61, 0.0  ;;  %v7881_v30 = vld [vmem:[#allocation176_spill] sm:$0xff] }
 0x31d   :  { %v2877_v36 = vrot.slane %v2876_v54, 4  ;;  %2787 = vst.msk [vmem:[#allocation2 + $0x17] sm:$0x1] %vm578_vm3, %v2786_v29  ;;  %v2971_v25 = vsel %vm349_vm0, %v2941_v9, 0.0  ;;  %v3032_v50 = vmax.f32 %v3016_v16, 0.0  ;;  %v3033_v52 = vmax.f32 %v3017_v38, 0.0 }
 0x31e   :  { %v2964_v21 = vadd.f32 %v2963_v41, %v2962_v4  ;;  %v3034_v34 = vmax.f32 %v3018_v1, 0.0  ;;  %v3035_v35 = vmax.f32 %v3019_v3, 0.0  ;;  %v3050_v43 = vadd.f32 %v7876_v42, %v7875_v26  ;;  %v7877_v41 = vld [vmem:[#allocation174_spill] sm:$0xff] }
 0x31f   :  { %v2878_v13 = vadd.f32 %v2877_v36, %v2876_v54  ;;  %v3036_v63 = vmax.f32 %v3020_v57, 0.0  ;;  %v3037_v7 = vmax.f32 %v3021_v55, 0.0  ;;  %v7878_v47 = vmax.f32 %v7877_v41, 0.0 }
 0x320   :  { %v2966_v53 = vadd.f32 %v2965_v62, %v2964_v21  ;;  %v7880_v39 = vmax.f32 %v7879_v40, 0.0  ;;  %v3055_v10 = vsel %vm349_vm0, %v3031_v45, 0.0  ;;  %v3057_v54 = vsel %vm349_vm0, %v3032_v50, 0.0  ;;  %v7882_v21 = vld [vmem:[#allocation183_spill] sm:$0xff] }
 0x321   :  { %v2879_v15 = vrot.slane %v2878_v13, 2  ;;  %v3051_v56 = vsel %vm349_vm0, %v7878_v47, 0.0  ;;  %v3059_v49 = vsel %vm349_vm0, %v3033_v52, 0.0  ;;  %v3092_v61 = vmul.f32 %v7881_v30, %v4650_v23 }
 0x322   :  { %v2968_v51 = vadd.f32 %v2967_v18, %v2966_v53  ;;  %v3052_v2 = vadd.f32 %v3051_v56, %v3050_v43  ;;  %v3053_v9 = vsel %vm349_vm0, %v7880_v39, 0.0  ;;  %v3093_v29 = vmul.f32 %v7881_v30, %v4655_v44  ;;  %v7883_v18 = vld [vmem:[#allocation180_spill] sm:$0xff] }
 0x323   :  { %v2880_v8 = vadd.f32 %v2879_v15, %v2878_v13  ;;  %v3094_v4 = vmul.f32 %v7881_v30, %v4659_v19  ;;  %v3095_v3 = vmul.f32 %v7881_v30, %v7801_v5  ;;  %v3096_v36 = vmul.f32 %v7881_v30, %v7802_v27 }
 0x324   :  { %v2970_v16 = vadd.f32 %v2969_v32, %v2968_v51  ;;  %v3054_v38 = vadd.f32 %v3053_v9, %v3052_v2  ;;  %v3097_v62 = vmul.f32 %v7881_v30, %v4711_v46  ;;  %v3111_v32 = vadd.f32 %v7883_v18, %v7882_v21 }
 0x325   :  { %v2881_v1 = vrot.slane %v2880_v8, 1  ;;  %v3112_v45 = vadd.f32 %v7883_v18, %v3092_v61  ;;  %v3113_v50 = vadd.f32 %v7883_v18, %v3093_v29  ;;  %v3114_v52 = vadd.f32 %v7883_v18, %v3094_v4 }
 0x326   :  { %v2972_v57 = vadd.f32 %v2971_v25, %v2970_v16  ;;  %v3056_v55 = vadd.f32 %v3055_v10, %v3054_v38  ;;  %v3115_v53 = vadd.f32 %v7883_v18, %v3095_v3  ;;  %v3061_v43 = vsel %vm349_vm0, %v3034_v34, 0.0  ;;  %v7884_v34 = vld [vmem:[#allocation191_spill] sm:$0xff]  ;;  %v7888_v3 = vld [vmem:[#allocation185_spill] sm:$0xff] }
 0x327   :  { %v2882_v13 = vadd.f32 %v2881_v1, %v2880_v8  ;;  %v3116_v15 = vadd.f32 %v7883_v18, %v3096_v36  ;;  %v3063_v25 = vsel %vm349_vm0, %v3035_v35, 0.0  ;;  %v3065_v41 = vsel %vm349_vm0, %v3036_v63, 0.0  ;;  %v7886_v35 = vld [vmem:[#allocation181_spill] sm:$0xff] }
 0x328   :  { %v2973_v26 = vrot.slane %v2972_v57, 4  ;;  %v3058_v42 = vadd.f32 %v3057_v54, %v3056_v55  ;;  %v3117_v47 = vadd.f32 %v7883_v18, %v3097_v62  ;;  %v3127_v56 = vmax.f32 %v3111_v32, 0.0  ;;  %v7885_v54 = vld [vmem:[#allocation189_spill] sm:$0xff]  ;;  %v7890_v32 = vld [vmem:[#allocation186_spill] sm:$0xff] }
 0x329   :  { %2883 = vst.msk [vmem:[#allocation2 + $0x18] sm:$0x1] %vm578_vm3, %v2882_v13  ;;  %v3128_v40 = vmax.f32 %v3112_v45, 0.0  ;;  %v3129_v39 = vmax.f32 %v3113_v50, 0.0  ;;  %v3067_v9 = vsel %vm349_vm0, %v3037_v7, 0.0  ;;  %v3130_v10 = vmax.f32 %v3114_v52, 0.0 }
 0x32a   :  { %v2974_v51 = vadd.f32 %v2973_v26, %v2972_v57  ;;  %v3060_v2 = vadd.f32 %v3059_v49, %v3058_v42  ;;  %v3131_v8 = vmax.f32 %v3115_v53, 0.0  ;;  %v3146_v30 = vadd.f32 %v7885_v54, %v7884_v34 }
 0x32b   :  { %v3132_v38 = vmax.f32 %v3116_v15, 0.0  ;;  %v7887_v29 = vmax.f32 %v7886_v35, 0.0  ;;  %v3133_v4 = vmax.f32 %v3117_v47, 0.0  ;;  %v7889_v49 = vmax.f32 %v7888_v3, 0.0  ;;  %v7892_v47 = vld [vmem:[#allocation187_spill] sm:$0xff] }
 0x32c   :  { %v2975_v61 = vrot.slane %v2974_v51, 2  ;;  %v3062_v16 = vadd.f32 %v3061_v43, %v3060_v2  ;;  %v3151_v7 = vsel %vm349_vm0, %v3127_v56, 0.0  ;;  %v3153_v55 = vsel %vm349_vm0, %v3128_v40, 0.0 }
 0x32d   :  { %v3147_v63 = vsel %vm349_vm0, %v7887_v29, 0.0  ;;  %v3149_v36 = vsel %vm349_vm0, %v7889_v49, 0.0  ;;  %v3155_v21 = vsel %vm349_vm0, %v3129_v39, 0.0  ;;  %v3188_v45 = vmul.f32 %v7890_v32, %v4650_v23 }
 0x32e   :  { %v3148_v1 = vadd.f32 %v3147_v63, %v3146_v30  ;;  %v2976_v62 = vadd.f32 %v2975_v61, %v2974_v51  ;;  %v3064_v57 = vadd.f32 %v3063_v25, %v3062_v16  ;;  %v3189_v13 = vmul.f32 %v7890_v32, %v4655_v44  ;;  %v7891_v25 = vld [vmem:[#allocation192_spill] sm:$0xff] }
 0x32f   :  { %v3190_v50 = vmul.f32 %v7890_v32, %v4659_v19  ;;  %v3191_v26 = vmul.f32 %v7890_v32, %v7801_v5  ;;  %v3192_v42 = vmul.f32 %v7890_v32, %v7802_v27  ;;  %v3193_v15 = vmul.f32 %v7890_v32, %v4711_v46 }
 0x330   :  { %v3150_v18 = vadd.f32 %v3149_v36, %v3148_v1  ;;  %v2977_v52 = vrot.slane %v2976_v62, 1  ;;  %v3066_v53 = vadd.f32 %v3065_v41, %v3064_v57  ;;  %v3207_v56 = vadd.f32 %v7892_v47, %v7891_v25 }
 0x331   :  { %v3208_v51 = vadd.f32 %v7892_v47, %v3188_v45  ;;  %v3209_v39 = vadd.f32 %v7892_v47, %v3189_v13  ;;  %v3210_v41 = vadd.f32 %v7892_v47, %v3190_v50  ;;  %v3157_v54 = vsel %vm349_vm0, %v3130_v10, 0.0  ;;  %v7894_v45 = vld [vmem:[#allocation188_spill] sm:$0xff] }
 0x332   :  { %v3152_v43 = vadd.f32 %v3151_v7, %v3150_v18  ;;  %v2978_v2 = vadd.f32 %v2977_v52, %v2976_v62  ;;  %v3068_v40 = vadd.f32 %v3067_v9, %v3066_v53  ;;  %v3211_v30 = vadd.f32 %v7892_v47, %v3191_v26  ;;  %v7893_v62 = vld [vmem:[#allocation196_spill] sm:$0xff]  ;;  %v7896_v52 = vld [vmem:[#allocation193_spill] sm:$0xff] }
 0x333   :  { %v3212_v61 = vadd.f32 %v7892_v47, %v3192_v42  ;;  %v3159_v35 = vsel %vm349_vm0, %v3131_v8, 0.0  ;;  %v3161_v29 = vsel %vm349_vm0, %v3132_v38, 0.0  ;;  %v3213_v9 = vadd.f32 %v7892_v47, %v3193_v15  ;;  %v7898_v47 = vld [vmem:[#allocation190_spill] sm:$0xff] }
 0x334   :  { %v3154_v34 = vadd.f32 %v3153_v55, %v3152_v43  ;;  %2979 = vst.msk [vmem:[#allocation2 + $0x19] sm:$0x1] %vm578_vm3, %v2978_v2  ;;  %v3069_v16 = vrot.slane %v3068_v40, 4  ;;  %v3223_v1 = vmax.f32 %v3207_v56, 0.0  ;;  %v3224_v3 = vmax.f32 %v3208_v51, 0.0 }
 0x335   :  { %v3225_v49 = vmax.f32 %v3209_v39, 0.0  ;;  %v3163_v10 = vsel %vm349_vm0, %v3133_v4, 0.0  ;;  %v3226_v7 = vmax.f32 %v3210_v41, 0.0  ;;  %v3242_v57 = vadd.f32 %v7893_v62, %v6093_v6 }
 0x336   :  { %v3156_v63 = vadd.f32 %v3155_v21, %v3154_v34  ;;  %v3070_v36 = vadd.f32 %v3069_v16, %v3068_v40  ;;  %v3227_v18 = vmax.f32 %v3211_v30, 0.0  ;;  %v3228_v32 = vmax.f32 %v3212_v61, 0.0  ;;  %v7899_v61 = vld [vmem:[#allocation197_spill] sm:$0xff]  ;;  %v7900_v16 = vld [vmem:[#allocation194_spill] sm:$0xff] }
 0x337   :  { %v7895_v8 = vmax.f32 %v7894_v45, 0.0  ;;  %v3229_v50 = vmax.f32 %v3213_v9, 0.0  ;;  %v7897_v53 = vmax.f32 %v7896_v52, 0.0  ;;  %v3247_v4 = vsel %vm349_vm0, %v3223_v1, 0.0 }
 0x338   :  { %v3158_v55 = vadd.f32 %v3157_v54, %v3156_v63  ;;  %v3071_v13 = vrot.slane %v3070_v36, 2  ;;  %v3249_v43 = vsel %vm349_vm0, %v3224_v3, 0.0  ;;  %v3251_v6 = vsel %vm349_vm0, %v3225_v49, 0.0 }
 0x339   :  { %v3243_v38 = vsel %vm349_vm0, %v7895_v8, 0.0  ;;  %v3245_v26 = vsel %vm349_vm0, %v7897_v53, 0.0  ;;  %v3284_v56 = vmul.f32 %v7898_v47, %v4650_v23  ;;  %v3285_v51 = vmul.f32 %v7898_v47, %v4655_v44 }
 0x33a   :  { %v3244_v21 = vadd.f32 %v3243_v38, %v3242_v57  ;;  %v3160_v42 = vadd.f32 %v3159_v35, %v3158_v55  ;;  %v3072_v15 = vadd.f32 %v3071_v13, %v3070_v36  ;;  %v3286_v40 = vmul.f32 %v7898_v47, %v4659_v19 }
 0x33b   :  { %v3287_v39 = vmul.f32 %v7898_v47, %v7801_v5  ;;  %v3288_v41 = vmul.f32 %v7898_v47, %v7802_v27  ;;  %v3289_v30 = vmul.f32 %v7898_v47, %v4711_v46  ;;  %v3303_v35 = vadd.f32 %v7900_v16, %v7899_v61 }
 0x33c   :  { %v3246_v25 = vadd.f32 %v3245_v26, %v3244_v21  ;;  %v3162_v2 = vadd.f32 %v3161_v29, %v3160_v42  ;;  %v3073_v34 = vrot.slane %v3072_v15, 1  ;;  %v3253_v29 = vsel %vm349_vm0, %v3226_v7, 0.0 }
 0x33d   :  { %v3304_v63 = vadd.f32 %v7900_v16, %v3284_v56  ;;  %v3305_v1 = vadd.f32 %v7900_v16, %v3285_v51  ;;  %v3306_v36 = vadd.f32 %v7900_v16, %v3286_v40  ;;  %v3307_v62 = vadd.f32 %v7900_v16, %v3287_v39 }
 0x33e   :  { %v3248_v54 = vadd.f32 %v3247_v4, %v3246_v25  ;;  %v3164_v9 = vadd.f32 %v3163_v10, %v3162_v2  ;;  %v3074_v3 = vadd.f32 %v3073_v34, %v3072_v15  ;;  %v3255_v55 = vsel %vm349_vm0, %v3227_v18, 0.0 }
 0x33f   :  { %v3308_v45 = vadd.f32 %v7900_v16, %v3288_v41  ;;  %v3309_v8 = vadd.f32 %v7900_v16, %v3289_v30  ;;  %v3257_v7 = vsel %vm349_vm0, %v3228_v32, 0.0  ;;  %v3319_v38 = vmax.f32 %v3303_v35, 0.0 }
 0x340   :  { %v3250_v49 = vadd.f32 %v3249_v43, %v3248_v54  ;;  %v3165_v57 = vrot.slane %v3164_v9, 4  ;;  %3075 = vst.msk [vmem:[#allocation2 + $0x1a] sm:$0x1] %vm578_vm3, %v3074_v3  ;;  %v3320_v13 = vmax.f32 %v3304_v63, 0.0  ;;  %v3259_v52 = vsel %vm349_vm0, %v3229_v50, 0.0  ;;  %v7901_v43 = vld [vmem:[#allocation195_spill] sm:$0xff] }
 0x341   :  { %v3321_v53 = vmax.f32 %v3305_v1, 0.0  ;;  %v3338_v26 = vadd.f32 %v6139_v17, %v6143_v22  ;;  %v3322_v18 = vmax.f32 %v3306_v36, 0.0  ;;  %v3323_v4 = vmax.f32 %v3307_v62, 0.0 }
 0x342   :  { %v3252_v10 = vadd.f32 %v3251_v6, %v3250_v49  ;;  %v3166_v21 = vadd.f32 %v3165_v57, %v3164_v9  ;;  %v7902_v15 = vmax.f32 %v7901_v43, 0.0  ;;  %v3324_v6 = vmax.f32 %v3308_v45, 0.0 }
 0x343   :  { %v3325_v56 = vmax.f32 %v3309_v8, 0.0  ;;  %v7903_v2 = vmax.f32 %v6096_v37, 0.0  ;;  %v3343_v40 = vsel %vm349_vm0, %v3319_v38, 0.0  ;;  %v3345_v17 = vsel %vm349_vm0, %v3320_v13, 0.0 }
 0x344   :  { %v3254_v42 = vadd.f32 %v3253_v29, %v3252_v10  ;;  %v3339_v25 = vsel %vm349_vm0, %v7902_v15, 0.0  ;;  %v3167_v47 = vrot.slane %v3166_v21, 2  ;;  %v3347_v41 = vsel %vm349_vm0, %v3321_v53, 0.0 }
 0x345   :  { %v3340_v32 = vadd.f32 %v3339_v25, %v3338_v26  ;;  %v3341_v50 = vsel %vm349_vm0, %v7903_v2, 0.0  ;;  %v3380_v34 = vmul.f32 %v6104_v33, %v4650_v23  ;;  %v3381_v30 = vmul.f32 %v6104_v33, %v4655_v44 }
 0x346   :  { %v3256_v51 = vadd.f32 %v3255_v55, %v3254_v42  ;;  %v3168_v22 = vadd.f32 %v3167_v47, %v3166_v21  ;;  %v3382_v37 = vmul.f32 %v6104_v33, %v4659_v19  ;;  %v3383_v61 = vmul.f32 %v6104_v33, %v7801_v5 }
 0x347   :  { %v3342_v39 = vadd.f32 %v3341_v50, %v3340_v32  ;;  %v3384_v9 = vmul.f32 %v6104_v33, %v7802_v27  ;;  %v3385_v29 = vmul.f32 %v6104_v33, %v4711_v46  ;;  %v3399_v1 = vadd.f32 %v6124_v20, %v6147_v31 }
 0x348   :  { %v3258_v54 = vadd.f32 %v3257_v7, %v3256_v51  ;;  %v3169_v16 = vrot.slane %v3168_v22, 1  ;;  %v3400_v3 = vadd.f32 %v6124_v20, %v3380_v34  ;;  %v3401_v49 = vadd.f32 %v6124_v20, %v3381_v30 }
 0x349   :  { %v3344_v35 = vadd.f32 %v3343_v40, %v3342_v39  ;;  %v3402_v57 = vadd.f32 %v6124_v20, %v3382_v37  ;;  %v3403_v55 = vadd.f32 %v6124_v20, %v3383_v61  ;;  %v3349_v8 = vsel %vm349_vm0, %v3322_v18, 0.0 }
 0x34a   :  { %v3260_v63 = vadd.f32 %v3259_v52, %v3258_v54  ;;  %v3170_v36 = vadd.f32 %v3169_v16, %v3168_v22  ;;  %v3404_v10 = vadd.f32 %v6124_v20, %v3384_v9  ;;  %v3405_v33 = vadd.f32 %v6124_v20, %v3385_v29 }
 0x34b   :  { %v3346_v62 = vadd.f32 %v3345_v17, %v3344_v35  ;;  %v3351_v7 = vsel %vm349_vm0, %v3323_v4, 0.0  ;;  %v3353_v38 = vsel %vm349_vm0, %v3324_v6, 0.0  ;;  %v3415_v13 = vmax.f32 %v3399_v1, 0.0 }
 0x34c   :  { %v3261_v45 = vrot.slane %v3260_v63, 4  ;;  %3171 = vst.msk [vmem:[#allocation2 + $0x1b] sm:$0x1] %vm578_vm3, %v3170_v36  ;;  %v3355_v52 = vsel %vm349_vm0, %v3325_v56, 0.0  ;;  %v3416_v53 = vmax.f32 %v3400_v3, 0.0  ;;  %v3417_v26 = vmax.f32 %v3401_v49, 0.0 }
 0x34d   :  { %v3348_v31 = vadd.f32 %v3347_v41, %v3346_v62  ;;  %v3418_v43 = vmax.f32 %v3402_v57, 0.0  ;;  %v3419_v18 = vmax.f32 %v3403_v55, 0.0  ;;  %v3434_v15 = vadd.f32 %v6193_v48, %v6198_v24  ;;  %v7906_v55 = vld [vmem:[#allocation199_spill] sm:$0xff] }
 0x34e   :  { %v3262_v21 = vadd.f32 %v3261_v45, %v3260_v63  ;;  %v3420_v25 = vmax.f32 %v3404_v10, 0.0  ;;  %v3421_v47 = vmax.f32 %v3405_v33, 0.0  ;;  %v7904_v32 = vmax.f32 %v6135_v14, 0.0 }
 0x34f   :  { %v3350_v42 = vadd.f32 %v3349_v8, %v3348_v31  ;;  %v7905_v2 = vmax.f32 %v6150_v59, 0.0  ;;  %v3439_v50 = vsel %vm349_vm0, %v3415_v13, 0.0  ;;  %v3441_v17 = vsel %vm349_vm0, %v3416_v53, 0.0 }
 0x350   :  { %v3263_v20 = vrot.slane %v3262_v21, 2  ;;  %v3435_v4 = vsel %vm349_vm0, %v7904_v32, 0.0  ;;  %v3443_v48 = vsel %vm349_vm0, %v3417_v26, 0.0  ;;  %v3476_v24 = vmul.f32 %v6141_v0, %v4650_v23 }
 0x351   :  { %v3352_v6 = vadd.f32 %v3351_v7, %v3350_v42  ;;  %v3436_v51 = vadd.f32 %v3435_v4, %v3434_v15  ;;  %v3437_v56 = vsel %vm349_vm0, %v7905_v2, 0.0  ;;  %v3477_v39 = vmul.f32 %v6141_v0, %v4655_v44  ;;  %v7907_v42 = vld [vmem:[#allocation198_spill] sm:$0xff] }
 0x352   :  { %v3264_v40 = vadd.f32 %v3263_v20, %v3262_v21  ;;  %v3478_v59 = vmul.f32 %v6141_v0, %v4659_v19  ;;  %v3479_v34 = vmul.f32 %v6141_v0, %v7801_v5  ;;  %v3480_v54 = vmul.f32 %v6141_v0, %v7802_v27 }
 0x353   :  { %v3354_v22 = vadd.f32 %v3353_v38, %v3352_v6  ;;  %v3438_v14 = vadd.f32 %v3437_v56, %v3436_v51  ;;  %v3481_v30 = vmul.f32 %v6141_v0, %v4711_v46  ;;  %v3496_v16 = vadd.f32 %v6175_v28, %v3476_v24  ;;  %v7910_v24 = vld [vmem:[#allocation45_spill] sm:$0xff] }
 0x354   :  { %v3265_v41 = vrot.slane %v3264_v40, 1  ;;  %v3497_v35 = vadd.f32 %v6175_v28, %v3477_v39  ;;  %v3498_v29 = vadd.f32 %v6175_v28, %v3478_v59  ;;  %v3499_v63 = vadd.f32 %v6175_v28, %v3479_v34 }
 0x355   :  { %v3356_v37 = vadd.f32 %v3355_v52, %v3354_v22  ;;  %v3440_v61 = vadd.f32 %v3439_v50, %v3438_v14  ;;  %v3500_v1 = vadd.f32 %v6175_v28, %v3480_v54  ;;  %v3445_v36 = vsel %vm349_vm0, %v3418_v43, 0.0  ;;  %v7911_v22 = vld [vmem:[#allocation7_spill] sm:$0xff] }
 0x356   :  { %v3266_v9 = vadd.f32 %v3265_v41, %v3264_v40  ;;  %v3501_v62 = vadd.f32 %v6175_v28, %v3481_v30  ;;  %v3447_v0 = vsel %vm349_vm0, %v3419_v18, 0.0  ;;  %v3449_v57 = vsel %vm349_vm0, %v3420_v25, 0.0 }
 0x357   :  { %v3357_v3 = vrot.slane %v3356_v37, 4  ;;  %v3442_v49 = vadd.f32 %v3441_v17, %v3440_v61  ;;  %v3511_v45 = vmax.f32 %v7906_v55, 0.0  ;;  %v3512_v8 = vmax.f32 %v3496_v16, 0.0 }
 0x358   :  { %3267 = vst.msk [vmem:[#allocation2 + $0x1c] sm:$0x1] %vm578_vm3, %v3266_v9  ;;  %v3451_v31 = vsel %vm349_vm0, %v3421_v47, 0.0  ;;  %v3513_v7 = vmax.f32 %v3497_v35, 0.0  ;;  %v3514_v38 = vmax.f32 %v3498_v29, 0.0  ;;  %v3515_v13 = vmax.f32 %v3499_v63, 0.0 }
 0x359   :  { %v3358_v10 = vadd.f32 %v3357_v3, %v3356_v37  ;;  %v3444_v33 = vadd.f32 %v3443_v48, %v3442_v49  ;;  %v3516_v21 = vmax.f32 %v3500_v1, 0.0  ;;  %v3530_v28 = vadd.f32 %v6233_v12, %v6240_v60  ;;  %v7909_v60 = vld [vmem:[#allocation6_spill] sm:$0xff] }
 0x35a   :  { %v3517_v26 = vmax.f32 %v3501_v62, 0.0  ;;  %v7908_v43 = vmax.f32 %v7907_v42, 0.0  ;;  %v3533_v20 = vsel %vm349_vm0, %v3510_v58, 0.0  ;;  %v3535_v25 = vsel %vm349_vm0, %v3511_v45, 0.0  ;;  %v7912_v45 = vld [vmem:[#allocation34_spill] sm:$0xff] }
 0x35b   :  { %v3359_v52 = vrot.slane %v3358_v10, 2  ;;  %v3446_v53 = vadd.f32 %v3445_v36, %v3444_v33  ;;  %v3537_v47 = vsel %vm349_vm0, %v3512_v8, 0.0  ;;  %v3539_v12 = vsel %vm349_vm0, %v3513_v7, 0.0  ;;  %v7913_v8 = vld [vmem:[#allocation49_spill] sm:$0xff] }
 0x35c   :  { %v3531_v18 = vsel %vm349_vm0, %v7908_v43, 0.0  ;;  %v499_v6 = vmul.f32 %v7909_v60, %v4650_v23  ;;  %v500_v2 = vmul.f32 %v7909_v60, %v4655_v44  ;;  %v501_v11 = vmul.f32 %v7909_v60, %v4659_v19 }
 0x35d   :  { %v3532_v15 = vadd.f32 %v3531_v18, %v3530_v28  ;;  %v3360_v32 = vadd.f32 %v3359_v52, %v3358_v10  ;;  %v3448_v4 = vadd.f32 %v3447_v0, %v3446_v53  ;;  %v502_v58 = vmul.f32 %v7909_v60, %v7801_v5  ;;  %v7916_v53 = vld [vmem:[#allocation24_spill] sm:$0xff] }
 0x35e   :  { %v503_v40 = vmul.f32 %v7909_v60, %v7802_v27  ;;  %v504_v17 = vmul.f32 %v7909_v60, %v4711_v46  ;;  %v518_v14 = vadd.f32 %v7911_v22, %v7910_v24  ;;  %v519_v39 = vadd.f32 %v7911_v22, %v499_v6 }
 0x35f   :  { %v3534_v51 = vadd.f32 %v3533_v20, %v3532_v15  ;;  %v3361_v56 = vrot.slane %v3360_v32, 1  ;;  %v3450_v50 = vadd.f32 %v3449_v57, %v3448_v4  ;;  %v520_v59 = vadd.f32 %v7911_v22, %v500_v2 }
 0x360   :  { %v521_v54 = vadd.f32 %v7911_v22, %v501_v11  ;;  %v522_v30 = vadd.f32 %v7911_v22, %v502_v58  ;;  %v3541_v61 = vsel %vm349_vm0, %v3514_v38, 0.0  ;;  %v523_v16 = vadd.f32 %v7911_v22, %v503_v40  ;;  %v7914_v38 = vld [vmem:[#allocation23_spill] sm:$0xff]  ;;  %v7920_v40 = vld [vmem:[#allocation9_spill] sm:$0xff] }
 0x361   :  { %v3536_v48 = vadd.f32 %v3535_v25, %v3534_v51  ;;  %v3362_v41 = vadd.f32 %v3361_v56, %v3360_v32  ;;  %v3452_v34 = vadd.f32 %v3451_v31, %v3450_v50  ;;  %v524_v35 = vadd.f32 %v7911_v22, %v504_v17  ;;  %v7918_v25 = vld [vmem:[#allocation8_spill] sm:$0xff]  ;;  %v7919_v50 = vld [vmem:[#allocation50_spill] sm:$0xff] }
 0x362   :  { %v3543_v29 = vsel %vm349_vm0, %v3515_v13, 0.0  ;;  %v3545_v63 = vsel %vm349_vm0, %v3516_v21, 0.0  ;;  %v534_v1 = vmax.f32 %v518_v14, 0.0  ;;  %v3547_v49 = vsel %vm349_vm0, %v3517_v26, 0.0 }
 0x363   :  { %v3538_v37 = vadd.f32 %v3537_v47, %v3536_v48  ;;  %3363 = vst.msk [vmem:[#allocation2 + $0x1d] sm:$0x1] %vm578_vm3, %v3362_v41  ;;  %v3453_v9 = vrot.slane %v3452_v34, 4  ;;  %v535_v36 = vmax.f32 %v519_v39, 0.0  ;;  %v536_v62 = vmax.f32 %v520_v59, 0.0 }
 0x364   :  { %v537_v57 = vmax.f32 %v521_v54, 0.0  ;;  %v538_v55 = vmax.f32 %v522_v30, 0.0  ;;  %v553_v10 = vadd.f32 %v7913_v8, %v7912_v45  ;;  %v539_v31 = vmax.f32 %v523_v16, 0.0 }
 0x365   :  { %v3540_v3 = vadd.f32 %v3539_v12, %v3538_v37  ;;  %v3454_v0 = vadd.f32 %v3453_v9, %v3452_v34  ;;  %v540_v7 = vmax.f32 %v524_v35, 0.0  ;;  %v7915_v28 = vmax.f32 %v7914_v38, 0.0 }
 0x366   :  { %v7917_v42 = vmax.f32 %v7916_v53, 0.0  ;;  %v558_v43 = vsel %vm349_vm0, %v534_v1, 0.0  ;;  %v560_v15 = vsel %vm349_vm0, %v535_v36, 0.0  ;;  %v562_v20 = vsel %vm349_vm0, %v536_v62, 0.0  ;;  %v7921_v36 = vld [vmem:[#allocation41_spill] sm:$0xff]  ;;  %v7922_v62 = vld [vmem:[#allocation54_spill] sm:$0xff] }
 0x367   :  { %v3542_v33 = vadd.f32 %v3541_v61, %v3540_v3  ;;  %v554_v13 = vsel %vm349_vm0, %v7915_v28, 0.0  ;;  %v3455_v21 = vrot.slane %v3454_v0, 2  ;;  %v596_v47 = vmul.f32 %v7918_v25, %v4650_v23 }
 0x368   :  { %v555_v52 = vadd.f32 %v554_v13, %v553_v10  ;;  %v556_v26 = vsel %vm349_vm0, %v7917_v42, 0.0  ;;  %v597_v12 = vmul.f32 %v7918_v25, %v4655_v44  ;;  %v598_v60 = vmul.f32 %v7918_v25, %v4659_v19  ;;  %v7923_v10 = vld [vmem:[#allocation31_spill] sm:$0xff]  ;;  %v7925_v13 = vld [vmem:[#allocation32_spill] sm:$0xff] }
 0x369   :  { %v3544_v18 = vadd.f32 %v3543_v29, %v3542_v33  ;;  %v3456_v32 = vadd.f32 %v3455_v21, %v3454_v0  ;;  %v599_v51 = vmul.f32 %v7918_v25, %v7801_v5  ;;  %v600_v2 = vmul.f32 %v7918_v25, %v7802_v27 }
 0x36a   :  { %v557_v4 = vadd.f32 %v556_v26, %v555_v52  ;;  %v601_v11 = vmul.f32 %v7918_v25, %v4711_v46  ;;  %v615_v17 = vadd.f32 %v7920_v40, %v7919_v50  ;;  %v616_v48 = vadd.f32 %v7920_v40, %v596_v47 }
 0x36b   :  { %v3546_v6 = vadd.f32 %v3545_v63, %v3544_v18  ;;  %v3457_v58 = vrot.slane %v3456_v32, 1  ;;  %v617_v22 = vadd.f32 %v7920_v40, %v597_v12  ;;  %v618_v14 = vadd.f32 %v7920_v40, %v598_v60 }
 0x36c   :  { %v559_v56 = vadd.f32 %v558_v43, %v557_v4  ;;  %v619_v39 = vadd.f32 %v7920_v40, %v599_v51  ;;  %v620_v34 = vadd.f32 %v7920_v40, %v600_v2  ;;  %v621_v54 = vadd.f32 %v7920_v40, %v601_v11  ;;  %v7928_v2 = vld [vmem:[#allocation55_spill] sm:$0xff] }
 0x36d   :  { %v3548_v24 = vadd.f32 %v3547_v49, %v3546_v6  ;;  %v3458_v59 = vadd.f32 %v3457_v58, %v3456_v32  ;;  %v564_v37 = vsel %vm349_vm0, %v537_v57, 0.0  ;;  %v566_v61 = vsel %vm349_vm0, %v538_v55, 0.0  ;;  %v7929_v11 = vld [vmem:[#allocation11_spill] sm:$0xff] }
 0x36e   :  { %v561_v41 = vadd.f32 %v560_v15, %v559_v56  ;;  %v568_v16 = vsel %vm349_vm0, %v539_v31, 0.0  ;;  %v631_v9 = vmax.f32 %v615_v17, 0.0  ;;  %v632_v29 = vmax.f32 %v616_v48, 0.0  ;;  %v7927_v15 = vld [vmem:[#allocation10_spill] sm:$0xff] }
 0x36f   :  { %v3549_v30 = vrot.slane %v3548_v24, 4  ;;  %3459 = vst.msk [vmem:[#allocation2 + $0x1e] sm:$0x1] %vm578_vm3, %v3458_v59  ;;  %v633_v63 = vmax.f32 %v617_v22, 0.0  ;;  %v570_v3 = vsel %vm349_vm0, %v540_v7, 0.0  ;;  %v634_v49 = vmax.f32 %v618_v14, 0.0 }
 0x370   :  { %v563_v35 = vadd.f32 %v562_v20, %v561_v41  ;;  %v650_v0 = vadd.f32 %v7922_v62, %v7921_v36  ;;  %v635_v8 = vmax.f32 %v619_v39, 0.0  ;;  %v636_v57 = vmax.f32 %v620_v34, 0.0  ;;  %v7932_v62 = vld [vmem:[#allocation38_spill] sm:$0xff] }
 0x371   :  { %v3550_v1 = vadd.f32 %v3549_v30, %v3548_v24  ;;  %v7924_v55 = vmax.f32 %v7923_v10, 0.0  ;;  %v637_v38 = vmax.f32 %v621_v54, 0.0  ;;  %v7926_v21 = vmax.f32 %v7925_v13, 0.0 }
 0x372   :  { %v565_v45 = vadd.f32 %v564_v37, %v563_v35  ;;  %v655_v7 = vsel %vm349_vm0, %v631_v9, 0.0  ;;  %v657_v42 = vsel %vm349_vm0, %v632_v29, 0.0  ;;  %v659_v26 = vsel %vm349_vm0, %v633_v63, 0.0  ;;  %v7930_v29 = vld [vmem:[#allocation46_spill] sm:$0xff]  ;;  %v7931_v63 = vld [vmem:[#allocation59_spill] sm:$0xff] }
 0x373   :  { %v651_v33 = vsel %vm349_vm0, %v7924_v55, 0.0  ;;  %v3551_v31 = vrot.slane %v3550_v1, 2  ;;  %v653_v52 = vsel %vm349_vm0, %v7926_v21, 0.0  ;;  %v692_v20 = vmul.f32 %v7927_v15, %v4650_v23 }
 0x374   :  { %v652_v28 = vadd.f32 %v651_v33, %v650_v0  ;;  %v567_v53 = vadd.f32 %v566_v61, %v565_v45  ;;  %v693_v25 = vmul.f32 %v7927_v15, %v4655_v44  ;;  %v694_v32 = vmul.f32 %v7927_v15, %v4659_v19 }
 0x375   :  { %v3552_v43 = vadd.f32 %v3551_v31, %v3550_v1  ;;  %v695_v4 = vmul.f32 %v7927_v15, %v7801_v5  ;;  %v696_v12 = vmul.f32 %v7927_v15, %v7802_v27  ;;  %v697_v51 = vmul.f32 %v7927_v15, %v4711_v46  ;;  %v7934_v31 = vld [vmem:[#allocation39_spill] sm:$0xff] }
 0x376   :  { %v654_v18 = vadd.f32 %v653_v52, %v652_v28  ;;  %v569_v47 = vadd.f32 %v568_v16, %v567_v53  ;;  %v711_v58 = vadd.f32 %v7929_v11, %v7928_v2  ;;  %v712_v50 = vadd.f32 %v7929_v11, %v692_v20  ;;  %v3558_v52 = vld [vmem:[#allocation2 + $0x10] sm:$0xff]  ;;  %v7937_v2 = vld [vmem:[#allocation60_spill] sm:$0xff] }
 0x377   :  { %v3553_v60 = vrot.slane %v3552_v43, 1  ;;  %v713_v40 = vadd.f32 %v7929_v11, %v693_v25  ;;  %v714_v17 = vadd.f32 %v7929_v11, %v694_v32  ;;  %v715_v22 = vadd.f32 %v7929_v11, %v695_v4 }
 0x378   :  { %v656_v6 = vadd.f32 %v655_v7, %v654_v18  ;;  %v571_v56 = vadd.f32 %v570_v3, %v569_v47  ;;  %v716_v14 = vadd.f32 %v7929_v11, %v696_v12  ;;  %v661_v59 = vsel %vm349_vm0, %v634_v49, 0.0 }
 0x379   :  { %v3554_v48 = vadd.f32 %v3553_v60, %v3552_v43  ;;  %v663_v41 = vsel %vm349_vm0, %v635_v8, 0.0  ;;  %v717_v34 = vadd.f32 %v7929_v11, %v697_v51  ;;  %v665_v30 = vsel %vm349_vm0, %v636_v57, 0.0  ;;  %v7938_v11 = vld [vmem:[#allocation13_spill] sm:$0xff] }
 0x37a   :  { %v658_v24 = vadd.f32 %v657_v42, %v656_v6  ;;  %v572_v39 = vrot.slane %v571_v56, 4  ;;  %v727_v37 = vmax.f32 %v711_v58, 0.0  ;;  %v728_v61 = vmax.f32 %v712_v50, 0.0 }
 0x37b   :  { %3555 = vst.msk [vmem:[#allocation2 + $0x1f] sm:$0x1] %vm578_vm3, %v3554_v48  ;;  %v667_v35 = vsel %vm349_vm0, %v637_v38, 0.0  ;;  %v729_v9 = vmax.f32 %v713_v40, 0.0  ;;  %v746_v1 = vadd.f32 %v7931_v63, %v7930_v29  ;;  %v730_v49 = vmax.f32 %v714_v17, 0.0 }
 0x37c   :  { %v660_v54 = vadd.f32 %v659_v26, %v658_v24  ;;  %v573_v16 = vadd.f32 %v572_v39, %v571_v56  ;;  %v731_v36 = vmax.f32 %v715_v22, 0.0  ;;  %v7933_v0 = vmax.f32 %v7932_v62, 0.0  ;;  %v7936_v26 = vld [vmem:[#allocation12_spill] sm:$0xff]  ;;  %v7942_v62 = vld [vmem:[#allocation51_spill] sm:$0xff] }
 0x37d   :  { %v732_v10 = vmax.f32 %v716_v14, 0.0  ;;  %v733_v55 = vmax.f32 %v717_v34, 0.0  ;;  %v7935_v28 = vmax.f32 %v7934_v31, 0.0  ;;  %v751_v13 = vsel %vm349_vm0, %v727_v37, 0.0  ;;  %v7944_v31 = vld [vmem:[#allocation43_spill] sm:$0xff] }
 0x37e   :  { %v662_v3 = vadd.f32 %v661_v59, %v660_v54  ;;  %v747_v45 = vsel %vm349_vm0, %v7933_v0, 0.0  ;;  %v574_v8 = vrot.slane %v573_v16, 2  ;;  %v753_v21 = vsel %vm349_vm0, %v728_v61, 0.0  ;;  %v7939_v59 = vld [vmem:[#allocation122_spill] sm:$0xff]  ;;  %v7943_v0 = vld [vmem:[#allocation64_spill] sm:$0xff] }
 0x37f   :  { %v748_v57 = vadd.f32 %v747_v45, %v746_v1  ;;  %v749_v38 = vsel %vm349_vm0, %v7935_v28, 0.0  ;;  %v755_v42 = vsel %vm349_vm0, %v729_v9, 0.0  ;;  %v788_v43 = vmul.f32 %v7936_v26, %v4650_v23 }
 0x380   :  { %v664_v33 = vadd.f32 %v663_v41, %v662_v3  ;;  %v575_v53 = vadd.f32 %v574_v8, %v573_v16  ;;  %v789_v15 = vmul.f32 %v7936_v26, %v4655_v44  ;;  %v790_v20 = vmul.f32 %v7936_v26, %v4659_v19  ;;  %v7940_v41 = vld [vmem:[#allocation123_spill] sm:$0xff] }
 0x381   :  { %v750_v7 = vadd.f32 %v749_v38, %v748_v57  ;;  %v791_v25 = vmul.f32 %v7936_v26, %v7801_v5  ;;  %v792_v12 = vmul.f32 %v7936_v26, %v7802_v27  ;;  %v793_v60 = vmul.f32 %v7936_v26, %v4711_v46 }
 0x382   :  { %v666_v18 = vadd.f32 %v665_v30, %v664_v33  ;;  %v3559_v47 = vld [vmem:[#allocation2 + $0x18] sm:$0xff]  ;;  %v576_v32 = vrot.slane %v575_v53, 1  ;;  %v807_v58 = vadd.f32 %v7938_v11, %v7937_v2  ;;  %v808_v56 = vadd.f32 %v7938_v11, %v788_v43 }
 0x383   :  { %v752_v4 = vadd.f32 %v751_v13, %v750_v7  ;;  %v3561_v6 = vpack.c.bf16 %v3559_v47, %v3558_v52  ;;  %v809_v17 = vadd.f32 %v7938_v11, %v789_v15  ;;  %v810_v48 = vadd.f32 %v7938_v11, %v790_v20  ;;  %v7946_v52 = vld [vmem:[#allocation44_spill] sm:$0xff]  ;;  %v7950_v2 = vld [vmem:[#allocation15_spill] sm:$0xff] }
 0x384   :  { %v668_v51 = vadd.f32 %v667_v35, %v666_v18  ;;  %v577_v50 = vadd.f32 %v576_v32, %v575_v53  ;;  %v811_v22 = vadd.f32 %v7938_v11, %v791_v25  ;;  %v812_v14 = vadd.f32 %v7938_v11, %v792_v12  ;;  %v7948_v18 = vld [vmem:[#allocation14_spill] sm:$0xff] }
 0x385   :  { %v754_v40 = vadd.f32 %v753_v21, %v752_v4  ;;  %3714 = vmatpush3.bf16.msra.mxu1 %v3561_v6  ;;  %v813_v39 = vadd.f32 %v7938_v11, %v793_v60  ;;  %v6915_v34 = vadd.f32 %v7940_v41, %v7939_v59  ;;  %v7941_v54 = vmov 0.0  }
 0x386   :  { %v669_v24 = vrot.slane %v668_v51, 4  ;;  %3715 = vmatprep.subr.bf16.mxu1 %v7941_v54  ;;  %579 = vst.msk [vmem:[#allocation2] sm:$0x1] %vm578_vm3, %v577_v50  ;;  %v757_v37 = vsel %vm349_vm0, %v730_v49, 0.0  ;;  %v759_v61 = vsel %vm349_vm0, %v731_v36, 0.0  ;;  %v761_v35 = vsel %vm349_vm0, %v732_v10, 0.0  ;;  %3717 = vmatprep.mubr.msk.bf16.mxu1 %vm3918_vm4, %v7941_v54 }
 0x387   :  { %v756_v30 = vadd.f32 %v755_v42, %v754_v40  ;;  %v823_v9 = vmax.f32 %v807_v58, 0.0  ;;  %v824_v29 = vmax.f32 %v808_v56, 0.0  ;;  %v763_v1 = vsel %vm349_vm0, %v733_v55, 0.0 }
 0x388   :  { %v670_v16 = vadd.f32 %v669_v24, %v668_v51  ;;  %v825_v3 = vmax.f32 %v809_v17, 0.0  ;;  %v842_v45 = vadd.f32 %v7943_v0, %v7942_v62  ;;  %v826_v57 = vmax.f32 %v810_v48, 0.0  ;;  %v7949_v51 = vld [vmem:[#allocation65_spill] sm:$0xff] }
 0x389   :  { %v758_v63 = vadd.f32 %v757_v37, %v756_v30  ;;  %v827_v33 = vmax.f32 %v811_v22, 0.0  ;;  %v7945_v28 = vmax.f32 %v7944_v31, 0.0  ;;  %v828_v38 = vmax.f32 %v812_v14, 0.0 }
 0x38a   :  { %v671_v8 = vrot.slane %v670_v16, 2  ;;  %v829_v13 = vmax.f32 %v813_v39, 0.0  ;;  %v7947_v53 = vmax.f32 %v7946_v52, 0.0  ;;  %v847_v7 = vsel %vm349_vm0, %v823_v9, 0.0 }
 0x38b   :  { %v843_v49 = vsel %vm349_vm0, %v7945_v28, 0.0  ;;  %v760_v36 = vadd.f32 %v759_v61, %v758_v63  ;;  %v849_v42 = vsel %vm349_vm0, %v824_v29, 0.0  ;;  %v884_v15 = vmul.f32 %v7948_v18, %v4650_v23  ;;  %v7951_v63 = vld [vmem:[#allocation56_spill] sm:$0xff] }
 0x38c   :  { %v844_v10 = vadd.f32 %v843_v49, %v842_v45  ;;  %v672_v21 = vadd.f32 %v671_v8, %v670_v16  ;;  %v845_v55 = vsel %vm349_vm0, %v7947_v53, 0.0  ;;  %v885_v20 = vmul.f32 %v7948_v18, %v4655_v44  ;;  %v7953_v8 = vld [vmem:[#allocation47_spill] sm:$0xff] }
 0x38d   :  { %v762_v26 = vadd.f32 %v761_v35, %v760_v36  ;;  %v886_v47 = vmul.f32 %v7948_v18, %v4659_v19  ;;  %v887_v32 = vmul.f32 %v7948_v18, %v7801_v5  ;;  %v888_v4 = vmul.f32 %v7948_v18, %v7802_v27 }
 0x38e   :  { %v846_v43 = vadd.f32 %v845_v55, %v844_v10  ;;  %v673_v25 = vrot.slane %v672_v21, 1  ;;  %v889_v6 = vmul.f32 %v7948_v18, %v4711_v46  ;;  %v903_v11 = vadd.f32 %v7950_v2, %v7949_v51 }
 0x38f   :  { %v764_v12 = vadd.f32 %v763_v1, %v762_v26  ;;  %v904_v56 = vadd.f32 %v7950_v2, %v884_v15  ;;  %v905_v50 = vadd.f32 %v7950_v2, %v885_v20  ;;  %v906_v40 = vadd.f32 %v7950_v2, %v886_v47  ;;  %v7952_v1 = vld [vmem:[#allocation69_spill] sm:$0xff] }
 0x390   :  { %v848_v60 = vadd.f32 %v847_v7, %v846_v43  ;;  %v674_v58 = vadd.f32 %v673_v25, %v672_v21  ;;  %v907_v24 = vadd.f32 %v7950_v2, %v887_v32  ;;  %v908_v22 = vadd.f32 %v7950_v2, %v888_v4  ;;  %v7955_v21 = vld [vmem:[#allocation48_spill] sm:$0xff] }
 0x391   :  { %v765_v17 = vrot.slane %v764_v12, 4  ;;  %v851_v14 = vsel %vm349_vm0, %v825_v3, 0.0  ;;  %v853_v39 = vsel %vm349_vm0, %v826_v57, 0.0  ;;  %v855_v59 = vsel %vm349_vm0, %v827_v33, 0.0 }
 0x392   :  { %v850_v48 = vadd.f32 %v849_v42, %v848_v60  ;;  %675 = vst.msk [vmem:[#allocation2 + $0x1] sm:$0x1] %vm578_vm3, %v674_v58  ;;  %v909_v41 = vadd.f32 %v7950_v2, %v889_v6  ;;  %v857_v61 = vsel %vm349_vm0, %v828_v38, 0.0  ;;  %v919_v16 = vmax.f32 %v903_v11, 0.0  ;;  %v7957_v42 = vld [vmem:[#allocation16_spill] sm:$0xff]  ;;  %v7959_v60 = vld [vmem:[#allocation17_spill] sm:$0xff] }
 0x393   :  { %v766_v30 = vadd.f32 %v765_v17, %v764_v12  ;;  %v859_v35 = vsel %vm349_vm0, %v829_v13, 0.0  ;;  %v920_v9 = vmax.f32 %v904_v56, 0.0  ;;  %v921_v29 = vmax.f32 %v905_v50, 0.0  ;;  %v7958_v12 = vld [vmem:[#allocation70_spill] sm:$0xff] }
 0x394   :  { %v852_v37 = vadd.f32 %v851_v14, %v850_v48  ;;  %v938_v62 = vadd.f32 %v7952_v1, %v7951_v63  ;;  %v922_v45 = vmax.f32 %v906_v40, 0.0  ;;  %v7954_v57 = vmax.f32 %v7953_v8, 0.0 }
 0x395   :  { %v767_v0 = vrot.slane %v766_v30, 2  ;;  %v923_v31 = vmax.f32 %v907_v24, 0.0  ;;  %v924_v28 = vmax.f32 %v908_v22, 0.0  ;;  %v925_v49 = vmax.f32 %v909_v41, 0.0 }
 0x396   :  { %v854_v3 = vadd.f32 %v853_v39, %v852_v37  ;;  %v939_v33 = vsel %vm349_vm0, %v7954_v57, 0.0  ;;  %v7956_v13 = vmax.f32 %v7955_v21, 0.0  ;;  %v943_v53 = vsel %vm349_vm0, %v919_v16, 0.0 }
 0x397   :  { %v940_v36 = vadd.f32 %v939_v33, %v938_v62  ;;  %v768_v38 = vadd.f32 %v767_v0, %v766_v30  ;;  %v945_v7 = vsel %vm349_vm0, %v920_v9, 0.0  ;;  %v980_v26 = vmul.f32 %v7957_v42, %v4650_v23  ;;  %v7961_v9 = vld [vmem:[#allocation74_spill] sm:$0xff]  ;;  %v7962_v0 = vld [vmem:[#allocation52_spill] sm:$0xff] }
 0x398   :  { %v856_v10 = vadd.f32 %v855_v59, %v854_v3  ;;  %v941_v52 = vsel %vm349_vm0, %v7956_v13, 0.0  ;;  %v981_v43 = vmul.f32 %v7957_v42, %v4655_v44  ;;  %v982_v20 = vmul.f32 %v7957_v42, %v4659_v19 }
 0x399   :  { %v942_v55 = vadd.f32 %v941_v52, %v940_v36  ;;  %v769_v18 = vrot.slane %v768_v38, 1  ;;  %v983_v25 = vmul.f32 %v7957_v42, %v7801_v5  ;;  %v984_v32 = vmul.f32 %v7957_v42, %v7802_v27 }
 0x39a   :  { %v858_v15 = vadd.f32 %v857_v61, %v856_v10  ;;  %v985_v4 = vmul.f32 %v7957_v42, %v4711_v46  ;;  %v999_v6 = vadd.f32 %v7959_v60, %v7958_v12  ;;  %v1000_v11 = vadd.f32 %v7959_v60, %v980_v26  ;;  %v7968_v12 = vld [vmem:[#allocation19_spill] sm:$0xff] }
 0x39b   :  { %v944_v47 = vadd.f32 %v943_v53, %v942_v55  ;;  %v770_v51 = vadd.f32 %v769_v18, %v768_v38  ;;  %v1001_v58 = vadd.f32 %v7959_v60, %v981_v43  ;;  %v1002_v50 = vadd.f32 %v7959_v60, %v982_v20  ;;  %v7964_v38 = vld [vmem:[#allocation53_spill] sm:$0xff]  ;;  %v7966_v55 = vld [vmem:[#allocation18_spill] sm:$0xff] }
 0x39c   :  { %v860_v2 = vadd.f32 %v859_v35, %v858_v15  ;;  %v1003_v40 = vadd.f32 %v7959_v60, %v983_v25  ;;  %v1004_v17 = vadd.f32 %v7959_v60, %v984_v32  ;;  %v947_v24 = vsel %vm349_vm0, %v921_v29, 0.0  ;;  %v7960_v35 = vld [vmem:[#allocation61_spill] sm:$0xff] }
 0x39d   :  { %v946_v56 = vadd.f32 %v945_v7, %v944_v47  ;;  %771 = vst.msk [vmem:[#allocation2 + $0x2] sm:$0x1] %vm578_vm3, %v770_v51  ;;  %v949_v22 = vsel %vm349_vm0, %v922_v45, 0.0  ;;  %v1005_v14 = vadd.f32 %v7959_v60, %v985_v4  ;;  %v951_v59 = vsel %vm349_vm0, %v923_v31, 0.0  ;;  %v7967_v4 = vld [vmem:[#allocation75_spill] sm:$0xff] }
 0x39e   :  { %v861_v48 = vrot.slane %v860_v2, 4  ;;  %v953_v41 = vsel %vm349_vm0, %v924_v28, 0.0  ;;  %v1015_v30 = vmax.f32 %v999_v6, 0.0  ;;  %v955_v61 = vsel %vm349_vm0, %v925_v49, 0.0 }
 0x39f   :  { %v948_v39 = vadd.f32 %v947_v24, %v946_v56  ;;  %v1016_v16 = vmax.f32 %v1000_v11, 0.0  ;;  %v1034_v63 = vadd.f32 %v7961_v9, %v7960_v35  ;;  %v1017_v62 = vmax.f32 %v1001_v58, 0.0  ;;  %v7969_v9 = vld [vmem:[#allocation66_spill] sm:$0xff] }
 0x3a0   :  { %v862_v37 = vadd.f32 %v861_v48, %v860_v2  ;;  %v1018_v29 = vmax.f32 %v1002_v50, 0.0  ;;  %v7963_v3 = vmax.f32 %v7962_v0, 0.0  ;;  %v1019_v57 = vmax.f32 %v1003_v40, 0.0 }
 0x3a1   :  { %v950_v1 = vadd.f32 %v949_v22, %v948_v39  ;;  %v1020_v33 = vmax.f32 %v1004_v17, 0.0  ;;  %v1021_v36 = vmax.f32 %v1005_v14, 0.0  ;;  %v7965_v10 = vmax.f32 %v7964_v38, 0.0 }
 0x3a2   :  { %v1035_v45 = vsel %vm349_vm0, %v7963_v3, 0.0  ;;  %v863_v8 = vrot.slane %v862_v37, 2  ;;  %v1039_v21 = vsel %vm349_vm0, %v1015_v30, 0.0  ;;  %v1041_v53 = vsel %vm349_vm0, %v1016_v16, 0.0 }
 0x3a3   :  { %v1036_v31 = vadd.f32 %v1035_v45, %v1034_v63  ;;  %v952_v28 = vadd.f32 %v951_v59, %v950_v1  ;;  %v1037_v49 = vsel %vm349_vm0, %v7965_v10, 0.0  ;;  %v1076_v7 = vmul.f32 %v7966_v55, %v4650_v23  ;;  %v7970_v63 = vld [vmem:[#allocation79_spill] sm:$0xff]  ;;  %v7971_v45 = vld [vmem:[#allocation57_spill] sm:$0xff] }
 0x3a4   :  { %v864_v13 = vadd.f32 %v863_v8, %v862_v37  ;;  %v1077_v26 = vmul.f32 %v7966_v55, %v4655_v44  ;;  %v1078_v43 = vmul.f32 %v7966_v55, %v4659_v19  ;;  %v1079_v18 = vmul.f32 %v7966_v55, %v7801_v5 }
 0x3a5   :  { %v1038_v52 = vadd.f32 %v1037_v49, %v1036_v31  ;;  %v954_v42 = vadd.f32 %v953_v41, %v952_v28  ;;  %v1080_v25 = vmul.f32 %v7966_v55, %v7802_v27  ;;  %v1081_v47 = vmul.f32 %v7966_v55, %v4711_v46  ;;  %v7973_v28 = vld [vmem:[#allocation58_spill] sm:$0xff] }
 0x3a6   :  { %v865_v15 = vrot.slane %v864_v13, 1  ;;  %v1095_v60 = vadd.f32 %v7968_v12, %v7967_v4  ;;  %v1096_v6 = vadd.f32 %v7968_v12, %v1076_v7  ;;  %v1097_v51 = vadd.f32 %v7968_v12, %v1077_v26 }
 0x3a7   :  { %v1040_v20 = vadd.f32 %v1039_v21, %v1038_v52  ;;  %v956_v32 = vadd.f32 %v955_v61, %v954_v42  ;;  %v1098_v58 = vadd.f32 %v7968_v12, %v1078_v43  ;;  %v1099_v56 = vadd.f32 %v7968_v12, %v1079_v18 }
 0x3a8   :  { %v866_v2 = vadd.f32 %v865_v15, %v864_v13  ;;  %v1043_v40 = vsel %vm349_vm0, %v1017_v62, 0.0  ;;  %v1100_v17 = vadd.f32 %v7968_v12, %v1080_v25  ;;  %v1101_v48 = vadd.f32 %v7968_v12, %v1081_v47  ;;  %v7975_v13 = vld [vmem:[#allocation20_spill] sm:$0xff] }
 0x3a9   :  { %v1042_v11 = vadd.f32 %v1041_v53, %v1040_v20  ;;  %v957_v50 = vrot.slane %v956_v32, 4  ;;  %v1045_v22 = vsel %vm349_vm0, %v1018_v29, 0.0  ;;  %v1047_v14 = vsel %vm349_vm0, %v1019_v57, 0.0  ;;  %v7976_v47 = vld [vmem:[#allocation80_spill] sm:$0xff] }
 0x3aa   :  { %867 = vst.msk [vmem:[#allocation2 + $0x3] sm:$0x1] %vm578_vm3, %v866_v2  ;;  %v1049_v39 = vsel %vm349_vm0, %v1020_v33, 0.0  ;;  %v1051_v41 = vsel %vm349_vm0, %v1021_v36, 0.0  ;;  %v1111_v30 = vmax.f32 %v1095_v60, 0.0  ;;  %v1112_v37 = vmax.f32 %v1096_v6, 0.0 }
 0x3ab   :  { %v1044_v24 = vadd.f32 %v1043_v40, %v1042_v11  ;;  %v958_v59 = vadd.f32 %v957_v50, %v956_v32  ;;  %v1113_v16 = vmax.f32 %v1097_v51, 0.0  ;;  %v1114_v35 = vmax.f32 %v1098_v58, 0.0  ;;  %v7977_v32 = vld [vmem:[#allocation21_spill] sm:$0xff] }
 0x3ac   :  { %v1130_v1 = vadd.f32 %v7970_v63, %v7969_v9  ;;  %v1115_v0 = vmax.f32 %v1099_v56, 0.0  ;;  %v1116_v3 = vmax.f32 %v1100_v17, 0.0  ;;  %v7972_v29 = vmax.f32 %v7971_v45, 0.0  ;;  %v7979_v9 = vld [vmem:[#allocation84_spill] sm:$0xff]  ;;  %v7980_v45 = vld [vmem:[#allocation62_spill] sm:$0xff] }
 0x3ad   :  { %v1046_v61 = vadd.f32 %v1045_v22, %v1044_v24  ;;  %v959_v62 = vrot.slane %v958_v59, 2  ;;  %v1117_v33 = vmax.f32 %v1101_v48, 0.0  ;;  %v7974_v36 = vmax.f32 %v7973_v28, 0.0 }
 0x3ae   :  { %v1131_v8 = vsel %vm349_vm0, %v7972_v29, 0.0  ;;  %v1135_v49 = vsel %vm349_vm0, %v1111_v30, 0.0  ;;  %v1137_v21 = vsel %vm349_vm0, %v1112_v37, 0.0  ;;  %v1172_v52 = vmul.f32 %v7975_v13, %v4650_v23 }
 0x3af   :  { %v1048_v57 = vadd.f32 %v1047_v14, %v1046_v61  ;;  %v1132_v31 = vadd.f32 %v1131_v8, %v1130_v1  ;;  %v1133_v38 = vsel %vm349_vm0, %v7974_v36, 0.0  ;;  %v960_v10 = vadd.f32 %v959_v62, %v958_v59  ;;  %v7978_v61 = vld [vmem:[#allocation71_spill] sm:$0xff] }
 0x3b0   :  { %v1173_v7 = vmul.f32 %v7975_v13, %v4655_v44  ;;  %v1174_v42 = vmul.f32 %v7975_v13, %v4659_v19  ;;  %v1175_v43 = vmul.f32 %v7975_v13, %v7801_v5  ;;  %v1176_v18 = vmul.f32 %v7975_v13, %v7802_v27 }
 0x3b1   :  { %v1050_v53 = vadd.f32 %v1049_v39, %v1048_v57  ;;  %v1134_v55 = vadd.f32 %v1133_v38, %v1132_v31  ;;  %v961_v26 = vrot.slane %v960_v10, 1  ;;  %v1177_v15 = vmul.f32 %v7975_v13, %v4711_v46  ;;  %v7982_v57 = vld [vmem:[#allocation63_spill] sm:$0xff] }
 0x3b2   :  { %v1191_v4 = vadd.f32 %v7977_v32, %v7976_v47  ;;  %v1192_v12 = vadd.f32 %v7977_v32, %v1172_v52  ;;  %v1193_v6 = vadd.f32 %v7977_v32, %v1173_v7  ;;  %v1194_v51 = vadd.f32 %v7977_v32, %v1174_v42 }
 0x3b3   :  { %v1052_v20 = vadd.f32 %v1051_v41, %v1050_v53  ;;  %v1136_v25 = vadd.f32 %v1135_v49, %v1134_v55  ;;  %v962_v60 = vadd.f32 %v961_v26, %v960_v10  ;;  %v1195_v2 = vadd.f32 %v7977_v32, %v1175_v43 }
 0x3b4   :  { %v1196_v56 = vadd.f32 %v7977_v32, %v1176_v18  ;;  %v1197_v50 = vadd.f32 %v7977_v32, %v1177_v15  ;;  %v1139_v40 = vsel %vm349_vm0, %v1113_v16, 0.0  ;;  %v1141_v17 = vsel %vm349_vm0, %v1114_v35, 0.0  ;;  %v7985_v15 = vld [vmem:[#allocation85_spill] sm:$0xff] }
 0x3b5   :  { %v1053_v11 = vrot.slane %v1052_v20, 4  ;;  %v1138_v58 = vadd.f32 %v1137_v21, %v1136_v25  ;;  %963 = vst.msk [vmem:[#allocation2 + $0x4] sm:$0x1] %vm578_vm3, %v962_v60  ;;  %v1143_v48 = vsel %vm349_vm0, %v1115_v0, 0.0  ;;  %v1145_v24 = vsel %vm349_vm0, %v1116_v3, 0.0  ;;  %v7984_v21 = vld [vmem:[#allocation22_spill] sm:$0xff] }
 0x3b6   :  { %v1207_v39 = vmax.f32 %v1191_v4, 0.0  ;;  %v1208_v59 = vmax.f32 %v1192_v12, 0.0  ;;  %v1147_v41 = vsel %vm349_vm0, %v1117_v33, 0.0  ;;  %v1209_v30 = vmax.f32 %v1193_v6, 0.0 }
 0x3b7   :  { %v1054_v22 = vadd.f32 %v1053_v11, %v1052_v20  ;;  %v1140_v14 = vadd.f32 %v1139_v40, %v1138_v58  ;;  %v1210_v37 = vmax.f32 %v1194_v51, 0.0  ;;  %v1226_v63 = vadd.f32 %v7979_v9, %v7978_v61  ;;  %v7986_v20 = vld [vmem:[#allocation25_spill] sm:$0xff] }
 0x3b8   :  { %v1211_v16 = vmax.f32 %v1195_v2, 0.0  ;;  %v7981_v35 = vmax.f32 %v7980_v45, 0.0  ;;  %v1212_v29 = vmax.f32 %v1196_v56, 0.0  ;;  %v1213_v3 = vmax.f32 %v1197_v50, 0.0  ;;  %v7988_v61 = vld [vmem:[#allocation89_spill] sm:$0xff] }
 0x3b9   :  { %v1055_v1 = vrot.slane %v1054_v22, 2  ;;  %v1142_v62 = vadd.f32 %v1141_v17, %v1140_v14  ;;  %v7983_v31 = vmax.f32 %v7982_v57, 0.0  ;;  %v1231_v38 = vsel %vm349_vm0, %v1207_v39, 0.0  ;;  %v7991_v57 = vld [vmem:[#allocation68_spill] sm:$0xff] }
 0x3ba   :  { %v1227_v0 = vsel %vm349_vm0, %v7981_v35, 0.0  ;;  %v1233_v10 = vsel %vm349_vm0, %v1208_v59, 0.0  ;;  %v1268_v13 = vmul.f32 %v7984_v21, %v4650_v23  ;;  %v1269_v52 = vmul.f32 %v7984_v21, %v4655_v44 }
 0x3bb   :  { %v1228_v8 = vadd.f32 %v1227_v0, %v1226_v63  ;;  %v1229_v28 = vsel %vm349_vm0, %v7983_v31, 0.0  ;;  %v1056_v33 = vadd.f32 %v1055_v1, %v1054_v22  ;;  %v1144_v36 = vadd.f32 %v1143_v48, %v1142_v62 }
 0x3bc   :  { %v1270_v53 = vmul.f32 %v7984_v21, %v4659_v19  ;;  %v1271_v42 = vmul.f32 %v7984_v21, %v7801_v5  ;;  %v1272_v26 = vmul.f32 %v7984_v21, %v7802_v27  ;;  %v1273_v18 = vmul.f32 %v7984_v21, %v4711_v46 }
 0x3bd   :  { %v1230_v49 = vadd.f32 %v1229_v28, %v1228_v8  ;;  %v1057_v55 = vrot.slane %v1056_v33, 1  ;;  %v1146_v7 = vadd.f32 %v1145_v24, %v1144_v36  ;;  %v1287_v25 = vadd.f32 %v7986_v20, %v7985_v15 }
 0x3be   :  { %v1288_v47 = vadd.f32 %v7986_v20, %v1268_v13  ;;  %v1289_v12 = vadd.f32 %v7986_v20, %v1269_v52  ;;  %v1290_v60 = vadd.f32 %v7986_v20, %v1270_v53  ;;  %v1291_v51 = vadd.f32 %v7986_v20, %v1271_v42 }
 0x3bf   :  { %v1232_v43 = vadd.f32 %v1231_v38, %v1230_v49  ;;  %v1058_v32 = vadd.f32 %v1057_v55, %v1056_v33  ;;  %v1148_v4 = vadd.f32 %v1147_v41, %v1146_v7  ;;  %v1292_v2 = vadd.f32 %v7986_v20, %v1272_v26  ;;  %v7987_v41 = vld [vmem:[#allocation76_spill] sm:$0xff] }
 0x3c0   :  { %v1293_v11 = vadd.f32 %v7986_v20, %v1273_v18  ;;  %v1235_v56 = vsel %vm349_vm0, %v1209_v30, 0.0  ;;  %v1237_v50 = vsel %vm349_vm0, %v1210_v37, 0.0  ;;  %v1239_v40 = vsel %vm349_vm0, %v1211_v16, 0.0  ;;  %v7989_v30 = vld [vmem:[#allocation67_spill] sm:$0xff] }
 0x3c1   :  { %v1234_v6 = vadd.f32 %v1233_v10, %v1232_v43  ;;  %1059 = vst.msk [vmem:[#allocation2 + $0x5] sm:$0x1] %vm578_vm3, %v1058_v32  ;;  %v1149_v58 = vrot.slane %v1148_v4, 4  ;;  %v1241_v48 = vsel %vm349_vm0, %v1212_v29, 0.0  ;;  %v1303_v24 = vmax.f32 %v1287_v25, 0.0  ;;  %v7993_v10 = vld [vmem:[#allocation26_spill] sm:$0xff] }
 0x3c2   :  { %v1304_v22 = vmax.f32 %v1288_v47, 0.0  ;;  %v1243_v39 = vsel %vm349_vm0, %v1213_v3, 0.0  ;;  %v1305_v59 = vmax.f32 %v1289_v12, 0.0  ;;  %v1322_v9 = vadd.f32 %v7988_v61, %v7987_v41  ;;  %v7994_v43 = vld [vmem:[#allocation90_spill] sm:$0xff]  ;;  %v7995_v18 = vld [vmem:[#allocation27_spill] sm:$0xff] }
 0x3c3   :  { %v1236_v17 = vadd.f32 %v1235_v56, %v1234_v6  ;;  %v1150_v14 = vadd.f32 %v1149_v58, %v1148_v4  ;;  %v1306_v1 = vmax.f32 %v1290_v60, 0.0  ;;  %v1307_v62 = vmax.f32 %v1291_v51, 0.0 }
 0x3c4   :  { %v7990_v45 = vmax.f32 %v7989_v30, 0.0  ;;  %v1308_v35 = vmax.f32 %v1292_v2, 0.0  ;;  %v1309_v0 = vmax.f32 %v1293_v11, 0.0  ;;  %v7992_v31 = vmax.f32 %v7991_v57, 0.0 }
 0x3c5   :  { %v1238_v63 = vadd.f32 %v1237_v50, %v1236_v17  ;;  %v1151_v16 = vrot.slane %v1150_v14, 2  ;;  %v1327_v28 = vsel %vm349_vm0, %v1303_v24, 0.0  ;;  %v1329_v33 = vsel %vm349_vm0, %v1304_v22, 0.0 }
 0x3c6   :  { %v1323_v37 = vsel %vm349_vm0, %v7990_v45, 0.0  ;;  %v1325_v3 = vsel %vm349_vm0, %v7992_v31, 0.0  ;;  %v1364_v49 = vmul.f32 %v7993_v10, %v4650_v23  ;;  %v1365_v21 = vmul.f32 %v7993_v10, %v4655_v44 }
 0x3c7   :  { %v1324_v29 = vadd.f32 %v1323_v37, %v1322_v9  ;;  %v1240_v8 = vadd.f32 %v1239_v40, %v1238_v63  ;;  %v1152_v36 = vadd.f32 %v1151_v16, %v1150_v14  ;;  %v1366_v52 = vmul.f32 %v7993_v10, %v4659_v19  ;;  %v7996_v14 = vld [vmem:[#allocation81_spill] sm:$0xff]  ;;  %v7998_v63 = vld [vmem:[#allocation72_spill] sm:$0xff] }
 0x3c8   :  { %v1367_v53 = vmul.f32 %v7993_v10, %v7801_v5  ;;  %v1368_v55 = vmul.f32 %v7993_v10, %v7802_v27  ;;  %v1369_v26 = vmul.f32 %v7993_v10, %v4711_v46  ;;  %v1383_v15 = vadd.f32 %v7995_v18, %v7994_v43  ;;  %v8004_v43 = vld [vmem:[#allocation29_spill] sm:$0xff] }
 0x3c9   :  { %v1326_v38 = vadd.f32 %v1325_v3, %v1324_v29  ;;  %v1242_v13 = vadd.f32 %v1241_v48, %v1240_v8  ;;  %v1153_v7 = vrot.slane %v1152_v36, 1  ;;  %v1384_v25 = vadd.f32 %v7995_v18, %v1364_v49  ;;  %v8000_v8 = vld [vmem:[#allocation73_spill] sm:$0xff] }
 0x3ca   :  { %v1385_v47 = vadd.f32 %v7995_v18, %v1365_v21  ;;  %v1386_v32 = vadd.f32 %v7995_v18, %v1366_v52  ;;  %v1387_v60 = vadd.f32 %v7995_v18, %v1367_v53  ;;  %v1388_v6 = vadd.f32 %v7995_v18, %v1368_v55 }
 0x3cb   :  { %v1328_v42 = vadd.f32 %v1327_v28, %v1326_v38  ;;  %v1244_v20 = vadd.f32 %v1243_v39, %v1242_v13  ;;  %v1154_v4 = vadd.f32 %v1153_v7, %v1152_v36  ;;  %v1331_v2 = vsel %vm349_vm0, %v1305_v59, 0.0  ;;  %v7997_v39 = vld [vmem:[#allocation92_spill] sm:$0xff] }
 0x3cc   :  { %v1333_v11 = vsel %vm349_vm0, %v1306_v1, 0.0  ;;  %v1389_v58 = vadd.f32 %v7995_v18, %v1369_v26  ;;  %v1335_v50 = vsel %vm349_vm0, %v1307_v62, 0.0  ;;  %v1337_v40 = vsel %vm349_vm0, %v1308_v35, 0.0  ;;  %v8002_v36 = vld [vmem:[#allocation28_spill] sm:$0xff]  ;;  %v8003_v26 = vld [vmem:[#allocation93_spill] sm:$0xff] }
 0x3cd   :  { %v1330_v12 = vadd.f32 %v1329_v33, %v1328_v42  ;;  %v1245_v51 = vrot.slane %v1244_v20, 4  ;;  %1155 = vst.msk [vmem:[#allocation2 + $0x6] sm:$0x1] %vm578_vm3, %v1154_v4  ;;  %v1399_v17 = vmax.f32 %v1383_v15, 0.0  ;;  %v1339_v24 = vsel %vm349_vm0, %v1309_v0, 0.0 }
 0x3ce   :  { %v1400_v22 = vmax.f32 %v1384_v25, 0.0  ;;  %v1418_v41 = vadd.f32 %v7997_v39, %v7996_v14  ;;  %v1401_v61 = vmax.f32 %v1385_v47, 0.0  ;;  %v1402_v9 = vmax.f32 %v1386_v32, 0.0  ;;  %v8005_v39 = vld [vmem:[#allocation86_spill] sm:$0xff] }
 0x3cf   :  { %v1332_v56 = vadd.f32 %v1331_v2, %v1330_v12  ;;  %v1246_v48 = vadd.f32 %v1245_v51, %v1244_v20  ;;  %v7999_v1 = vmax.f32 %v7998_v63, 0.0  ;;  %v1403_v37 = vmax.f32 %v1387_v60, 0.0 }
 0x3d0   :  { %v1404_v62 = vmax.f32 %v1388_v6, 0.0  ;;  %v1405_v29 = vmax.f32 %v1389_v58, 0.0  ;;  %v8001_v57 = vmax.f32 %v8000_v8, 0.0  ;;  %v1423_v31 = vsel %vm349_vm0, %v1399_v17, 0.0 }
 0x3d1   :  { %v1334_v59 = vadd.f32 %v1333_v11, %v1332_v56  ;;  %v1419_v30 = vsel %vm349_vm0, %v7999_v1, 0.0  ;;  %v1247_v45 = vrot.slane %v1246_v48, 2  ;;  %v1425_v33 = vsel %vm349_vm0, %v1400_v22, 0.0 }
 0x3d2   :  { %v1420_v16 = vadd.f32 %v1419_v30, %v1418_v41  ;;  %v1421_v0 = vsel %vm349_vm0, %v8001_v57, 0.0  ;;  %v1460_v38 = vmul.f32 %v8002_v36, %v4650_v23  ;;  %v1461_v49 = vmul.f32 %v8002_v36, %v4655_v44  ;;  %v8006_v41 = vld [vmem:[#allocation95_spill] sm:$0xff]  ;;  %v8007_v30 = vld [vmem:[#allocation77_spill] sm:$0xff] }
 0x3d3   :  { %v1336_v35 = vadd.f32 %v1335_v50, %v1334_v59  ;;  %v1248_v3 = vadd.f32 %v1247_v45, %v1246_v48  ;;  %v1462_v21 = vmul.f32 %v8002_v36, %v4659_v19  ;;  %v1463_v13 = vmul.f32 %v8002_v36, %v7801_v5 }
 0x3d4   :  { %v1422_v28 = vadd.f32 %v1421_v0, %v1420_v16  ;;  %v1464_v55 = vmul.f32 %v8002_v36, %v7802_v27  ;;  %v1465_v7 = vmul.f32 %v8002_v36, %v4711_v46  ;;  %v1479_v18 = vadd.f32 %v8004_v43, %v8003_v26 }
 0x3d5   :  { %v1338_v10 = vadd.f32 %v1337_v40, %v1336_v35  ;;  %v1249_v52 = vrot.slane %v1248_v3, 1  ;;  %v1480_v15 = vadd.f32 %v8004_v43, %v1460_v38  ;;  %v1481_v20 = vadd.f32 %v8004_v43, %v1461_v49  ;;  %v8009_v35 = vld [vmem:[#allocation78_spill] sm:$0xff] }
 0x3d6   :  { %v1424_v53 = vadd.f32 %v1423_v31, %v1422_v28  ;;  %v1482_v32 = vadd.f32 %v8004_v43, %v1462_v21  ;;  %v1483_v4 = vadd.f32 %v8004_v43, %v1463_v13  ;;  %v1427_v60 = vsel %vm349_vm0, %v1401_v61, 0.0 }
 0x3d7   :  { %v1340_v42 = vadd.f32 %v1339_v24, %v1338_v10  ;;  %v1250_v25 = vadd.f32 %v1249_v52, %v1248_v3  ;;  %v1484_v6 = vadd.f32 %v8004_v43, %v1464_v55  ;;  %v1485_v51 = vadd.f32 %v8004_v43, %v1465_v7  ;;  %v8011_v3 = vld [vmem:[#allocation30_spill] sm:$0xff]  ;;  %v8012_v7 = vld [vmem:[#allocation96_spill] sm:$0xff] }
 0x3d8   :  { %v1426_v47 = vadd.f32 %v1425_v33, %v1424_v53  ;;  %v1429_v11 = vsel %vm349_vm0, %v1402_v9, 0.0  ;;  %v1431_v58 = vsel %vm349_vm0, %v1403_v37, 0.0  ;;  %v1433_v56 = vsel %vm349_vm0, %v1404_v62, 0.0 }
 0x3d9   :  { %v1341_v12 = vrot.slane %v1340_v42, 4  ;;  %1251 = vst.msk [vmem:[#allocation2 + $0x7] sm:$0x1] %vm578_vm3, %v1250_v25  ;;  %v1435_v40 = vsel %vm349_vm0, %v1405_v29, 0.0  ;;  %v1495_v17 = vmax.f32 %v1479_v18, 0.0  ;;  %v1496_v48 = vmax.f32 %v1480_v15, 0.0 }
 0x3da   :  { %v1428_v2 = vadd.f32 %v1427_v60, %v1426_v47  ;;  %v1497_v22 = vmax.f32 %v1481_v20, 0.0  ;;  %v1498_v14 = vmax.f32 %v1482_v32, 0.0  ;;  %v1514_v59 = vadd.f32 %v8006_v41, %v8005_v39  ;;  %v8014_v60 = vld [vmem:[#allocation117_spill] sm:$0xff] }
 0x3db   :  { %v1342_v50 = vadd.f32 %v1341_v12, %v1340_v42  ;;  %v1499_v63 = vmax.f32 %v1483_v4, 0.0  ;;  %v1500_v1 = vmax.f32 %v1484_v6, 0.0  ;;  %v8008_v9 = vmax.f32 %v8007_v30, 0.0  ;;  %v8013_v42 = vld [vmem:[#allocation33_spill] sm:$0xff] }
 0x3dc   :  { %v1430_v24 = vadd.f32 %v1429_v11, %v1428_v2  ;;  %v1501_v62 = vmax.f32 %v1485_v51, 0.0  ;;  %v8010_v29 = vmax.f32 %v8009_v35, 0.0  ;;  %v1519_v0 = vsel %vm349_vm0, %v1495_v17, 0.0  ;;  %v8015_v51 = vld [vmem:[#allocation118_spill] sm:$0xff]  ;;  %v8016_v11 = vld [vmem:[#allocation124_spill] sm:$0xff] }
 0x3dd   :  { %v1343_v61 = vrot.slane %v1342_v50, 2  ;;  %v1515_v45 = vsel %vm349_vm0, %v8008_v9, 0.0  ;;  %v1521_v31 = vsel %vm349_vm0, %v1496_v48, 0.0  ;;  %v1556_v28 = vmul.f32 %v8011_v3, %v4650_v23 }
 0x3de   :  { %v1432_v37 = vadd.f32 %v1431_v58, %v1430_v24  ;;  %v1516_v16 = vadd.f32 %v1515_v45, %v1514_v59  ;;  %v1517_v8 = vsel %vm349_vm0, %v8010_v29, 0.0  ;;  %v1557_v38 = vmul.f32 %v8011_v3, %v4655_v44  ;;  %v8017_v59 = vld [vmem:[#allocation91_spill] sm:$0xff] }
 0x3df   :  { %v1344_v57 = vadd.f32 %v1343_v61, %v1342_v50  ;;  %v1558_v10 = vmul.f32 %v8011_v3, %v4659_v19  ;;  %v1559_v21 = vmul.f32 %v8011_v3, %v7801_v5  ;;  %v1560_v13 = vmul.f32 %v8011_v3, %v7802_v27  ;;  %v8018_v61 = vld [vmem:[#allocation97_spill] sm:$0xff] }
 0x3e0   :  { %v1434_v33 = vadd.f32 %v1433_v56, %v1432_v37  ;;  %v1518_v36 = vadd.f32 %v1517_v8, %v1516_v16  ;;  %v1561_v52 = vmul.f32 %v8011_v3, %v4711_v46  ;;  %v1575_v26 = vadd.f32 %v8013_v42, %v8012_v7  ;;  %v8019_v37 = vld [vmem:[#allocation82_spill] sm:$0xff]  ;;  %v8025_v7 = vld [vmem:[#allocation36_spill] sm:$0xff] }
 0x3e1   :  { %v1345_v49 = vrot.slane %v1344_v57, 1  ;;  %v1576_v43 = vadd.f32 %v8013_v42, %v1556_v28  ;;  %v1577_v15 = vadd.f32 %v8013_v42, %v1557_v38  ;;  %v7202_v20 = vadd.f32 %v8013_v42, %v1558_v10 }
 0x3e2   :  { %v1436_v53 = vadd.f32 %v1435_v40, %v1434_v33  ;;  %v1520_v55 = vadd.f32 %v1519_v0, %v1518_v36  ;;  %v7205_v25 = vadd.f32 %v8013_v42, %v1559_v21  ;;  %v7208_v4 = vadd.f32 %v8013_v42, %v1560_v13 }
 0x3e3   :  { %v1346_v18 = vadd.f32 %v1345_v49, %v1344_v57  ;;  %v7211_v12 = vadd.f32 %v8013_v42, %v1561_v52  ;;  %v1971_v6 = vmax.f32 %v8014_v60, 0.0  ;;  %v1972_v2 = vmax.f32 %v8015_v51, 0.0 }
 0x3e4   :  { %v1437_v47 = vrot.slane %v1436_v53, 4  ;;  %v1522_v32 = vadd.f32 %v1521_v31, %v1520_v55  ;;  %v1986_v58 = vadd.f32 %v8016_v11, %v6915_v34  ;;  %v1523_v56 = vsel %vm349_vm0, %v1497_v22, 0.0  ;;  %v8024_v55 = vld [vmem:[#allocation98_spill] sm:$0xff] }
 0x3e5   :  { %1347 = vst.msk [vmem:[#allocation2 + $0x8] sm:$0x1] %vm578_vm3, %v1346_v18  ;;  %v1591_v17 = vmax.f32 %v1575_v26, 0.0  ;;  %v1592_v48 = vmax.f32 %v1576_v43, 0.0  ;;  %v1525_v24 = vsel %vm349_vm0, %v1498_v14, 0.0  ;;  %v1527_v39 = vsel %vm349_vm0, %v1499_v63, 0.0 }
 0x3e6   :  { %v1438_v50 = vadd.f32 %v1437_v47, %v1436_v53  ;;  %v1524_v40 = vadd.f32 %v1523_v56, %v1522_v32  ;;  %v1529_v41 = vsel %vm349_vm0, %v1500_v1, 0.0  ;;  %v1610_v30 = vadd.f32 %v8018_v61, %v8017_v59  ;;  %v8021_v14 = vld [vmem:[#allocation83_spill] sm:$0xff]  ;;  %v8029_v61 = vld [vmem:[#allocation120_spill] sm:$0xff] }
 0x3e7   :  { %v1531_v34 = vsel %vm349_vm0, %v1501_v62, 0.0  ;;  %v8020_v16 = vmax.f32 %v8019_v37, 0.0  ;;  %v1593_v35 = vmax.f32 %v1577_v15, 0.0  ;;  %v1594_v29 = vmax.f32 %v7202_v20, 0.0  ;;  %v8023_v62 = vld [vmem:[#allocation35_spill] sm:$0xff] }
 0x3e8   :  { %v1439_v9 = vrot.slane %v1438_v50, 2  ;;  %v1526_v45 = vadd.f32 %v1525_v24, %v1524_v40  ;;  %v8022_v57 = vmax.f32 %v8021_v14, 0.0  ;;  %v1615_v31 = vsel %vm349_vm0, %v1591_v17, 0.0 }
 0x3e9   :  { %v1611_v22 = vsel %vm349_vm0, %v8020_v16, 0.0  ;;  %v1617_v3 = vsel %vm349_vm0, %v1592_v48, 0.0  ;;  %v1652_v33 = vmul.f32 %v8023_v62, %v4650_v23  ;;  %v1653_v36 = vmul.f32 %v8023_v62, %v4655_v44 }
 0x3ea   :  { %v1612_v8 = vadd.f32 %v1611_v22, %v1610_v30  ;;  %v1613_v63 = vsel %vm349_vm0, %v8022_v57, 0.0  ;;  %v1440_v1 = vadd.f32 %v1439_v9, %v1438_v50  ;;  %v1528_v0 = vadd.f32 %v1527_v39, %v1526_v45  ;;  %v8026_v50 = vld [vmem:[#allocation115_spill] sm:$0xff] }
 0x3eb   :  { %v1654_v38 = vmul.f32 %v8023_v62, %v4659_v19  ;;  %v1655_v21 = vmul.f32 %v8023_v62, %v7801_v5  ;;  %v1656_v13 = vmul.f32 %v8023_v62, %v7802_v27  ;;  %v1657_v53 = vmul.f32 %v8023_v62, %v4711_v46  ;;  %v8030_v22 = vld [vmem:[#allocation99_spill] sm:$0xff] }
 0x3ec   :  { %v1614_v28 = vadd.f32 %v1613_v63, %v1612_v8  ;;  %v1441_v10 = vrot.slane %v1440_v1, 1  ;;  %v1530_v49 = vadd.f32 %v1529_v41, %v1528_v0  ;;  %v1671_v42 = vadd.f32 %v8025_v7, %v8024_v55  ;;  %v8028_v41 = vld [vmem:[#allocation119_spill] sm:$0xff]  ;;  %v8031_v8 = vld [vmem:[#allocation101_spill] sm:$0xff] }
 0x3ed   :  { %v1672_v26 = vadd.f32 %v8025_v7, %v1652_v33  ;;  %v1673_v15 = vadd.f32 %v8025_v7, %v1653_v36  ;;  %v1674_v20 = vadd.f32 %v8025_v7, %v1654_v38  ;;  %v1675_v32 = vadd.f32 %v8025_v7, %v1655_v21  ;;  %v8036_v36 = vld [vmem:[#allocation88_spill] sm:$0xff] }
 0x3ee   :  { %v1616_v52 = vadd.f32 %v1615_v31, %v1614_v28  ;;  %v1442_v43 = vadd.f32 %v1441_v10, %v1440_v1  ;;  %v1532_v18 = vadd.f32 %v1531_v34, %v1530_v49  ;;  %v7253_v11 = vadd.f32 %v8025_v7, %v1656_v13  ;;  %v8032_v1 = vld [vmem:[#allocation87_spill] sm:$0xff]  ;;  %v8034_v31 = vld [vmem:[#allocation116_spill] sm:$0xff] }
 0x3ef   :  { %v7256_v56 = vadd.f32 %v8025_v7, %v1657_v53  ;;  %v8027_v40 = vmax.f32 %v8026_v50, 0.0  ;;  %v1595_v24 = vmax.f32 %v7205_v25, 0.0  ;;  %v1619_v39 = vsel %vm349_vm0, %v1593_v35, 0.0 }
 0x3f0   :  { %v1618_v47 = vadd.f32 %v1617_v3, %v1616_v52  ;;  %1443 = vst.msk [vmem:[#allocation2 + $0x9] sm:$0x1] %vm578_vm3, %v1442_v43  ;;  %v1533_v48 = vrot.slane %v1532_v18, 4  ;;  %v1973_v59 = vmax.f32 %v8028_v41, 0.0  ;;  %v1974_v30 = vmax.f32 %v8029_v61, 0.0 }
 0x3f1   :  { %v1987_v17 = vsel %vm349_vm0, %v8027_v40, 0.0  ;;  %v1596_v37 = vmax.f32 %v7208_v4, 0.0  ;;  %v1621_v16 = vsel %vm349_vm0, %v1594_v29, 0.0  ;;  %v1706_v14 = vadd.f32 %v8031_v8, %v8030_v22 }
 0x3f2   :  { %v1988_v9 = vadd.f32 %v1987_v17, %v1986_v58  ;;  %v1620_v45 = vadd.f32 %v1619_v39, %v1618_v47  ;;  %v1534_v34 = vadd.f32 %v1533_v48, %v1532_v18  ;;  %v1597_v57 = vmax.f32 %v7211_v12, 0.0 }
 0x3f3   :  { %v1687_v25 = vmax.f32 %v1671_v42, 0.0  ;;  %v8033_v35 = vmax.f32 %v8032_v1, 0.0  ;;  %v8035_v3 = vmax.f32 %v8034_v31, 0.0  ;;  %v1623_v4 = vsel %vm349_vm0, %v1595_v24, 0.0 }
 0x3f4   :  { %v1622_v63 = vadd.f32 %v1621_v16, %v1620_v45  ;;  %v1535_v28 = vrot.slane %v1534_v34, 2  ;;  %v7281_v29 = vsel %vm349_vm0, %v1971_v6, 0.0  ;;  %v1688_v33 = vmax.f32 %v1672_v26, 0.0  ;;  %v8038_v26 = vld [vmem:[#allocation37_spill] sm:$0xff] }
 0x3f5   :  { %v1707_v0 = vsel %vm349_vm0, %v8033_v35, 0.0  ;;  %v1989_v58 = vsel %vm349_vm0, %v8035_v3, 0.0  ;;  %v8037_v38 = vmax.f32 %v8036_v36, 0.0  ;;  %v1625_v13 = vsel %vm349_vm0, %v1596_v37, 0.0  ;;  %v8043_v3 = vld [vmem:[#allocation102_spill] sm:$0xff] }
 0x3f6   :  { %v1708_v62 = vadd.f32 %v1707_v0, %v1706_v14  ;;  %v1624_v12 = vadd.f32 %v1623_v4, %v1622_v63  ;;  %v1990_v49 = vadd.f32 %v1989_v58, %v1988_v9  ;;  %v1536_v21 = vadd.f32 %v1535_v28, %v1534_v34  ;;  %v8040_v9 = vld [vmem:[#allocation94_spill] sm:$0xff] }
 0x3f7   :  { %v1709_v10 = vsel %vm349_vm0, %v8037_v38, 0.0  ;;  %v1627_v55 = vsel %vm349_vm0, %v1597_v57, 0.0  ;;  %v1689_v7 = vmax.f32 %v1673_v15, 0.0  ;;  %v1711_v60 = vsel %vm349_vm0, %v1687_v25, 0.0  ;;  %v8039_v15 = vld [vmem:[#allocation104_spill] sm:$0xff]  ;;  %v8041_v63 = vld [vmem:[#allocation110_spill] sm:$0xff] }
 0x3f8   :  { %v1710_v52 = vadd.f32 %v1709_v10, %v1708_v62  ;;  %v1626_v53 = vadd.f32 %v1625_v13, %v1624_v12  ;;  %v1537_v42 = vrot.slane %v1536_v21, 1  ;;  %v1690_v6 = vmax.f32 %v1674_v20, 0.0  ;;  %v8042_v25 = vld [vmem:[#allocation107_spill] sm:$0xff] }
 0x3f9   :  { %v1748_v18 = vmul.f32 %v8038_v26, %v4650_v23  ;;  %v1691_v50 = vmax.f32 %v1675_v32, 0.0  ;;  %v1692_v40 = vmax.f32 %v7253_v11, 0.0  ;;  %v1713_v17 = vsel %vm349_vm0, %v1688_v33, 0.0 }
 0x3fa   :  { %v1712_v43 = vadd.f32 %v1711_v60, %v1710_v52  ;;  %v1628_v47 = vadd.f32 %v1627_v55, %v1626_v53  ;;  %v1538_v48 = vadd.f32 %v1537_v42, %v1536_v21  ;;  %v1749_v39 = vmul.f32 %v8038_v26, %v4655_v44  ;;  %v8045_v21 = vld [vmem:[#allocation105_spill] sm:$0xff] }
 0x3fb   :  { %v1767_v45 = vadd.f32 %v8040_v9, %v8039_v15  ;;  %v1693_v20 = vmax.f32 %v7256_v56, 0.0  ;;  %v1715_v37 = vsel %vm349_vm0, %v1689_v7, 0.0  ;;  %v1750_v32 = vmul.f32 %v8038_v26, %v4659_v19 }
 0x3fc   :  { %v1714_v24 = vadd.f32 %v1713_v17, %v1712_v43  ;;  %v1629_v34 = vrot.slane %v1628_v47, 4  ;;  %1539 = vst.msk [vmem:[#allocation2 + $0xa] sm:$0x1] %vm578_vm3, %v1538_v48  ;;  %v1717_v16 = vsel %vm349_vm0, %v1690_v6, 0.0  ;;  %v1751_v22 = vmul.f32 %v8038_v26, %v7801_v5 }
 0x3fd   :  { %v1768_v8 = vadd.f32 %v8040_v9, %v1748_v18  ;;  %v1719_v57 = vsel %vm349_vm0, %v1691_v50, 0.0  ;;  %v1752_v56 = vmul.f32 %v8038_v26, %v7802_v27  ;;  %v1802_v1 = vadd.f32 %v8042_v25, %v8041_v63 }
 0x3fe   :  { %v1716_v11 = vadd.f32 %v1715_v37, %v1714_v24  ;;  %v1630_v14 = vadd.f32 %v1629_v34, %v1628_v47  ;;  %v1769_v0 = vadd.f32 %v8040_v9, %v1749_v39  ;;  %v1783_v31 = vmax.f32 %v1767_v45, 0.0 }
 0x3ff   :  { %v8044_v58 = vmax.f32 %v8043_v3, 0.0  ;;  %v1753_v62 = vmul.f32 %v8038_v26, %v4711_v46  ;;  %v1770_v12 = vadd.f32 %v8040_v9, %v1750_v32  ;;  %v1771_v38 = vadd.f32 %v8040_v9, %v1751_v22  ;;  %v8049_v22 = vld [vmem:[#allocation103_spill] sm:$0xff]  ;;  %v8050_v3 = vld [vmem:[#allocation121_spill] sm:$0xff] }
 0x400   :  { %v1718_v35 = vadd.f32 %v1717_v16, %v1716_v11  ;;  %v1631_v4 = vrot.slane %v1630_v14, 2  ;;  %v1784_v10 = vmax.f32 %v1768_v8, 0.0  ;;  %v8046_v13 = vmax.f32 %v8045_v21, 0.0  ;;  %v8048_v16 = vld [vmem:[#allocation108_spill] sm:$0xff] }
 0x401   :  { %v1803_v28 = vsel %vm349_vm0, %v8044_v58, 0.0  ;;  %v1721_v55 = vsel %vm349_vm0, %v1692_v40, 0.0  ;;  %v1772_v7 = vadd.f32 %v8040_v9, %v1752_v56  ;;  %v1723_v6 = vsel %vm349_vm0, %v1693_v20, 0.0  ;;  %v8047_v40 = vld [vmem:[#allocation100_spill] sm:$0xff]  ;;  %v8051_v58 = vld [vmem:[#allocation113_spill] sm:$0xff] }
 0x402   :  { %v1804_v33 = vadd.f32 %v1803_v28, %v1802_v1  ;;  %v1720_v36 = vadd.f32 %v1719_v57, %v1718_v35  ;;  %v1805_v52 = vsel %vm349_vm0, %v8046_v13, 0.0  ;;  %v1632_v53 = vadd.f32 %v1631_v4, %v1630_v14 }
 0x403   :  { %v1785_v43 = vmax.f32 %v1769_v0, 0.0  ;;  %v1807_v26 = vsel %vm349_vm0, %v1783_v31, 0.0  ;;  %v1773_v47 = vadd.f32 %v8040_v9, %v1753_v62  ;;  %v1786_v50 = vmax.f32 %v1770_v12, 0.0 }
 0x404   :  { %v1806_v60 = vadd.f32 %v1805_v52, %v1804_v33  ;;  %v1722_v42 = vadd.f32 %v1721_v55, %v1720_v36  ;;  %v1633_v18 = vrot.slane %v1632_v53, 1  ;;  %v1787_v24 = vmax.f32 %v1771_v38, 0.0  ;;  %v8052_v33 = vld [vmem:[#allocation109_spill] sm:$0xff] }
 0x405   :  { %v1809_v39 = vsel %vm349_vm0, %v1784_v10, 0.0  ;;  %v1844_v15 = vmul.f32 %v8047_v40, %v4650_v23  ;;  %v7331_v45 = vadd.f32 %v7281_v29, %v1990_v49  ;;  %v1788_v20 = vmax.f32 %v1772_v7, 0.0 }
 0x406   :  { %v1808_v17 = vadd.f32 %v1807_v26, %v1806_v60  ;;  %v1724_v48 = vadd.f32 %v1723_v6, %v1722_v42  ;;  %v1634_v34 = vadd.f32 %v1633_v18, %v1632_v53  ;;  %v1811_v11 = vsel %vm349_vm0, %v1785_v43, 0.0  ;;  %v8054_v60 = vld [vmem:[#allocation111_spill] sm:$0xff] }
 0x407   :  { %v1845_v9 = vmul.f32 %v8047_v40, %v4655_v44  ;;  %v1863_v8 = vadd.f32 %v8049_v22, %v8048_v16  ;;  %v1789_v14 = vmax.f32 %v1773_v47, 0.0  ;;  %v1813_v56 = vsel %vm349_vm0, %v1786_v50, 0.0 }
 0x408   :  { %v1810_v37 = vadd.f32 %v1809_v39, %v1808_v17  ;;  %v1725_v32 = vrot.slane %v1724_v48, 4  ;;  %1635 = vst.msk [vmem:[#allocation2 + $0xb] sm:$0x1] %vm578_vm3, %v1634_v34  ;;  %v1846_v29 = vmul.f32 %v8047_v40, %v4659_v19  ;;  %v1815_v63 = vsel %vm349_vm0, %v1787_v24, 0.0  ;;  %v8056_v34 = vld [vmem:[#allocation106_spill] sm:$0xff] }
 0x409   :  { %v1847_v25 = vmul.f32 %v8047_v40, %v7801_v5  ;;  %v1864_v1 = vadd.f32 %v8049_v22, %v1844_v15  ;;  %v1848_v0 = vmul.f32 %v8047_v40, %v7802_v27  ;;  %v1849_v31 = vmul.f32 %v8047_v40, %v4711_v46 }
 0x40a   :  { %v1812_v57 = vadd.f32 %v1811_v11, %v1810_v37  ;;  %v1726_v49 = vadd.f32 %v1725_v32, %v1724_v48  ;;  %v1898_v28 = vadd.f32 %v8051_v58, %v8050_v3  ;;  %v1865_v62 = vadd.f32 %v8049_v22, %v1845_v9 }
 0x40b   :  { %v1879_v12 = vmax.f32 %v1863_v8, 0.0  ;;  %v8053_v36 = vmax.f32 %v8052_v33, 0.0  ;;  %v1817_v21 = vsel %vm349_vm0, %v1788_v20, 0.0  ;;  %v1866_v13 = vadd.f32 %v8049_v22, %v1846_v29 }
 0x40c   :  { %v1814_v35 = vadd.f32 %v1813_v56, %v1812_v57  ;;  %v1727_v4 = vrot.slane %v1726_v49, 2  ;;  %v1867_v55 = vadd.f32 %v8049_v22, %v1847_v25  ;;  %v1880_v7 = vmax.f32 %v1864_v1, 0.0  ;;  %v8058_v57 = vld [vmem:[#allocation112_spill] sm:$0xff] }
 0x40d   :  { %v1899_v38 = vsel %vm349_vm0, %v8053_v36, 0.0  ;;  %v8055_v42 = vmax.f32 %v8054_v60, 0.0  ;;  %v1819_v26 = vsel %vm349_vm0, %v1789_v14, 0.0  ;;  %v1868_v18 = vadd.f32 %v8049_v22, %v1848_v0  ;;  %v8057_v14 = vld [vmem:[#allocation114_spill] sm:$0xff] }
 0x40e   :  { %v1816_v10 = vadd.f32 %v1815_v63, %v1814_v35  ;;  %v1900_v52 = vadd.f32 %v1899_v38, %v1898_v28  ;;  %v1728_v53 = vadd.f32 %v1727_v4, %v1726_v49  ;;  %v1869_v17 = vadd.f32 %v8049_v22, %v1849_v31 }
 0x40f   :  { %v1901_v6 = vsel %vm349_vm0, %v8055_v42, 0.0  ;;  %v1881_v48 = vmax.f32 %v1865_v62, 0.0  ;;  %v1903_v24 = vsel %vm349_vm0, %v1879_v12, 0.0  ;;  %v1882_v40 = vmax.f32 %v1866_v13, 0.0 }
 0x410   :  { %v1818_v43 = vadd.f32 %v1817_v21, %v1816_v10  ;;  %v1902_v47 = vadd.f32 %v1901_v6, %v1900_v52  ;;  %v1729_v50 = vrot.slane %v1728_v53, 1  ;;  %v1940_v20 = vmul.f32 %v8056_v34, %v4650_v23 }
 0x411   :  { %v1883_v32 = vmax.f32 %v1867_v55, 0.0  ;;  %v1905_v11 = vsel %vm349_vm0, %v1880_v7, 0.0  ;;  %v1941_v9 = vmul.f32 %v8056_v34, %v4655_v44  ;;  %v1993_v16 = vsel %vm349_vm0, %v1972_v2, 0.0 }
 0x412   :  { %v1820_v39 = vadd.f32 %v1819_v26, %v1818_v43  ;;  %v1904_v15 = vadd.f32 %v1903_v24, %v1902_v47  ;;  %v1730_v37 = vadd.f32 %v1729_v50, %v1728_v53  ;;  %v1959_v56 = vadd.f32 %v8058_v57, %v8057_v14 }
 0x413   :  { %v1884_v29 = vmax.f32 %v1868_v18, 0.0  ;;  %v1885_v23 = vmax.f32 %v1869_v17, 0.0  ;;  %v1907_v49 = vsel %vm349_vm0, %v1881_v48, 0.0  ;;  %v1942_v63 = vmul.f32 %v8056_v34, %v4659_v19 }
 0x414   :  { %v1821_v22 = vrot.slane %v1820_v39, 4  ;;  %v1906_v8 = vadd.f32 %v1905_v11, %v1904_v15  ;;  %1731 = vst.msk [vmem:[#allocation2 + $0xc] sm:$0x1] %vm578_vm3, %v1730_v37  ;;  %v1909_v51 = vsel %vm349_vm0, %v1882_v40, 0.0  ;;  %v1960_v2 = vadd.f32 %v8058_v57, %v1940_v20 }
 0x415   :  { %v1911_v1 = vsel %vm349_vm0, %v1883_v32, 0.0  ;;  %v1943_v35 = vmul.f32 %v8056_v34, %v7801_v5  ;;  %v1961_v0 = vadd.f32 %v8058_v57, %v1941_v9  ;;  %v1994_v31 = vadd.f32 %v1993_v16, %v7331_v45 }
 0x416   :  { %v1822_v25 = vadd.f32 %v1821_v22, %v1820_v39  ;;  %v1908_v44 = vadd.f32 %v1907_v49, %v1906_v8  ;;  %v1975_v28 = vmax.f32 %v1959_v56, 0.0  ;;  %v1995_v19 = vsel %vm349_vm0, %v1973_v59, 0.0 }
 0x417   :  { %v1913_v4 = vsel %vm349_vm0, %v1884_v29, 0.0  ;;  %v1944_v62 = vmul.f32 %v8056_v34, %v7802_v27  ;;  %v1962_v12 = vadd.f32 %v8058_v57, %v1942_v63  ;;  %v1996_v33 = vadd.f32 %v1995_v19, %v1994_v31 }
 0x418   :  { %v1823_v3 = vrot.slane %v1822_v25, 2  ;;  %v1910_v58 = vadd.f32 %v1909_v51, %v1908_v44  ;;  %v1976_v38 = vmax.f32 %v1960_v2, 0.0  ;;  %v1997_v45 = vsel %vm349_vm0, %v1974_v30, 0.0  ;;  %v3569_v44 = vpop.permute.xlu0 %3568 }
 0x419   :  { %v1945_v41 = vmul.f32 %v8056_v34, %v4711_v46  ;;  %v1963_v59 = vadd.f32 %v8058_v57, %v1943_v35  ;;  %v1998_v10 = vadd.f32 %v1997_v45, %v1996_v33  ;;  %v1977_v52 = vmax.f32 %v1961_v0, 0.0  ;;  %v3574_v35 = vpop.permute.xlu1 %3573 }
 0x41a   :  { %v1824_v5 = vadd.f32 %v1823_v3, %v1822_v25  ;;  %v1912_v36 = vadd.f32 %v1911_v1, %v1910_v58  ;;  %v1999_v27 = vsel %vm349_vm0, %v1975_v28, 0.0  ;;  %v1915_v53 = vsel %vm349_vm0, %v1885_v23, 0.0  ;;  %v3556_v23 = vld [vmem:[#allocation2] sm:$0xff] }
 0x41b   :  { %v1964_v61 = vadd.f32 %v8058_v57, %v1944_v62  ;;  %v2000_v55 = vadd.f32 %v1999_v27, %v1998_v10  ;;  %v1978_v60 = vmax.f32 %v1962_v12, 0.0  ;;  %v2001_v46 = vsel %vm349_vm0, %v1976_v38, 0.0  ;;  %v3889_v25 = vld [vmem:[%s7427_s5] sm:$0xff]  }
 0x41c   :  { %v1825_v21 = vrot.slane %v1824_v5, 1  ;;  %v1914_v13 = vadd.f32 %v1913_v4, %v1912_v36  ;;  %v1965_v43 = vadd.f32 %v8058_v57, %v1945_v41  ;;  %v1979_v26 = vmax.f32 %v1963_v59, 0.0 }
 0x41d   :  { %v2002_v42 = vadd.f32 %v2001_v46, %v2000_v55  ;;  %v2003_v18 = vsel %vm349_vm0, %v1977_v52, 0.0  ;;  %v1980_v50 = vmax.f32 %v1964_v61, 0.0  ;;  %v2005_v17 = vsel %vm349_vm0, %v1978_v60, 0.0 }
 0x41e   :  { %v1826_v30 = vadd.f32 %v1825_v21, %v1824_v5  ;;  %v1916_v7 = vadd.f32 %v1915_v53, %v1914_v13  ;;  %v1981_v39 = vmax.f32 %v1965_v43, 0.0  ;;  %v2007_v40 = vsel %vm349_vm0, %v1979_v26, 0.0 }
 0x41f   :  { %v2004_v54 = vadd.f32 %v2003_v18, %v2002_v42  ;;  %v2009_v20 = vsel %vm349_vm0, %v1980_v50, 0.0 }
 0x420   :  { %1827 = vst.msk [vmem:[#allocation2 + $0xd] sm:$0x1] %vm578_vm3, %v1826_v30  ;;  %v1917_v6 = vrot.slane %v1916_v7, 4  ;;  %v2011_v11 = vsel %vm349_vm0, %v1981_v39, 0.0 }
 0x421   :  { %v2006_v48 = vadd.f32 %v2005_v17, %v2004_v54 }
 0x422   :  { %v1918_v47 = vadd.f32 %v1917_v6, %v1916_v7 }
 0x423   :  { %v2008_v15 = vadd.f32 %v2007_v40, %v2006_v48 }
 0x424   :  { %v1919_v24 = vrot.slane %v1918_v47, 2 }
 0x425   :  { %v2010_v37 = vadd.f32 %v2009_v20, %v2008_v15 }
 0x426   :  { %v1920_v34 = vadd.f32 %v1919_v24, %v1918_v47 }
 0x427   :  { %v2012_v9 = vadd.f32 %v2011_v11, %v2010_v37 }
 0x428   :  { %v1921_v32 = vrot.slane %v1920_v34, 1 }
 0x429   :  { %v2013_v22 = vrot.slane %v2012_v9, 4 }
 0x42a   :  { %v1922_v16 = vadd.f32 %v1921_v32, %v1920_v34 }
 0x42b   :  { %v2014_v8 = vadd.f32 %v2013_v22, %v2012_v9 }
 0x42c   :  { %1923 = vst.msk [vmem:[#allocation2 + $0xe] sm:$0x1] %vm578_vm3, %v1922_v16 }
 0x42d   :  { %v2015_v14 = vrot.slane %v2014_v8, 2 }
 0x42f   :  { %v2016_v57 = vadd.f32 %v2015_v14, %v2014_v8 }
 0x431   :  { %v2017_v56 = vrot.slane %v2016_v57, 1 }
 0x433   :  { %v2018_v29 = vadd.f32 %v2017_v56, %v2016_v57 }
 0x435   :  { %2019 = vst.msk [vmem:[#allocation2 + $0xf] sm:$0x1] %vm578_vm3, %v2018_v29 }
 0x43c   :  { %v3557_v49 = vld [vmem:[#allocation2 + $0x8] sm:$0xff] }
 0x43d   :  { %v3560_v63 = vpack.c.bf16 %v3557_v49, %v3556_v23 }
 0x43f   :  { %3716 = vmatpush3.bf16.msra.mxu1 %v3560_v63 }
 0x442   :  { %3718 = vmatmul.mubr.msk.bf16.vlgmr.msra.gmra.mxu1 %vm3581_vm5, %v3889_v25 }
 0x502   :  { %v3619_v51 = vpop.f32.mrf.mxu1 }
 0x503   :  { %v3620_v2 = vadd.f32 %v3619_v51, %v3569_v44 }
 0x504   :  { %v3719_v1 = vpop.f32.mrf.mxu1 }
 0x505   :  { %3626 = vst.msk [vmem:[#allocation3] sm:$0xff] %vm349_vm0, %v3620_v2 }
 0x506   :  { %v3622_v0 = vpop.f32.mrf.mxu1 }
 0x507   :  { %v3623_v31 = vadd.f32 %v3622_v0, %v3574_v35 }
 0x508   :  { %v3720_v3 = vpop.f32.mrf.mxu1 }
 0x509   :  { %3627 = vst.msk [vmem:[#allocation3 + $0x8] sm:$0xff] %vm349_vm0, %v3623_v31 }
 0x50a   :  { %3905 = shalt.err (!%p3902_p4)
}
 0x50b   :  { %s3920_s5 = smov 128   ;;  %s3921_s22 = smov 8  }
 0x50c   :  { %3639 = dma.vmem_to_hbm [thread:$0]  %s3634_s21, 256, %s7429_s7, [#allocation4], %s3920_s5, %s3920_s5, %s3921_s22  }
 0x50d   :  { %3914 = dma.done.wait [#allocation4], 256  }
 0x50e   :  { %3915 = vsyncadd [#allocation4], 4294967040 }
 0x50f   :  { %3643 = vsyncpa [#allocation4], 1 }

</bundles_post_ra>
